<compile_context>
chip_gen: v6e
topology: v6e:2x2x1
jax: 0.10.0
libtpu: 0.0.40
codegen_flags: <defaults>
</compile_context>

<pallas_src>
import numpy as np
import jax
import jax.numpy as jnp
from jax.experimental import pallas as pl
from jax.experimental.pallas import tpu as pltpu

EPS = 1e-5

_FIX_KERNELS = np.stack([
    np.array([[-1, 0, 1], [-2, 0, 2], [-1, 0, 1]], np.float32),       # sobel_x
    np.array([[-1, -2, -1], [0, 0, 0], [1, 2, 1]], np.float32),       # sobel_y
    np.array([[-1, -1, -1], [-1, 8, -1], [-1, -1, -1]], np.float32),  # high_pass
    np.array([[0, 1, 0], [1, -4, 1], [0, 1, 0]], np.float32),         # laplacian
    np.array([[0, -1, 0], [-1, 5, -1], [0, -1, 0]], np.float32),      # sharpen
])


# ----------------------------- the single fused Pallas kernel -----------------------------

def model1k_kernel(x_ref, g1_ref, b1_ref, g2_ref, b2_ref, g3_ref, b3_ref,
                   wh_ref, bh_ref, o_ref):
    # x_ref : (bb, 32, 96)   input rows, (w, c) flattened channel-minor
    # gK_ref: (3, Win*Cin, Wout*Cout) per-row-tap folded conv+BN matrices, bK_ref: (1, Wout*Cout)
    # wh_ref: (54, 100) pooled-head matrix (pool * w1 @ w2 folded), bh_ref: (1, 100)
    # o_ref : (bb, 1, 100)

    def stage(rows, g_ref, b_ref, n_out):
        # One conv stage, fully unrolled over output rows.  Output row i uses padded input rows
        # 2i+ky (ky=0..2) -> real rows 2i+ky-1; out-of-range rows are the zero padding -> skipped.
        brow = b_ref[...]                                      # (1, Wout*Cout)
        n_in = len(rows)
        out_rows = []
        for i in range(n_out):
            acc = None
            for ky in range(3):
                rr = 2 * i + ky - 1
                if 0 <= rr < n_in:
                    t = jnp.dot(rows[rr], g_ref[ky],
                                preferred_element_type=jnp.float32)
                    acc = t if acc is None else acc + t
            out_rows.append(jnp.maximum(acc + brow, 0.0))      # bias + BN shift + ReLU (folded)
        return out_rows

    h0 = x_ref.shape[1]
    rows0 = [x_ref[:, r, :] for r in range(h0)]                # 32 x (bb, 96)

    n1 = (h0 - 1) // 2 + 1                                     # 16
    rows1 = stage(rows0, g1_ref, b1_ref, n1)                   # 16 x (bb, 176)
    n2 = (n1 - 1) // 2 + 1                                     # 8
    rows2 = stage(rows1, g2_ref, b2_ref, n2)                   # 8  x (bb, 96)
    rows3 = stage(rows2, g3_ref, b3_ref, 3)                    # only the 3 rows the 3x3 pool uses

    # AvgPool2d(3) + low-rank classifier: pool/Wlow already folded into wh_ref.
    s = rows3[0] + rows3[1] + rows3[2]                         # (bb, 54)
    out = jnp.dot(s, wh_ref[...], preferred_element_type=jnp.float32) + bh_ref[...]
    o_ref[:, 0, :] = out                                       # lane-dense (bb, 100) store


# ----------------------------- parameter folding (one-time, exact f32 numpy) -----------------------------

def _conv_row_matrices(wt, beta, win, wo_keep):
    """wt: (3,3,Cin,Cout) BN-folded conv weight -> G (3, win*Cin, wo_keep*Cout), bias row (1, .).

    G[ky] maps one unpadded input row (w,c flattened) to one unpadded output row (j,co flattened),
    absorbing the 3 taps along W, stride 2 and the zero padding (pad=1)."""
    cin, cout = wt.shape[2], wt.shape[3]
    sel = np.zeros((win, wo_keep, 3), np.float32)
    for j in range(wo_keep):
        for kx in range(3):
            w = 2 * j + kx - 1                   # padded col 2j+kx -> real col (pad dropped)
            if 0 <= w < win:
                sel[w, j, kx] = 1.0
    g = np.einsum('wjk,ykcd->ywcjd', sel, wt).reshape(3, win * cin, wo_keep * cout)
    brow = np.tile(beta, wo_keep)[None, :]       # index j*Cout+co -> beta[co]
    return g.astype(np.float32), brow.astype(np.float32)


def fold_params(params):
    p = {k: ({kk: np.asarray(vv) for kk, vv in v.items()} if isinstance(v, dict) else np.asarray(v))
         for k, v in params.items()}

    def bn_fold(bn):
        a = bn["gamma"] / np.sqrt(bn["var"] + EPS)
        return a, bn["beta"] - bn["mean"] * a

    # stage 1: 5 fixed filters (channels 0..4, summed over input channels) || dw-sep conv1 (5..10), BN1
    wt_fix = np.broadcast_to(np.transpose(_FIX_KERNELS, (1, 2, 0))[:, :, None, :], (3, 3, 3, 5))
    wt_ds1 = np.einsum('cyx,cd->yxcd', p["dw1"], p["pw1"])
    wt1 = np.concatenate([wt_fix, wt_ds1], axis=-1)                              # (3,3,3,11)
    beta1 = np.concatenate([np.zeros(5, np.float32), p["bdw1"] @ p["pw1"] + p["bpw1"]])
    a1, c1 = bn_fold(p["bn1"]); wt1 = wt1 * a1; beta1 = beta1 * a1 + c1

    def ds_stage(dw, bdw, pw, bpw, bn):
        wt = np.einsum('cyx,cd->yxcd', dw, pw)
        beta = bdw @ pw + bpw
        a, c = bn_fold(bn)
        return wt * a, beta * a + c

    wt2, beta2 = ds_stage(p["dw2"], p["bdw2"], p["pw2"], p["bpw2"], p["bn2"])
    wt3, beta3 = ds_stage(p["dw3"], p["bdw3"], p["pw3"], p["bpw3"], p["bn3"])

    g1, brow1 = _conv_row_matrices(wt1, beta1, win=32, wo_keep=16)
    g2, brow2 = _conv_row_matrices(wt2, beta2, win=16, wo_keep=8)
    g3, brow3 = _conv_row_matrices(wt3, beta3, win=8, wo_keep=3)   # 3x3 pool only uses cols 0..2

    # AvgPool2d(3) (rows/cols 0..2 of the 4x4 map, /9) + Linear(18,5) + Linear(5,100), folded.
    wlow = p["w1"] @ p["w2"]                                       # (18, 100)
    whead = np.tile(wlow / 9.0, (3, 1)).astype(np.float32)         # row j*18+co -> Wlow[co]/9
    bh = (p["b1"] @ p["w2"] + p["b2"])[None, :].astype(np.float32)

    f = jnp.asarray
    return dict(G1=f(g1), brow1=f(brow1), G2=f(g2), brow2=f(brow2),
                G3=f(g3), brow3=f(brow3), Whead=f(whead), bh=f(bh))


# ----------------------------- forward -----------------------------

def model_1k_forward(folded, x_nchw):
    x = jnp.transpose(x_nchw, (0, 2, 3, 1)).astype(jnp.float32)   # NCHW -> NHWC
    B, H, W, C = x.shape
    xr = x.reshape(B, H, W * C)                                   # rows: (w, c) flattened

    # >=2 grid steps whenever possible so v7x can megacore-shard the batch; single TC chips just
    # run the steps back-to-back (weights stay VMEM-resident via constant index maps).
    bb = B // 2 if (B >= 2 and B % 2 == 0) else B
    grid = (B // bb,)

    def const_spec(shape):
        return pl.BlockSpec(shape, lambda b: (0,) * len(shape))

    out = pl.pallas_call(
        model1k_kernel,
        grid=grid,
        in_specs=[
            pl.BlockSpec((bb, H, W * C), lambda b: (b, 0, 0)),
            const_spec(folded["G1"].shape), const_spec(folded["brow1"].shape),
            const_spec(folded["G2"].shape), const_spec(folded["brow2"].shape),
            const_spec(folded["G3"].shape), const_spec(folded["brow3"].shape),
            const_spec(folded["Whead"].shape), const_spec(folded["bh"].shape),
        ],
        out_specs=pl.BlockSpec((bb, 1, 100), lambda b: (b, 0, 0)),
        out_shape=jax.ShapeDtypeStruct((B, 1, 100), jnp.float32),
        compiler_params=pltpu.CompilerParams(dimension_semantics=("parallel",)),
    )(xr, folded["G1"], folded["brow1"], folded["G2"], folded["brow2"],
      folded["G3"], folded["brow3"], folded["Whead"], folded["bh"])
    return out[:, 0, :]                                           # (B, 100)


# ----------------------------- pure-JAX reference (for self-check) -----------------------------

def _conv2d(x, w, stride, padding, groups=1):
    return jax.lax.conv_general_dilated(
        x, w, (stride, stride), padding,
        dimension_numbers=('NCHW', 'OIHW', 'NCHW'),
        feature_group_count=groups, precision=jax.lax.Precision.HIGHEST)


def reference_forward(params, x):
    x = x.astype(jnp.float32)

    def dsconv(x, dw, bdw, pw, bpw):
        c = dw.shape[0]
        y = _conv2d(x, dw[:, None], 2, ((1, 1), (1, 1)), groups=c) + bdw[None, :, None, None]
        y = _conv2d(y, jnp.transpose(pw)[:, :, None, None], 1, ((0, 0), (0, 0))) + bpw[None, :, None, None]
        return y

    def fixedconv(x, k3):
        w = jnp.broadcast_to(k3[None, None], (1, x.shape[1], 3, 3))
        return _conv2d(x, w, 2, ((1, 1), (1, 1)))

    def bn(z, q):
        a = q["gamma"] / jnp.sqrt(q["var"] + EPS)
        return z * a[None, :, None, None] + (q["beta"] - q["mean"] * a)[None, :, None, None]

    fix = jnp.asarray(_FIX_KERNELS)
    feats = [fixedconv(x, fix[i]) for i in range(5)]
    y1 = dsconv(x, params["dw1"], params["bdw1"], params["pw1"], params["bpw1"])
    z = jax.nn.relu(bn(jnp.concatenate(feats + [y1], axis=1), params["bn1"]))
    z = jax.nn.relu(bn(dsconv(z, params["dw2"], params["bdw2"], params["pw2"], params["bpw2"]), params["bn2"]))
    z = jax.nn.relu(bn(dsconv(z, params["dw3"], params["bdw3"], params["pw3"], params["bpw3"]), params["bn3"]))
    pooled = jnp.mean(z[:, :, 0:3, 0:3], axis=(2, 3))             # AvgPool2d((3,3)): 4x4 -> 1x1
    h = jnp.matmul(pooled, params["w1"], precision=jax.lax.Precision.HIGHEST) + params["b1"]
    return jnp.matmul(h, params["w2"], precision=jax.lax.Precision.HIGHEST) + params["b2"]


# ----------------------------- params -----------------------------

def _bn_init(key, c):
    k1, k2, k3, k4 = jax.random.split(key, 4)
    return dict(gamma=jax.random.uniform(k1, (c,), jnp.float32, 0.5, 1.5),
                beta=0.1 * jax.random.normal(k2, (c,), jnp.float32),
                mean=0.1 * jax.random.normal(k3, (c,), jnp.float32),
                var=jax.random.uniform(k4, (c,), jnp.float32, 0.5, 1.5))


def init_params(key):
    ks = jax.random.split(key, 16)
    n = lambda k, s, sc=0.2: sc * jax.random.normal(k, s, jnp.float32)
    return dict(
        dw1=n(ks[0], (3, 3, 3)),   bdw1=n(ks[1], (3,)),
        pw1=n(ks[2], (3, 6)),      bpw1=n(ks[3], (6,)),
        bn1=_bn_init(ks[4], 11),
        dw2=n(ks[5], (11, 3, 3)),  bdw2=n(ks[6], (11,)),
        pw2=n(ks[7], (11, 12)),    bpw2=n(ks[8], (12,)),
        bn2=_bn_init(ks[9], 12),
        dw3=n(ks[10], (12, 3, 3)), bdw3=n(ks[11], (12,)),
        pw3=n(ks[12], (12, 18)),   bpw3=n(ks[13], (18,)),
        bn3=_bn_init(ks[14], 18),
        w1=n(ks[15], (18, 5)),     b1=jnp.zeros((5,), jnp.float32),
        w2=n(jax.random.fold_in(key, 99), (5, 100)), b2=jnp.zeros((100,), jnp.float32),
    )


if __name__ == "__main__":
    key = jax.random.PRNGKey(0)
    k_in, k_params = jax.random.split(key)
    # CIFAR-like input: 3 stride-2 convs (32 -> 16 -> 8 -> 4), AvgPool2d(3) -> 1x1, 18 -> 100.
    B, C, H, W = 2, 3, 32, 32
    x = jax.random.normal(k_in, (B, C, H, W), jnp.float32)

    params = init_params(k_params)
    folded = fold_params(params)            # one-time exact f32 folding, hoisted out of the forward

    fwd = jax.jit(model_1k_forward)
    out = jax.block_until_ready(fwd(folded, x))

    assert out.shape == (B, 100), out.shape
    assert bool(jnp.all(jnp.isfinite(out)))

    ref = jax.block_until_ready(reference_forward(params, x))
    err = float(jnp.max(jnp.abs(out - ref)))
    assert err < 5e-3, f"max abs err vs reference = {err}"

    print("KERNEL_OK")
</pallas_src>

<mosaic_0001>
module attributes {stable_mosaic.version = 11 : i64} {
  func.func @model1k_kernel(%arg0: i32, %arg1: memref<1x32x96xf32, #tpu.memory_space<vmem>>, %arg2: memref<3x96x176xf32, #tpu.memory_space<vmem>>, %arg3: memref<1x176xf32, #tpu.memory_space<vmem>>, %arg4: memref<3x176x96xf32, #tpu.memory_space<vmem>>, %arg5: memref<1x96xf32, #tpu.memory_space<vmem>>, %arg6: memref<3x96x54xf32, #tpu.memory_space<vmem>>, %arg7: memref<1x54xf32, #tpu.memory_space<vmem>>, %arg8: memref<54x100xf32, #tpu.memory_space<vmem>>, %arg9: memref<1x100xf32, #tpu.memory_space<vmem>>, %arg10: memref<1x1x100xf32, #tpu.memory_space<vmem>>) attributes {dimension_semantics = [#tpu.dimension_semantics<parallel>], iteration_bounds = array<i64: 2>, scalar_prefetch = 0 : i64, scratch_operands = 0 : i64, tpu.core_type = #tpu.core_type<tc>, window_params = [{transform_indices = @transform_0, window_bounds = array<i64: 1, 32, 96>}, {pipeline_mode = #tpu.pipeline_mode<synchronous>, transform_indices = @transform_1, window_bounds = array<i64: 3, 96, 176>}, {pipeline_mode = #tpu.pipeline_mode<synchronous>, transform_indices = @transform_2, window_bounds = array<i64: 1, 176>}, {pipeline_mode = #tpu.pipeline_mode<synchronous>, transform_indices = @transform_3, window_bounds = array<i64: 3, 176, 96>}, {pipeline_mode = #tpu.pipeline_mode<synchronous>, transform_indices = @transform_4, window_bounds = array<i64: 1, 96>}, {pipeline_mode = #tpu.pipeline_mode<synchronous>, transform_indices = @transform_5, window_bounds = array<i64: 3, 96, 54>}, {pipeline_mode = #tpu.pipeline_mode<synchronous>, transform_indices = @transform_6, window_bounds = array<i64: 1, 54>}, {pipeline_mode = #tpu.pipeline_mode<synchronous>, transform_indices = @transform_7, window_bounds = array<i64: 54, 100>}, {pipeline_mode = #tpu.pipeline_mode<synchronous>, transform_indices = @transform_8, window_bounds = array<i64: 1, 100>}, {transform_indices = @transform_9, window_bounds = array<i64: 1, 1, 100>}]} {
    %c0 = arith.constant 0 : index
    %c0_0 = arith.constant 0 : index
    %c0_1 = arith.constant 0 : index
    %0 = vector.load %arg1[%c0, %c0_0, %c0_1] : memref<1x32x96xf32, #tpu.memory_space<vmem>>, vector<1x1x96xf32>
    %1 = vector.shape_cast %0 : vector<1x1x96xf32> to vector<1x96xf32>
    %c0_2 = arith.constant 0 : index
    %c1 = arith.constant 1 : index
    %c0_3 = arith.constant 0 : index
    %2 = vector.load %arg1[%c0_2, %c1, %c0_3] : memref<1x32x96xf32, #tpu.memory_space<vmem>>, vector<1x1x96xf32>
    %3 = vector.shape_cast %2 : vector<1x1x96xf32> to vector<1x96xf32>
    %c0_4 = arith.constant 0 : index
    %c2 = arith.constant 2 : index
    %c0_5 = arith.constant 0 : index
    %4 = vector.load %arg1[%c0_4, %c2, %c0_5] : memref<1x32x96xf32, #tpu.memory_space<vmem>>, vector<1x1x96xf32>
    %5 = vector.shape_cast %4 : vector<1x1x96xf32> to vector<1x96xf32>
    %c0_6 = arith.constant 0 : index
    %c3 = arith.constant 3 : index
    %c0_7 = arith.constant 0 : index
    %6 = vector.load %arg1[%c0_6, %c3, %c0_7] : memref<1x32x96xf32, #tpu.memory_space<vmem>>, vector<1x1x96xf32>
    %7 = vector.shape_cast %6 : vector<1x1x96xf32> to vector<1x96xf32>
    %c0_8 = arith.constant 0 : index
    %c4 = arith.constant 4 : index
    %c0_9 = arith.constant 0 : index
    %8 = vector.load %arg1[%c0_8, %c4, %c0_9] : memref<1x32x96xf32, #tpu.memory_space<vmem>>, vector<1x1x96xf32>
    %9 = vector.shape_cast %8 : vector<1x1x96xf32> to vector<1x96xf32>
    %c0_10 = arith.constant 0 : index
    %c5 = arith.constant 5 : index
    %c0_11 = arith.constant 0 : index
    %10 = vector.load %arg1[%c0_10, %c5, %c0_11] : memref<1x32x96xf32, #tpu.memory_space<vmem>>, vector<1x1x96xf32>
    %11 = vector.shape_cast %10 : vector<1x1x96xf32> to vector<1x96xf32>
    %c0_12 = arith.constant 0 : index
    %c6 = arith.constant 6 : index
    %c0_13 = arith.constant 0 : index
    %12 = vector.load %arg1[%c0_12, %c6, %c0_13] : memref<1x32x96xf32, #tpu.memory_space<vmem>>, vector<1x1x96xf32>
    %13 = vector.shape_cast %12 : vector<1x1x96xf32> to vector<1x96xf32>
    %c0_14 = arith.constant 0 : index
    %c7 = arith.constant 7 : index
    %c0_15 = arith.constant 0 : index
    %14 = vector.load %arg1[%c0_14, %c7, %c0_15] : memref<1x32x96xf32, #tpu.memory_space<vmem>>, vector<1x1x96xf32>
    %15 = vector.shape_cast %14 : vector<1x1x96xf32> to vector<1x96xf32>
    %c0_16 = arith.constant 0 : index
    %c8 = arith.constant 8 : index
    %c0_17 = arith.constant 0 : index
    %16 = vector.load %arg1[%c0_16, %c8, %c0_17] : memref<1x32x96xf32, #tpu.memory_space<vmem>>, vector<1x1x96xf32>
    %17 = vector.shape_cast %16 : vector<1x1x96xf32> to vector<1x96xf32>
    %c0_18 = arith.constant 0 : index
    %c9 = arith.constant 9 : index
    %c0_19 = arith.constant 0 : index
    %18 = vector.load %arg1[%c0_18, %c9, %c0_19] : memref<1x32x96xf32, #tpu.memory_space<vmem>>, vector<1x1x96xf32>
    %19 = vector.shape_cast %18 : vector<1x1x96xf32> to vector<1x96xf32>
    %c0_20 = arith.constant 0 : index
    %c10 = arith.constant 10 : index
    %c0_21 = arith.constant 0 : index
    %20 = vector.load %arg1[%c0_20, %c10, %c0_21] : memref<1x32x96xf32, #tpu.memory_space<vmem>>, vector<1x1x96xf32>
    %21 = vector.shape_cast %20 : vector<1x1x96xf32> to vector<1x96xf32>
    %c0_22 = arith.constant 0 : index
    %c11 = arith.constant 11 : index
    %c0_23 = arith.constant 0 : index
    %22 = vector.load %arg1[%c0_22, %c11, %c0_23] : memref<1x32x96xf32, #tpu.memory_space<vmem>>, vector<1x1x96xf32>
    %23 = vector.shape_cast %22 : vector<1x1x96xf32> to vector<1x96xf32>
    %c0_24 = arith.constant 0 : index
    %c12 = arith.constant 12 : index
    %c0_25 = arith.constant 0 : index
    %24 = vector.load %arg1[%c0_24, %c12, %c0_25] : memref<1x32x96xf32, #tpu.memory_space<vmem>>, vector<1x1x96xf32>
    %25 = vector.shape_cast %24 : vector<1x1x96xf32> to vector<1x96xf32>
    %c0_26 = arith.constant 0 : index
    %c13 = arith.constant 13 : index
    %c0_27 = arith.constant 0 : index
    %26 = vector.load %arg1[%c0_26, %c13, %c0_27] : memref<1x32x96xf32, #tpu.memory_space<vmem>>, vector<1x1x96xf32>
    %27 = vector.shape_cast %26 : vector<1x1x96xf32> to vector<1x96xf32>
    %c0_28 = arith.constant 0 : index
    %c14 = arith.constant 14 : index
    %c0_29 = arith.constant 0 : index
    %28 = vector.load %arg1[%c0_28, %c14, %c0_29] : memref<1x32x96xf32, #tpu.memory_space<vmem>>, vector<1x1x96xf32>
    %29 = vector.shape_cast %28 : vector<1x1x96xf32> to vector<1x96xf32>
    %c0_30 = arith.constant 0 : index
    %c15 = arith.constant 15 : index
    %c0_31 = arith.constant 0 : index
    %30 = vector.load %arg1[%c0_30, %c15, %c0_31] : memref<1x32x96xf32, #tpu.memory_space<vmem>>, vector<1x1x96xf32>
    %31 = vector.shape_cast %30 : vector<1x1x96xf32> to vector<1x96xf32>
    %c0_32 = arith.constant 0 : index
    %c16 = arith.constant 16 : index
    %c0_33 = arith.constant 0 : index
    %32 = vector.load %arg1[%c0_32, %c16, %c0_33] : memref<1x32x96xf32, #tpu.memory_space<vmem>>, vector<1x1x96xf32>
    %33 = vector.shape_cast %32 : vector<1x1x96xf32> to vector<1x96xf32>
    %c0_34 = arith.constant 0 : index
    %c17 = arith.constant 17 : index
    %c0_35 = arith.constant 0 : index
    %34 = vector.load %arg1[%c0_34, %c17, %c0_35] : memref<1x32x96xf32, #tpu.memory_space<vmem>>, vector<1x1x96xf32>
    %35 = vector.shape_cast %34 : vector<1x1x96xf32> to vector<1x96xf32>
    %c0_36 = arith.constant 0 : index
    %c18 = arith.constant 18 : index
    %c0_37 = arith.constant 0 : index
    %36 = vector.load %arg1[%c0_36, %c18, %c0_37] : memref<1x32x96xf32, #tpu.memory_space<vmem>>, vector<1x1x96xf32>
    %37 = vector.shape_cast %36 : vector<1x1x96xf32> to vector<1x96xf32>
    %c0_38 = arith.constant 0 : index
    %c19 = arith.constant 19 : index
    %c0_39 = arith.constant 0 : index
    %38 = vector.load %arg1[%c0_38, %c19, %c0_39] : memref<1x32x96xf32, #tpu.memory_space<vmem>>, vector<1x1x96xf32>
    %39 = vector.shape_cast %38 : vector<1x1x96xf32> to vector<1x96xf32>
    %c0_40 = arith.constant 0 : index
    %c20 = arith.constant 20 : index
    %c0_41 = arith.constant 0 : index
    %40 = vector.load %arg1[%c0_40, %c20, %c0_41] : memref<1x32x96xf32, #tpu.memory_space<vmem>>, vector<1x1x96xf32>
    %41 = vector.shape_cast %40 : vector<1x1x96xf32> to vector<1x96xf32>
    %c0_42 = arith.constant 0 : index
    %c21 = arith.constant 21 : index
    %c0_43 = arith.constant 0 : index
    %42 = vector.load %arg1[%c0_42, %c21, %c0_43] : memref<1x32x96xf32, #tpu.memory_space<vmem>>, vector<1x1x96xf32>
    %43 = vector.shape_cast %42 : vector<1x1x96xf32> to vector<1x96xf32>
    %c0_44 = arith.constant 0 : index
    %c22 = arith.constant 22 : index
    %c0_45 = arith.constant 0 : index
    %44 = vector.load %arg1[%c0_44, %c22, %c0_45] : memref<1x32x96xf32, #tpu.memory_space<vmem>>, vector<1x1x96xf32>
    %45 = vector.shape_cast %44 : vector<1x1x96xf32> to vector<1x96xf32>
    %c0_46 = arith.constant 0 : index
    %c23 = arith.constant 23 : index
    %c0_47 = arith.constant 0 : index
    %46 = vector.load %arg1[%c0_46, %c23, %c0_47] : memref<1x32x96xf32, #tpu.memory_space<vmem>>, vector<1x1x96xf32>
    %47 = vector.shape_cast %46 : vector<1x1x96xf32> to vector<1x96xf32>
    %c0_48 = arith.constant 0 : index
    %c0_49 = arith.constant 0 : index
    %48 = vector.load %arg3[%c0_48, %c0_49] : memref<1x176xf32, #tpu.memory_space<vmem>>, vector<1x176xf32>
    %c1_50 = arith.constant 1 : index
    %c0_51 = arith.constant 0 : index
    %c0_52 = arith.constant 0 : index
    %49 = vector.load %arg2[%c1_50, %c0_51, %c0_52] : memref<3x96x176xf32, #tpu.memory_space<vmem>>, vector<1x96x176xf32>
    %50 = vector.shape_cast %49 : vector<1x96x176xf32> to vector<96x176xf32>
    %cst = arith.constant dense<0.000000e+00> : vector<1x176xf32>
    %51 = tpu.matmul %1, %50, %cst {dimension_numbers = #tpu.dot_dimension_numbers<[1], [0], [0], [1], [0, 0, 1, 1], [], []>} : vector<1x96xf32>, vector<96x176xf32>, vector<1x176xf32> -> vector<1x176xf32>
    %c2_53 = arith.constant 2 : index
    %c0_54 = arith.constant 0 : index
    %c0_55 = arith.constant 0 : index
    %52 = vector.load %arg2[%c2_53, %c0_54, %c0_55] : memref<3x96x176xf32, #tpu.memory_space<vmem>>, vector<1x96x176xf32>
    %53 = vector.shape_cast %52 : vector<1x96x176xf32> to vector<96x176xf32>
    %cst_56 = arith.constant dense<0.000000e+00> : vector<1x176xf32>
    %54 = tpu.matmul %3, %53, %cst_56 {dimension_numbers = #tpu.dot_dimension_numbers<[1], [0], [0], [1], [0, 0, 1, 1], [], []>} : vector<1x96xf32>, vector<96x176xf32>, vector<1x176xf32> -> vector<1x176xf32>
    %55 = arith.addf %51, %54 : vector<1x176xf32>
    %56 = arith.addf %55, %48 : vector<1x176xf32>
    %cst_57 = arith.constant 0.000000e+00 : f32
    %57 = vector.broadcast %cst_57 : f32 to vector<1x176xf32>
    %58 = arith.maximumf %56, %57 : vector<1x176xf32>
    %c0_58 = arith.constant 0 : index
    %c0_59 = arith.constant 0 : index
    %c0_60 = arith.constant 0 : index
    %59 = vector.load %arg2[%c0_58, %c0_59, %c0_60] : memref<3x96x176xf32, #tpu.memory_space<vmem>>, vector<1x96x176xf32>
    %60 = vector.shape_cast %59 : vector<1x96x176xf32> to vector<96x176xf32>
    %cst_61 = arith.constant dense<0.000000e+00> : vector<1x176xf32>
    %61 = tpu.matmul %3, %60, %cst_61 {dimension_numbers = #tpu.dot_dimension_numbers<[1], [0], [0], [1], [0, 0, 1, 1], [], []>} : vector<1x96xf32>, vector<96x176xf32>, vector<1x176xf32> -> vector<1x176xf32>
    %c1_62 = arith.constant 1 : index
    %c0_63 = arith.constant 0 : index
    %c0_64 = arith.constant 0 : index
    %62 = vector.load %arg2[%c1_62, %c0_63, %c0_64] : memref<3x96x176xf32, #tpu.memory_space<vmem>>, vector<1x96x176xf32>
    %63 = vector.shape_cast %62 : vector<1x96x176xf32> to vector<96x176xf32>
    %cst_65 = arith.constant dense<0.000000e+00> : vector<1x176xf32>
    %64 = tpu.matmul %5, %63, %cst_65 {dimension_numbers = #tpu.dot_dimension_numbers<[1], [0], [0], [1], [0, 0, 1, 1], [], []>} : vector<1x96xf32>, vector<96x176xf32>, vector<1x176xf32> -> vector<1x176xf32>
    %65 = arith.addf %61, %64 : vector<1x176xf32>
    %c2_66 = arith.constant 2 : index
    %c0_67 = arith.constant 0 : index
    %c0_68 = arith.constant 0 : index
    %66 = vector.load %arg2[%c2_66, %c0_67, %c0_68] : memref<3x96x176xf32, #tpu.memory_space<vmem>>, vector<1x96x176xf32>
    %67 = vector.shape_cast %66 : vector<1x96x176xf32> to vector<96x176xf32>
    %cst_69 = arith.constant dense<0.000000e+00> : vector<1x176xf32>
    %68 = tpu.matmul %7, %67, %cst_69 {dimension_numbers = #tpu.dot_dimension_numbers<[1], [0], [0], [1], [0, 0, 1, 1], [], []>} : vector<1x96xf32>, vector<96x176xf32>, vector<1x176xf32> -> vector<1x176xf32>
    %69 = arith.addf %65, %68 : vector<1x176xf32>
    %70 = arith.addf %69, %48 : vector<1x176xf32>
    %cst_70 = arith.constant 0.000000e+00 : f32
    %71 = vector.broadcast %cst_70 : f32 to vector<1x176xf32>
    %72 = arith.maximumf %70, %71 : vector<1x176xf32>
    %c0_71 = arith.constant 0 : index
    %c0_72 = arith.constant 0 : index
    %c0_73 = arith.constant 0 : index
    %73 = vector.load %arg2[%c0_71, %c0_72, %c0_73] : memref<3x96x176xf32, #tpu.memory_space<vmem>>, vector<1x96x176xf32>
    %74 = vector.shape_cast %73 : vector<1x96x176xf32> to vector<96x176xf32>
    %cst_74 = arith.constant dense<0.000000e+00> : vector<1x176xf32>
    %75 = tpu.matmul %7, %74, %cst_74 {dimension_numbers = #tpu.dot_dimension_numbers<[1], [0], [0], [1], [0, 0, 1, 1], [], []>} : vector<1x96xf32>, vector<96x176xf32>, vector<1x176xf32> -> vector<1x176xf32>
    %c1_75 = arith.constant 1 : index
    %c0_76 = arith.constant 0 : index
    %c0_77 = arith.constant 0 : index
    %76 = vector.load %arg2[%c1_75, %c0_76, %c0_77] : memref<3x96x176xf32, #tpu.memory_space<vmem>>, vector<1x96x176xf32>
    %77 = vector.shape_cast %76 : vector<1x96x176xf32> to vector<96x176xf32>
    %cst_78 = arith.constant dense<0.000000e+00> : vector<1x176xf32>
    %78 = tpu.matmul %9, %77, %cst_78 {dimension_numbers = #tpu.dot_dimension_numbers<[1], [0], [0], [1], [0, 0, 1, 1], [], []>} : vector<1x96xf32>, vector<96x176xf32>, vector<1x176xf32> -> vector<1x176xf32>
    %79 = arith.addf %75, %78 : vector<1x176xf32>
    %c2_79 = arith.constant 2 : index
    %c0_80 = arith.constant 0 : index
    %c0_81 = arith.constant 0 : index
    %80 = vector.load %arg2[%c2_79, %c0_80, %c0_81] : memref<3x96x176xf32, #tpu.memory_space<vmem>>, vector<1x96x176xf32>
    %81 = vector.shape_cast %80 : vector<1x96x176xf32> to vector<96x176xf32>
    %cst_82 = arith.constant dense<0.000000e+00> : vector<1x176xf32>
    %82 = tpu.matmul %11, %81, %cst_82 {dimension_numbers = #tpu.dot_dimension_numbers<[1], [0], [0], [1], [0, 0, 1, 1], [], []>} : vector<1x96xf32>, vector<96x176xf32>, vector<1x176xf32> -> vector<1x176xf32>
    %83 = arith.addf %79, %82 : vector<1x176xf32>
    %84 = arith.addf %83, %48 : vector<1x176xf32>
    %cst_83 = arith.constant 0.000000e+00 : f32
    %85 = vector.broadcast %cst_83 : f32 to vector<1x176xf32>
    %86 = arith.maximumf %84, %85 : vector<1x176xf32>
    %c0_84 = arith.constant 0 : index
    %c0_85 = arith.constant 0 : index
    %c0_86 = arith.constant 0 : index
    %87 = vector.load %arg2[%c0_84, %c0_85, %c0_86] : memref<3x96x176xf32, #tpu.memory_space<vmem>>, vector<1x96x176xf32>
    %88 = vector.shape_cast %87 : vector<1x96x176xf32> to vector<96x176xf32>
    %cst_87 = arith.constant dense<0.000000e+00> : vector<1x176xf32>
    %89 = tpu.matmul %11, %88, %cst_87 {dimension_numbers = #tpu.dot_dimension_numbers<[1], [0], [0], [1], [0, 0, 1, 1], [], []>} : vector<1x96xf32>, vector<96x176xf32>, vector<1x176xf32> -> vector<1x176xf32>
    %c1_88 = arith.constant 1 : index
    %c0_89 = arith.constant 0 : index
    %c0_90 = arith.constant 0 : index
    %90 = vector.load %arg2[%c1_88, %c0_89, %c0_90] : memref<3x96x176xf32, #tpu.memory_space<vmem>>, vector<1x96x176xf32>
    %91 = vector.shape_cast %90 : vector<1x96x176xf32> to vector<96x176xf32>
    %cst_91 = arith.constant dense<0.000000e+00> : vector<1x176xf32>
    %92 = tpu.matmul %13, %91, %cst_91 {dimension_numbers = #tpu.dot_dimension_numbers<[1], [0], [0], [1], [0, 0, 1, 1], [], []>} : vector<1x96xf32>, vector<96x176xf32>, vector<1x176xf32> -> vector<1x176xf32>
    %93 = arith.addf %89, %92 : vector<1x176xf32>
    %c2_92 = arith.constant 2 : index
    %c0_93 = arith.constant 0 : index
    %c0_94 = arith.constant 0 : index
    %94 = vector.load %arg2[%c2_92, %c0_93, %c0_94] : memref<3x96x176xf32, #tpu.memory_space<vmem>>, vector<1x96x176xf32>
    %95 = vector.shape_cast %94 : vector<1x96x176xf32> to vector<96x176xf32>
    %cst_95 = arith.constant dense<0.000000e+00> : vector<1x176xf32>
    %96 = tpu.matmul %15, %95, %cst_95 {dimension_numbers = #tpu.dot_dimension_numbers<[1], [0], [0], [1], [0, 0, 1, 1], [], []>} : vector<1x96xf32>, vector<96x176xf32>, vector<1x176xf32> -> vector<1x176xf32>
    %97 = arith.addf %93, %96 : vector<1x176xf32>
    %98 = arith.addf %97, %48 : vector<1x176xf32>
    %cst_96 = arith.constant 0.000000e+00 : f32
    %99 = vector.broadcast %cst_96 : f32 to vector<1x176xf32>
    %100 = arith.maximumf %98, %99 : vector<1x176xf32>
    %c0_97 = arith.constant 0 : index
    %c0_98 = arith.constant 0 : index
    %c0_99 = arith.constant 0 : index
    %101 = vector.load %arg2[%c0_97, %c0_98, %c0_99] : memref<3x96x176xf32, #tpu.memory_space<vmem>>, vector<1x96x176xf32>
    %102 = vector.shape_cast %101 : vector<1x96x176xf32> to vector<96x176xf32>
    %cst_100 = arith.constant dense<0.000000e+00> : vector<1x176xf32>
    %103 = tpu.matmul %15, %102, %cst_100 {dimension_numbers = #tpu.dot_dimension_numbers<[1], [0], [0], [1], [0, 0, 1, 1], [], []>} : vector<1x96xf32>, vector<96x176xf32>, vector<1x176xf32> -> vector<1x176xf32>
    %c1_101 = arith.constant 1 : index
    %c0_102 = arith.constant 0 : index
    %c0_103 = arith.constant 0 : index
    %104 = vector.load %arg2[%c1_101, %c0_102, %c0_103] : memref<3x96x176xf32, #tpu.memory_space<vmem>>, vector<1x96x176xf32>
    %105 = vector.shape_cast %104 : vector<1x96x176xf32> to vector<96x176xf32>
    %cst_104 = arith.constant dense<0.000000e+00> : vector<1x176xf32>
    %106 = tpu.matmul %17, %105, %cst_104 {dimension_numbers = #tpu.dot_dimension_numbers<[1], [0], [0], [1], [0, 0, 1, 1], [], []>} : vector<1x96xf32>, vector<96x176xf32>, vector<1x176xf32> -> vector<1x176xf32>
    %107 = arith.addf %103, %106 : vector<1x176xf32>
    %c2_105 = arith.constant 2 : index
    %c0_106 = arith.constant 0 : index
    %c0_107 = arith.constant 0 : index
    %108 = vector.load %arg2[%c2_105, %c0_106, %c0_107] : memref<3x96x176xf32, #tpu.memory_space<vmem>>, vector<1x96x176xf32>
    %109 = vector.shape_cast %108 : vector<1x96x176xf32> to vector<96x176xf32>
    %cst_108 = arith.constant dense<0.000000e+00> : vector<1x176xf32>
    %110 = tpu.matmul %19, %109, %cst_108 {dimension_numbers = #tpu.dot_dimension_numbers<[1], [0], [0], [1], [0, 0, 1, 1], [], []>} : vector<1x96xf32>, vector<96x176xf32>, vector<1x176xf32> -> vector<1x176xf32>
    %111 = arith.addf %107, %110 : vector<1x176xf32>
    %112 = arith.addf %111, %48 : vector<1x176xf32>
    %cst_109 = arith.constant 0.000000e+00 : f32
    %113 = vector.broadcast %cst_109 : f32 to vector<1x176xf32>
    %114 = arith.maximumf %112, %113 : vector<1x176xf32>
    %c0_110 = arith.constant 0 : index
    %c0_111 = arith.constant 0 : index
    %c0_112 = arith.constant 0 : index
    %115 = vector.load %arg2[%c0_110, %c0_111, %c0_112] : memref<3x96x176xf32, #tpu.memory_space<vmem>>, vector<1x96x176xf32>
    %116 = vector.shape_cast %115 : vector<1x96x176xf32> to vector<96x176xf32>
    %cst_113 = arith.constant dense<0.000000e+00> : vector<1x176xf32>
    %117 = tpu.matmul %19, %116, %cst_113 {dimension_numbers = #tpu.dot_dimension_numbers<[1], [0], [0], [1], [0, 0, 1, 1], [], []>} : vector<1x96xf32>, vector<96x176xf32>, vector<1x176xf32> -> vector<1x176xf32>
    %c1_114 = arith.constant 1 : index
    %c0_115 = arith.constant 0 : index
    %c0_116 = arith.constant 0 : index
    %118 = vector.load %arg2[%c1_114, %c0_115, %c0_116] : memref<3x96x176xf32, #tpu.memory_space<vmem>>, vector<1x96x176xf32>
    %119 = vector.shape_cast %118 : vector<1x96x176xf32> to vector<96x176xf32>
    %cst_117 = arith.constant dense<0.000000e+00> : vector<1x176xf32>
    %120 = tpu.matmul %21, %119, %cst_117 {dimension_numbers = #tpu.dot_dimension_numbers<[1], [0], [0], [1], [0, 0, 1, 1], [], []>} : vector<1x96xf32>, vector<96x176xf32>, vector<1x176xf32> -> vector<1x176xf32>
    %121 = arith.addf %117, %120 : vector<1x176xf32>
    %c2_118 = arith.constant 2 : index
    %c0_119 = arith.constant 0 : index
    %c0_120 = arith.constant 0 : index
    %122 = vector.load %arg2[%c2_118, %c0_119, %c0_120] : memref<3x96x176xf32, #tpu.memory_space<vmem>>, vector<1x96x176xf32>
    %123 = vector.shape_cast %122 : vector<1x96x176xf32> to vector<96x176xf32>
    %cst_121 = arith.constant dense<0.000000e+00> : vector<1x176xf32>
    %124 = tpu.matmul %23, %123, %cst_121 {dimension_numbers = #tpu.dot_dimension_numbers<[1], [0], [0], [1], [0, 0, 1, 1], [], []>} : vector<1x96xf32>, vector<96x176xf32>, vector<1x176xf32> -> vector<1x176xf32>
    %125 = arith.addf %121, %124 : vector<1x176xf32>
    %126 = arith.addf %125, %48 : vector<1x176xf32>
    %cst_122 = arith.constant 0.000000e+00 : f32
    %127 = vector.broadcast %cst_122 : f32 to vector<1x176xf32>
    %128 = arith.maximumf %126, %127 : vector<1x176xf32>
    %c0_123 = arith.constant 0 : index
    %c0_124 = arith.constant 0 : index
    %c0_125 = arith.constant 0 : index
    %129 = vector.load %arg2[%c0_123, %c0_124, %c0_125] : memref<3x96x176xf32, #tpu.memory_space<vmem>>, vector<1x96x176xf32>
    %130 = vector.shape_cast %129 : vector<1x96x176xf32> to vector<96x176xf32>
    %cst_126 = arith.constant dense<0.000000e+00> : vector<1x176xf32>
    %131 = tpu.matmul %23, %130, %cst_126 {dimension_numbers = #tpu.dot_dimension_numbers<[1], [0], [0], [1], [0, 0, 1, 1], [], []>} : vector<1x96xf32>, vector<96x176xf32>, vector<1x176xf32> -> vector<1x176xf32>
    %c1_127 = arith.constant 1 : index
    %c0_128 = arith.constant 0 : index
    %c0_129 = arith.constant 0 : index
    %132 = vector.load %arg2[%c1_127, %c0_128, %c0_129] : memref<3x96x176xf32, #tpu.memory_space<vmem>>, vector<1x96x176xf32>
    %133 = vector.shape_cast %132 : vector<1x96x176xf32> to vector<96x176xf32>
    %cst_130 = arith.constant dense<0.000000e+00> : vector<1x176xf32>
    %134 = tpu.matmul %25, %133, %cst_130 {dimension_numbers = #tpu.dot_dimension_numbers<[1], [0], [0], [1], [0, 0, 1, 1], [], []>} : vector<1x96xf32>, vector<96x176xf32>, vector<1x176xf32> -> vector<1x176xf32>
    %135 = arith.addf %131, %134 : vector<1x176xf32>
    %c2_131 = arith.constant 2 : index
    %c0_132 = arith.constant 0 : index
    %c0_133 = arith.constant 0 : index
    %136 = vector.load %arg2[%c2_131, %c0_132, %c0_133] : memref<3x96x176xf32, #tpu.memory_space<vmem>>, vector<1x96x176xf32>
    %137 = vector.shape_cast %136 : vector<1x96x176xf32> to vector<96x176xf32>
    %cst_134 = arith.constant dense<0.000000e+00> : vector<1x176xf32>
    %138 = tpu.matmul %27, %137, %cst_134 {dimension_numbers = #tpu.dot_dimension_numbers<[1], [0], [0], [1], [0, 0, 1, 1], [], []>} : vector<1x96xf32>, vector<96x176xf32>, vector<1x176xf32> -> vector<1x176xf32>
    %139 = arith.addf %135, %138 : vector<1x176xf32>
    %140 = arith.addf %139, %48 : vector<1x176xf32>
    %cst_135 = arith.constant 0.000000e+00 : f32
    %141 = vector.broadcast %cst_135 : f32 to vector<1x176xf32>
    %142 = arith.maximumf %140, %141 : vector<1x176xf32>
    %c0_136 = arith.constant 0 : index
    %c0_137 = arith.constant 0 : index
    %c0_138 = arith.constant 0 : index
    %143 = vector.load %arg2[%c0_136, %c0_137, %c0_138] : memref<3x96x176xf32, #tpu.memory_space<vmem>>, vector<1x96x176xf32>
    %144 = vector.shape_cast %143 : vector<1x96x176xf32> to vector<96x176xf32>
    %cst_139 = arith.constant dense<0.000000e+00> : vector<1x176xf32>
    %145 = tpu.matmul %27, %144, %cst_139 {dimension_numbers = #tpu.dot_dimension_numbers<[1], [0], [0], [1], [0, 0, 1, 1], [], []>} : vector<1x96xf32>, vector<96x176xf32>, vector<1x176xf32> -> vector<1x176xf32>
    %c1_140 = arith.constant 1 : index
    %c0_141 = arith.constant 0 : index
    %c0_142 = arith.constant 0 : index
    %146 = vector.load %arg2[%c1_140, %c0_141, %c0_142] : memref<3x96x176xf32, #tpu.memory_space<vmem>>, vector<1x96x176xf32>
    %147 = vector.shape_cast %146 : vector<1x96x176xf32> to vector<96x176xf32>
    %cst_143 = arith.constant dense<0.000000e+00> : vector<1x176xf32>
    %148 = tpu.matmul %29, %147, %cst_143 {dimension_numbers = #tpu.dot_dimension_numbers<[1], [0], [0], [1], [0, 0, 1, 1], [], []>} : vector<1x96xf32>, vector<96x176xf32>, vector<1x176xf32> -> vector<1x176xf32>
    %149 = arith.addf %145, %148 : vector<1x176xf32>
    %c2_144 = arith.constant 2 : index
    %c0_145 = arith.constant 0 : index
    %c0_146 = arith.constant 0 : index
    %150 = vector.load %arg2[%c2_144, %c0_145, %c0_146] : memref<3x96x176xf32, #tpu.memory_space<vmem>>, vector<1x96x176xf32>
    %151 = vector.shape_cast %150 : vector<1x96x176xf32> to vector<96x176xf32>
    %cst_147 = arith.constant dense<0.000000e+00> : vector<1x176xf32>
    %152 = tpu.matmul %31, %151, %cst_147 {dimension_numbers = #tpu.dot_dimension_numbers<[1], [0], [0], [1], [0, 0, 1, 1], [], []>} : vector<1x96xf32>, vector<96x176xf32>, vector<1x176xf32> -> vector<1x176xf32>
    %153 = arith.addf %149, %152 : vector<1x176xf32>
    %154 = arith.addf %153, %48 : vector<1x176xf32>
    %cst_148 = arith.constant 0.000000e+00 : f32
    %155 = vector.broadcast %cst_148 : f32 to vector<1x176xf32>
    %156 = arith.maximumf %154, %155 : vector<1x176xf32>
    %c0_149 = arith.constant 0 : index
    %c0_150 = arith.constant 0 : index
    %c0_151 = arith.constant 0 : index
    %157 = vector.load %arg2[%c0_149, %c0_150, %c0_151] : memref<3x96x176xf32, #tpu.memory_space<vmem>>, vector<1x96x176xf32>
    %158 = vector.shape_cast %157 : vector<1x96x176xf32> to vector<96x176xf32>
    %cst_152 = arith.constant dense<0.000000e+00> : vector<1x176xf32>
    %159 = tpu.matmul %31, %158, %cst_152 {dimension_numbers = #tpu.dot_dimension_numbers<[1], [0], [0], [1], [0, 0, 1, 1], [], []>} : vector<1x96xf32>, vector<96x176xf32>, vector<1x176xf32> -> vector<1x176xf32>
    %c1_153 = arith.constant 1 : index
    %c0_154 = arith.constant 0 : index
    %c0_155 = arith.constant 0 : index
    %160 = vector.load %arg2[%c1_153, %c0_154, %c0_155] : memref<3x96x176xf32, #tpu.memory_space<vmem>>, vector<1x96x176xf32>
    %161 = vector.shape_cast %160 : vector<1x96x176xf32> to vector<96x176xf32>
    %cst_156 = arith.constant dense<0.000000e+00> : vector<1x176xf32>
    %162 = tpu.matmul %33, %161, %cst_156 {dimension_numbers = #tpu.dot_dimension_numbers<[1], [0], [0], [1], [0, 0, 1, 1], [], []>} : vector<1x96xf32>, vector<96x176xf32>, vector<1x176xf32> -> vector<1x176xf32>
    %163 = arith.addf %159, %162 : vector<1x176xf32>
    %c2_157 = arith.constant 2 : index
    %c0_158 = arith.constant 0 : index
    %c0_159 = arith.constant 0 : index
    %164 = vector.load %arg2[%c2_157, %c0_158, %c0_159] : memref<3x96x176xf32, #tpu.memory_space<vmem>>, vector<1x96x176xf32>
    %165 = vector.shape_cast %164 : vector<1x96x176xf32> to vector<96x176xf32>
    %cst_160 = arith.constant dense<0.000000e+00> : vector<1x176xf32>
    %166 = tpu.matmul %35, %165, %cst_160 {dimension_numbers = #tpu.dot_dimension_numbers<[1], [0], [0], [1], [0, 0, 1, 1], [], []>} : vector<1x96xf32>, vector<96x176xf32>, vector<1x176xf32> -> vector<1x176xf32>
    %167 = arith.addf %163, %166 : vector<1x176xf32>
    %168 = arith.addf %167, %48 : vector<1x176xf32>
    %cst_161 = arith.constant 0.000000e+00 : f32
    %169 = vector.broadcast %cst_161 : f32 to vector<1x176xf32>
    %170 = arith.maximumf %168, %169 : vector<1x176xf32>
    %c0_162 = arith.constant 0 : index
    %c0_163 = arith.constant 0 : index
    %c0_164 = arith.constant 0 : index
    %171 = vector.load %arg2[%c0_162, %c0_163, %c0_164] : memref<3x96x176xf32, #tpu.memory_space<vmem>>, vector<1x96x176xf32>
    %172 = vector.shape_cast %171 : vector<1x96x176xf32> to vector<96x176xf32>
    %cst_165 = arith.constant dense<0.000000e+00> : vector<1x176xf32>
    %173 = tpu.matmul %35, %172, %cst_165 {dimension_numbers = #tpu.dot_dimension_numbers<[1], [0], [0], [1], [0, 0, 1, 1], [], []>} : vector<1x96xf32>, vector<96x176xf32>, vector<1x176xf32> -> vector<1x176xf32>
    %c1_166 = arith.constant 1 : index
    %c0_167 = arith.constant 0 : index
    %c0_168 = arith.constant 0 : index
    %174 = vector.load %arg2[%c1_166, %c0_167, %c0_168] : memref<3x96x176xf32, #tpu.memory_space<vmem>>, vector<1x96x176xf32>
    %175 = vector.shape_cast %174 : vector<1x96x176xf32> to vector<96x176xf32>
    %cst_169 = arith.constant dense<0.000000e+00> : vector<1x176xf32>
    %176 = tpu.matmul %37, %175, %cst_169 {dimension_numbers = #tpu.dot_dimension_numbers<[1], [0], [0], [1], [0, 0, 1, 1], [], []>} : vector<1x96xf32>, vector<96x176xf32>, vector<1x176xf32> -> vector<1x176xf32>
    %177 = arith.addf %173, %176 : vector<1x176xf32>
    %c2_170 = arith.constant 2 : index
    %c0_171 = arith.constant 0 : index
    %c0_172 = arith.constant 0 : index
    %178 = vector.load %arg2[%c2_170, %c0_171, %c0_172] : memref<3x96x176xf32, #tpu.memory_space<vmem>>, vector<1x96x176xf32>
    %179 = vector.shape_cast %178 : vector<1x96x176xf32> to vector<96x176xf32>
    %cst_173 = arith.constant dense<0.000000e+00> : vector<1x176xf32>
    %180 = tpu.matmul %39, %179, %cst_173 {dimension_numbers = #tpu.dot_dimension_numbers<[1], [0], [0], [1], [0, 0, 1, 1], [], []>} : vector<1x96xf32>, vector<96x176xf32>, vector<1x176xf32> -> vector<1x176xf32>
    %181 = arith.addf %177, %180 : vector<1x176xf32>
    %182 = arith.addf %181, %48 : vector<1x176xf32>
    %cst_174 = arith.constant 0.000000e+00 : f32
    %183 = vector.broadcast %cst_174 : f32 to vector<1x176xf32>
    %184 = arith.maximumf %182, %183 : vector<1x176xf32>
    %c0_175 = arith.constant 0 : index
    %c0_176 = arith.constant 0 : index
    %c0_177 = arith.constant 0 : index
    %185 = vector.load %arg2[%c0_175, %c0_176, %c0_177] : memref<3x96x176xf32, #tpu.memory_space<vmem>>, vector<1x96x176xf32>
    %186 = vector.shape_cast %185 : vector<1x96x176xf32> to vector<96x176xf32>
    %cst_178 = arith.constant dense<0.000000e+00> : vector<1x176xf32>
    %187 = tpu.matmul %39, %186, %cst_178 {dimension_numbers = #tpu.dot_dimension_numbers<[1], [0], [0], [1], [0, 0, 1, 1], [], []>} : vector<1x96xf32>, vector<96x176xf32>, vector<1x176xf32> -> vector<1x176xf32>
    %c1_179 = arith.constant 1 : index
    %c0_180 = arith.constant 0 : index
    %c0_181 = arith.constant 0 : index
    %188 = vector.load %arg2[%c1_179, %c0_180, %c0_181] : memref<3x96x176xf32, #tpu.memory_space<vmem>>, vector<1x96x176xf32>
    %189 = vector.shape_cast %188 : vector<1x96x176xf32> to vector<96x176xf32>
    %cst_182 = arith.constant dense<0.000000e+00> : vector<1x176xf32>
    %190 = tpu.matmul %41, %189, %cst_182 {dimension_numbers = #tpu.dot_dimension_numbers<[1], [0], [0], [1], [0, 0, 1, 1], [], []>} : vector<1x96xf32>, vector<96x176xf32>, vector<1x176xf32> -> vector<1x176xf32>
    %191 = arith.addf %187, %190 : vector<1x176xf32>
    %c2_183 = arith.constant 2 : index
    %c0_184 = arith.constant 0 : index
    %c0_185 = arith.constant 0 : index
    %192 = vector.load %arg2[%c2_183, %c0_184, %c0_185] : memref<3x96x176xf32, #tpu.memory_space<vmem>>, vector<1x96x176xf32>
    %193 = vector.shape_cast %192 : vector<1x96x176xf32> to vector<96x176xf32>
    %cst_186 = arith.constant dense<0.000000e+00> : vector<1x176xf32>
    %194 = tpu.matmul %43, %193, %cst_186 {dimension_numbers = #tpu.dot_dimension_numbers<[1], [0], [0], [1], [0, 0, 1, 1], [], []>} : vector<1x96xf32>, vector<96x176xf32>, vector<1x176xf32> -> vector<1x176xf32>
    %195 = arith.addf %191, %194 : vector<1x176xf32>
    %196 = arith.addf %195, %48 : vector<1x176xf32>
    %cst_187 = arith.constant 0.000000e+00 : f32
    %197 = vector.broadcast %cst_187 : f32 to vector<1x176xf32>
    %198 = arith.maximumf %196, %197 : vector<1x176xf32>
    %c0_188 = arith.constant 0 : index
    %c0_189 = arith.constant 0 : index
    %c0_190 = arith.constant 0 : index
    %199 = vector.load %arg2[%c0_188, %c0_189, %c0_190] : memref<3x96x176xf32, #tpu.memory_space<vmem>>, vector<1x96x176xf32>
    %200 = vector.shape_cast %199 : vector<1x96x176xf32> to vector<96x176xf32>
    %cst_191 = arith.constant dense<0.000000e+00> : vector<1x176xf32>
    %201 = tpu.matmul %43, %200, %cst_191 {dimension_numbers = #tpu.dot_dimension_numbers<[1], [0], [0], [1], [0, 0, 1, 1], [], []>} : vector<1x96xf32>, vector<96x176xf32>, vector<1x176xf32> -> vector<1x176xf32>
    %c1_192 = arith.constant 1 : index
    %c0_193 = arith.constant 0 : index
    %c0_194 = arith.constant 0 : index
    %202 = vector.load %arg2[%c1_192, %c0_193, %c0_194] : memref<3x96x176xf32, #tpu.memory_space<vmem>>, vector<1x96x176xf32>
    %203 = vector.shape_cast %202 : vector<1x96x176xf32> to vector<96x176xf32>
    %cst_195 = arith.constant dense<0.000000e+00> : vector<1x176xf32>
    %204 = tpu.matmul %45, %203, %cst_195 {dimension_numbers = #tpu.dot_dimension_numbers<[1], [0], [0], [1], [0, 0, 1, 1], [], []>} : vector<1x96xf32>, vector<96x176xf32>, vector<1x176xf32> -> vector<1x176xf32>
    %205 = arith.addf %201, %204 : vector<1x176xf32>
    %c2_196 = arith.constant 2 : index
    %c0_197 = arith.constant 0 : index
    %c0_198 = arith.constant 0 : index
    %206 = vector.load %arg2[%c2_196, %c0_197, %c0_198] : memref<3x96x176xf32, #tpu.memory_space<vmem>>, vector<1x96x176xf32>
    %207 = vector.shape_cast %206 : vector<1x96x176xf32> to vector<96x176xf32>
    %cst_199 = arith.constant dense<0.000000e+00> : vector<1x176xf32>
    %208 = tpu.matmul %47, %207, %cst_199 {dimension_numbers = #tpu.dot_dimension_numbers<[1], [0], [0], [1], [0, 0, 1, 1], [], []>} : vector<1x96xf32>, vector<96x176xf32>, vector<1x176xf32> -> vector<1x176xf32>
    %209 = arith.addf %205, %208 : vector<1x176xf32>
    %210 = arith.addf %209, %48 : vector<1x176xf32>
    %cst_200 = arith.constant 0.000000e+00 : f32
    %211 = vector.broadcast %cst_200 : f32 to vector<1x176xf32>
    %212 = arith.maximumf %210, %211 : vector<1x176xf32>
    %c0_201 = arith.constant 0 : index
    %c0_202 = arith.constant 0 : index
    %213 = vector.load %arg5[%c0_201, %c0_202] : memref<1x96xf32, #tpu.memory_space<vmem>>, vector<1x96xf32>
    %c1_203 = arith.constant 1 : index
    %c0_204 = arith.constant 0 : index
    %c0_205 = arith.constant 0 : index
    %214 = vector.load %arg4[%c1_203, %c0_204, %c0_205] : memref<3x176x96xf32, #tpu.memory_space<vmem>>, vector<1x176x96xf32>
    %215 = vector.shape_cast %214 : vector<1x176x96xf32> to vector<176x96xf32>
    %cst_206 = arith.constant dense<0.000000e+00> : vector<1x96xf32>
    %216 = tpu.matmul %58, %215, %cst_206 {dimension_numbers = #tpu.dot_dimension_numbers<[1], [0], [0], [1], [0, 0, 1, 1], [], []>} : vector<1x176xf32>, vector<176x96xf32>, vector<1x96xf32> -> vector<1x96xf32>
    %c2_207 = arith.constant 2 : index
    %c0_208 = arith.constant 0 : index
    %c0_209 = arith.constant 0 : index
    %217 = vector.load %arg4[%c2_207, %c0_208, %c0_209] : memref<3x176x96xf32, #tpu.memory_space<vmem>>, vector<1x176x96xf32>
    %218 = vector.shape_cast %217 : vector<1x176x96xf32> to vector<176x96xf32>
    %cst_210 = arith.constant dense<0.000000e+00> : vector<1x96xf32>
    %219 = tpu.matmul %72, %218, %cst_210 {dimension_numbers = #tpu.dot_dimension_numbers<[1], [0], [0], [1], [0, 0, 1, 1], [], []>} : vector<1x176xf32>, vector<176x96xf32>, vector<1x96xf32> -> vector<1x96xf32>
    %220 = arith.addf %216, %219 : vector<1x96xf32>
    %221 = arith.addf %220, %213 : vector<1x96xf32>
    %cst_211 = arith.constant 0.000000e+00 : f32
    %222 = vector.broadcast %cst_211 : f32 to vector<1x96xf32>
    %223 = arith.maximumf %221, %222 : vector<1x96xf32>
    %c0_212 = arith.constant 0 : index
    %c0_213 = arith.constant 0 : index
    %c0_214 = arith.constant 0 : index
    %224 = vector.load %arg4[%c0_212, %c0_213, %c0_214] : memref<3x176x96xf32, #tpu.memory_space<vmem>>, vector<1x176x96xf32>
    %225 = vector.shape_cast %224 : vector<1x176x96xf32> to vector<176x96xf32>
    %cst_215 = arith.constant dense<0.000000e+00> : vector<1x96xf32>
    %226 = tpu.matmul %72, %225, %cst_215 {dimension_numbers = #tpu.dot_dimension_numbers<[1], [0], [0], [1], [0, 0, 1, 1], [], []>} : vector<1x176xf32>, vector<176x96xf32>, vector<1x96xf32> -> vector<1x96xf32>
    %c1_216 = arith.constant 1 : index
    %c0_217 = arith.constant 0 : index
    %c0_218 = arith.constant 0 : index
    %227 = vector.load %arg4[%c1_216, %c0_217, %c0_218] : memref<3x176x96xf32, #tpu.memory_space<vmem>>, vector<1x176x96xf32>
    %228 = vector.shape_cast %227 : vector<1x176x96xf32> to vector<176x96xf32>
    %cst_219 = arith.constant dense<0.000000e+00> : vector<1x96xf32>
    %229 = tpu.matmul %86, %228, %cst_219 {dimension_numbers = #tpu.dot_dimension_numbers<[1], [0], [0], [1], [0, 0, 1, 1], [], []>} : vector<1x176xf32>, vector<176x96xf32>, vector<1x96xf32> -> vector<1x96xf32>
    %230 = arith.addf %226, %229 : vector<1x96xf32>
    %c2_220 = arith.constant 2 : index
    %c0_221 = arith.constant 0 : index
    %c0_222 = arith.constant 0 : index
    %231 = vector.load %arg4[%c2_220, %c0_221, %c0_222] : memref<3x176x96xf32, #tpu.memory_space<vmem>>, vector<1x176x96xf32>
    %232 = vector.shape_cast %231 : vector<1x176x96xf32> to vector<176x96xf32>
    %cst_223 = arith.constant dense<0.000000e+00> : vector<1x96xf32>
    %233 = tpu.matmul %100, %232, %cst_223 {dimension_numbers = #tpu.dot_dimension_numbers<[1], [0], [0], [1], [0, 0, 1, 1], [], []>} : vector<1x176xf32>, vector<176x96xf32>, vector<1x96xf32> -> vector<1x96xf32>
    %234 = arith.addf %230, %233 : vector<1x96xf32>
    %235 = arith.addf %234, %213 : vector<1x96xf32>
    %cst_224 = arith.constant 0.000000e+00 : f32
    %236 = vector.broadcast %cst_224 : f32 to vector<1x96xf32>
    %237 = arith.maximumf %235, %236 : vector<1x96xf32>
    %c0_225 = arith.constant 0 : index
    %c0_226 = arith.constant 0 : index
    %c0_227 = arith.constant 0 : index
    %238 = vector.load %arg4[%c0_225, %c0_226, %c0_227] : memref<3x176x96xf32, #tpu.memory_space<vmem>>, vector<1x176x96xf32>
    %239 = vector.shape_cast %238 : vector<1x176x96xf32> to vector<176x96xf32>
    %cst_228 = arith.constant dense<0.000000e+00> : vector<1x96xf32>
    %240 = tpu.matmul %100, %239, %cst_228 {dimension_numbers = #tpu.dot_dimension_numbers<[1], [0], [0], [1], [0, 0, 1, 1], [], []>} : vector<1x176xf32>, vector<176x96xf32>, vector<1x96xf32> -> vector<1x96xf32>
    %c1_229 = arith.constant 1 : index
    %c0_230 = arith.constant 0 : index
    %c0_231 = arith.constant 0 : index
    %241 = vector.load %arg4[%c1_229, %c0_230, %c0_231] : memref<3x176x96xf32, #tpu.memory_space<vmem>>, vector<1x176x96xf32>
    %242 = vector.shape_cast %241 : vector<1x176x96xf32> to vector<176x96xf32>
    %cst_232 = arith.constant dense<0.000000e+00> : vector<1x96xf32>
    %243 = tpu.matmul %114, %242, %cst_232 {dimension_numbers = #tpu.dot_dimension_numbers<[1], [0], [0], [1], [0, 0, 1, 1], [], []>} : vector<1x176xf32>, vector<176x96xf32>, vector<1x96xf32> -> vector<1x96xf32>
    %244 = arith.addf %240, %243 : vector<1x96xf32>
    %c2_233 = arith.constant 2 : index
    %c0_234 = arith.constant 0 : index
    %c0_235 = arith.constant 0 : index
    %245 = vector.load %arg4[%c2_233, %c0_234, %c0_235] : memref<3x176x96xf32, #tpu.memory_space<vmem>>, vector<1x176x96xf32>
    %246 = vector.shape_cast %245 : vector<1x176x96xf32> to vector<176x96xf32>
    %cst_236 = arith.constant dense<0.000000e+00> : vector<1x96xf32>
    %247 = tpu.matmul %128, %246, %cst_236 {dimension_numbers = #tpu.dot_dimension_numbers<[1], [0], [0], [1], [0, 0, 1, 1], [], []>} : vector<1x176xf32>, vector<176x96xf32>, vector<1x96xf32> -> vector<1x96xf32>
    %248 = arith.addf %244, %247 : vector<1x96xf32>
    %249 = arith.addf %248, %213 : vector<1x96xf32>
    %cst_237 = arith.constant 0.000000e+00 : f32
    %250 = vector.broadcast %cst_237 : f32 to vector<1x96xf32>
    %251 = arith.maximumf %249, %250 : vector<1x96xf32>
    %c0_238 = arith.constant 0 : index
    %c0_239 = arith.constant 0 : index
    %c0_240 = arith.constant 0 : index
    %252 = vector.load %arg4[%c0_238, %c0_239, %c0_240] : memref<3x176x96xf32, #tpu.memory_space<vmem>>, vector<1x176x96xf32>
    %253 = vector.shape_cast %252 : vector<1x176x96xf32> to vector<176x96xf32>
    %cst_241 = arith.constant dense<0.000000e+00> : vector<1x96xf32>
    %254 = tpu.matmul %128, %253, %cst_241 {dimension_numbers = #tpu.dot_dimension_numbers<[1], [0], [0], [1], [0, 0, 1, 1], [], []>} : vector<1x176xf32>, vector<176x96xf32>, vector<1x96xf32> -> vector<1x96xf32>
    %c1_242 = arith.constant 1 : index
    %c0_243 = arith.constant 0 : index
    %c0_244 = arith.constant 0 : index
    %255 = vector.load %arg4[%c1_242, %c0_243, %c0_244] : memref<3x176x96xf32, #tpu.memory_space<vmem>>, vector<1x176x96xf32>
    %256 = vector.shape_cast %255 : vector<1x176x96xf32> to vector<176x96xf32>
    %cst_245 = arith.constant dense<0.000000e+00> : vector<1x96xf32>
    %257 = tpu.matmul %142, %256, %cst_245 {dimension_numbers = #tpu.dot_dimension_numbers<[1], [0], [0], [1], [0, 0, 1, 1], [], []>} : vector<1x176xf32>, vector<176x96xf32>, vector<1x96xf32> -> vector<1x96xf32>
    %258 = arith.addf %254, %257 : vector<1x96xf32>
    %c2_246 = arith.constant 2 : index
    %c0_247 = arith.constant 0 : index
    %c0_248 = arith.constant 0 : index
    %259 = vector.load %arg4[%c2_246, %c0_247, %c0_248] : memref<3x176x96xf32, #tpu.memory_space<vmem>>, vector<1x176x96xf32>
    %260 = vector.shape_cast %259 : vector<1x176x96xf32> to vector<176x96xf32>
    %cst_249 = arith.constant dense<0.000000e+00> : vector<1x96xf32>
    %261 = tpu.matmul %156, %260, %cst_249 {dimension_numbers = #tpu.dot_dimension_numbers<[1], [0], [0], [1], [0, 0, 1, 1], [], []>} : vector<1x176xf32>, vector<176x96xf32>, vector<1x96xf32> -> vector<1x96xf32>
    %262 = arith.addf %258, %261 : vector<1x96xf32>
    %263 = arith.addf %262, %213 : vector<1x96xf32>
    %cst_250 = arith.constant 0.000000e+00 : f32
    %264 = vector.broadcast %cst_250 : f32 to vector<1x96xf32>
    %265 = arith.maximumf %263, %264 : vector<1x96xf32>
    %c0_251 = arith.constant 0 : index
    %c0_252 = arith.constant 0 : index
    %c0_253 = arith.constant 0 : index
    %266 = vector.load %arg4[%c0_251, %c0_252, %c0_253] : memref<3x176x96xf32, #tpu.memory_space<vmem>>, vector<1x176x96xf32>
    %267 = vector.shape_cast %266 : vector<1x176x96xf32> to vector<176x96xf32>
    %cst_254 = arith.constant dense<0.000000e+00> : vector<1x96xf32>
    %268 = tpu.matmul %156, %267, %cst_254 {dimension_numbers = #tpu.dot_dimension_numbers<[1], [0], [0], [1], [0, 0, 1, 1], [], []>} : vector<1x176xf32>, vector<176x96xf32>, vector<1x96xf32> -> vector<1x96xf32>
    %c1_255 = arith.constant 1 : index
    %c0_256 = arith.constant 0 : index
    %c0_257 = arith.constant 0 : index
    %269 = vector.load %arg4[%c1_255, %c0_256, %c0_257] : memref<3x176x96xf32, #tpu.memory_space<vmem>>, vector<1x176x96xf32>
    %270 = vector.shape_cast %269 : vector<1x176x96xf32> to vector<176x96xf32>
    %cst_258 = arith.constant dense<0.000000e+00> : vector<1x96xf32>
    %271 = tpu.matmul %170, %270, %cst_258 {dimension_numbers = #tpu.dot_dimension_numbers<[1], [0], [0], [1], [0, 0, 1, 1], [], []>} : vector<1x176xf32>, vector<176x96xf32>, vector<1x96xf32> -> vector<1x96xf32>
    %272 = arith.addf %268, %271 : vector<1x96xf32>
    %c2_259 = arith.constant 2 : index
    %c0_260 = arith.constant 0 : index
    %c0_261 = arith.constant 0 : index
    %273 = vector.load %arg4[%c2_259, %c0_260, %c0_261] : memref<3x176x96xf32, #tpu.memory_space<vmem>>, vector<1x176x96xf32>
    %274 = vector.shape_cast %273 : vector<1x176x96xf32> to vector<176x96xf32>
    %cst_262 = arith.constant dense<0.000000e+00> : vector<1x96xf32>
    %275 = tpu.matmul %184, %274, %cst_262 {dimension_numbers = #tpu.dot_dimension_numbers<[1], [0], [0], [1], [0, 0, 1, 1], [], []>} : vector<1x176xf32>, vector<176x96xf32>, vector<1x96xf32> -> vector<1x96xf32>
    %276 = arith.addf %272, %275 : vector<1x96xf32>
    %277 = arith.addf %276, %213 : vector<1x96xf32>
    %cst_263 = arith.constant 0.000000e+00 : f32
    %278 = vector.broadcast %cst_263 : f32 to vector<1x96xf32>
    %279 = arith.maximumf %277, %278 : vector<1x96xf32>
    %c0_264 = arith.constant 0 : index
    %c0_265 = arith.constant 0 : index
    %c0_266 = arith.constant 0 : index
    %280 = vector.load %arg4[%c0_264, %c0_265, %c0_266] : memref<3x176x96xf32, #tpu.memory_space<vmem>>, vector<1x176x96xf32>
    %281 = vector.shape_cast %280 : vector<1x176x96xf32> to vector<176x96xf32>
    %cst_267 = arith.constant dense<0.000000e+00> : vector<1x96xf32>
    %282 = tpu.matmul %184, %281, %cst_267 {dimension_numbers = #tpu.dot_dimension_numbers<[1], [0], [0], [1], [0, 0, 1, 1], [], []>} : vector<1x176xf32>, vector<176x96xf32>, vector<1x96xf32> -> vector<1x96xf32>
    %c1_268 = arith.constant 1 : index
    %c0_269 = arith.constant 0 : index
    %c0_270 = arith.constant 0 : index
    %283 = vector.load %arg4[%c1_268, %c0_269, %c0_270] : memref<3x176x96xf32, #tpu.memory_space<vmem>>, vector<1x176x96xf32>
    %284 = vector.shape_cast %283 : vector<1x176x96xf32> to vector<176x96xf32>
    %cst_271 = arith.constant dense<0.000000e+00> : vector<1x96xf32>
    %285 = tpu.matmul %198, %284, %cst_271 {dimension_numbers = #tpu.dot_dimension_numbers<[1], [0], [0], [1], [0, 0, 1, 1], [], []>} : vector<1x176xf32>, vector<176x96xf32>, vector<1x96xf32> -> vector<1x96xf32>
    %286 = arith.addf %282, %285 : vector<1x96xf32>
    %c2_272 = arith.constant 2 : index
    %c0_273 = arith.constant 0 : index
    %c0_274 = arith.constant 0 : index
    %287 = vector.load %arg4[%c2_272, %c0_273, %c0_274] : memref<3x176x96xf32, #tpu.memory_space<vmem>>, vector<1x176x96xf32>
    %288 = vector.shape_cast %287 : vector<1x176x96xf32> to vector<176x96xf32>
    %cst_275 = arith.constant dense<0.000000e+00> : vector<1x96xf32>
    %289 = tpu.matmul %212, %288, %cst_275 {dimension_numbers = #tpu.dot_dimension_numbers<[1], [0], [0], [1], [0, 0, 1, 1], [], []>} : vector<1x176xf32>, vector<176x96xf32>, vector<1x96xf32> -> vector<1x96xf32>
    %290 = arith.addf %286, %289 : vector<1x96xf32>
    %291 = arith.addf %290, %213 : vector<1x96xf32>
    %cst_276 = arith.constant 0.000000e+00 : f32
    %292 = vector.broadcast %cst_276 : f32 to vector<1x96xf32>
    %293 = arith.maximumf %291, %292 : vector<1x96xf32>
    %c0_277 = arith.constant 0 : index
    %c0_278 = arith.constant 0 : index
    %294 = vector.load %arg7[%c0_277, %c0_278] : memref<1x54xf32, #tpu.memory_space<vmem>>, vector<1x54xf32>
    %c1_279 = arith.constant 1 : index
    %c0_280 = arith.constant 0 : index
    %c0_281 = arith.constant 0 : index
    %295 = vector.load %arg6[%c1_279, %c0_280, %c0_281] : memref<3x96x54xf32, #tpu.memory_space<vmem>>, vector<1x96x54xf32>
    %296 = vector.shape_cast %295 : vector<1x96x54xf32> to vector<96x54xf32>
    %cst_282 = arith.constant dense<0.000000e+00> : vector<1x54xf32>
    %297 = tpu.matmul %223, %296, %cst_282 {dimension_numbers = #tpu.dot_dimension_numbers<[1], [0], [0], [1], [0, 0, 1, 1], [], []>} : vector<1x96xf32>, vector<96x54xf32>, vector<1x54xf32> -> vector<1x54xf32>
    %c2_283 = arith.constant 2 : index
    %c0_284 = arith.constant 0 : index
    %c0_285 = arith.constant 0 : index
    %298 = vector.load %arg6[%c2_283, %c0_284, %c0_285] : memref<3x96x54xf32, #tpu.memory_space<vmem>>, vector<1x96x54xf32>
    %299 = vector.shape_cast %298 : vector<1x96x54xf32> to vector<96x54xf32>
    %cst_286 = arith.constant dense<0.000000e+00> : vector<1x54xf32>
    %300 = tpu.matmul %237, %299, %cst_286 {dimension_numbers = #tpu.dot_dimension_numbers<[1], [0], [0], [1], [0, 0, 1, 1], [], []>} : vector<1x96xf32>, vector<96x54xf32>, vector<1x54xf32> -> vector<1x54xf32>
    %301 = arith.addf %297, %300 : vector<1x54xf32>
    %302 = arith.addf %301, %294 : vector<1x54xf32>
    %cst_287 = arith.constant 0.000000e+00 : f32
    %303 = vector.broadcast %cst_287 : f32 to vector<1x54xf32>
    %304 = arith.maximumf %302, %303 : vector<1x54xf32>
    %c0_288 = arith.constant 0 : index
    %c0_289 = arith.constant 0 : index
    %c0_290 = arith.constant 0 : index
    %305 = vector.load %arg6[%c0_288, %c0_289, %c0_290] : memref<3x96x54xf32, #tpu.memory_space<vmem>>, vector<1x96x54xf32>
    %306 = vector.shape_cast %305 : vector<1x96x54xf32> to vector<96x54xf32>
    %cst_291 = arith.constant dense<0.000000e+00> : vector<1x54xf32>
    %307 = tpu.matmul %237, %306, %cst_291 {dimension_numbers = #tpu.dot_dimension_numbers<[1], [0], [0], [1], [0, 0, 1, 1], [], []>} : vector<1x96xf32>, vector<96x54xf32>, vector<1x54xf32> -> vector<1x54xf32>
    %c1_292 = arith.constant 1 : index
    %c0_293 = arith.constant 0 : index
    %c0_294 = arith.constant 0 : index
    %308 = vector.load %arg6[%c1_292, %c0_293, %c0_294] : memref<3x96x54xf32, #tpu.memory_space<vmem>>, vector<1x96x54xf32>
    %309 = vector.shape_cast %308 : vector<1x96x54xf32> to vector<96x54xf32>
    %cst_295 = arith.constant dense<0.000000e+00> : vector<1x54xf32>
    %310 = tpu.matmul %251, %309, %cst_295 {dimension_numbers = #tpu.dot_dimension_numbers<[1], [0], [0], [1], [0, 0, 1, 1], [], []>} : vector<1x96xf32>, vector<96x54xf32>, vector<1x54xf32> -> vector<1x54xf32>
    %311 = arith.addf %307, %310 : vector<1x54xf32>
    %c2_296 = arith.constant 2 : index
    %c0_297 = arith.constant 0 : index
    %c0_298 = arith.constant 0 : index
    %312 = vector.load %arg6[%c2_296, %c0_297, %c0_298] : memref<3x96x54xf32, #tpu.memory_space<vmem>>, vector<1x96x54xf32>
    %313 = vector.shape_cast %312 : vector<1x96x54xf32> to vector<96x54xf32>
    %cst_299 = arith.constant dense<0.000000e+00> : vector<1x54xf32>
    %314 = tpu.matmul %265, %313, %cst_299 {dimension_numbers = #tpu.dot_dimension_numbers<[1], [0], [0], [1], [0, 0, 1, 1], [], []>} : vector<1x96xf32>, vector<96x54xf32>, vector<1x54xf32> -> vector<1x54xf32>
    %315 = arith.addf %311, %314 : vector<1x54xf32>
    %316 = arith.addf %315, %294 : vector<1x54xf32>
    %cst_300 = arith.constant 0.000000e+00 : f32
    %317 = vector.broadcast %cst_300 : f32 to vector<1x54xf32>
    %318 = arith.maximumf %316, %317 : vector<1x54xf32>
    %c0_301 = arith.constant 0 : index
    %c0_302 = arith.constant 0 : index
    %c0_303 = arith.constant 0 : index
    %319 = vector.load %arg6[%c0_301, %c0_302, %c0_303] : memref<3x96x54xf32, #tpu.memory_space<vmem>>, vector<1x96x54xf32>
    %320 = vector.shape_cast %319 : vector<1x96x54xf32> to vector<96x54xf32>
    %cst_304 = arith.constant dense<0.000000e+00> : vector<1x54xf32>
    %321 = tpu.matmul %265, %320, %cst_304 {dimension_numbers = #tpu.dot_dimension_numbers<[1], [0], [0], [1], [0, 0, 1, 1], [], []>} : vector<1x96xf32>, vector<96x54xf32>, vector<1x54xf32> -> vector<1x54xf32>
    %c1_305 = arith.constant 1 : index
    %c0_306 = arith.constant 0 : index
    %c0_307 = arith.constant 0 : index
    %322 = vector.load %arg6[%c1_305, %c0_306, %c0_307] : memref<3x96x54xf32, #tpu.memory_space<vmem>>, vector<1x96x54xf32>
    %323 = vector.shape_cast %322 : vector<1x96x54xf32> to vector<96x54xf32>
    %cst_308 = arith.constant dense<0.000000e+00> : vector<1x54xf32>
    %324 = tpu.matmul %279, %323, %cst_308 {dimension_numbers = #tpu.dot_dimension_numbers<[1], [0], [0], [1], [0, 0, 1, 1], [], []>} : vector<1x96xf32>, vector<96x54xf32>, vector<1x54xf32> -> vector<1x54xf32>
    %325 = arith.addf %321, %324 : vector<1x54xf32>
    %c2_309 = arith.constant 2 : index
    %c0_310 = arith.constant 0 : index
    %c0_311 = arith.constant 0 : index
    %326 = vector.load %arg6[%c2_309, %c0_310, %c0_311] : memref<3x96x54xf32, #tpu.memory_space<vmem>>, vector<1x96x54xf32>
    %327 = vector.shape_cast %326 : vector<1x96x54xf32> to vector<96x54xf32>
    %cst_312 = arith.constant dense<0.000000e+00> : vector<1x54xf32>
    %328 = tpu.matmul %293, %327, %cst_312 {dimension_numbers = #tpu.dot_dimension_numbers<[1], [0], [0], [1], [0, 0, 1, 1], [], []>} : vector<1x96xf32>, vector<96x54xf32>, vector<1x54xf32> -> vector<1x54xf32>
    %329 = arith.addf %325, %328 : vector<1x54xf32>
    %330 = arith.addf %329, %294 : vector<1x54xf32>
    %cst_313 = arith.constant 0.000000e+00 : f32
    %331 = vector.broadcast %cst_313 : f32 to vector<1x54xf32>
    %332 = arith.maximumf %330, %331 : vector<1x54xf32>
    %333 = arith.addf %304, %318 : vector<1x54xf32>
    %334 = arith.addf %333, %332 : vector<1x54xf32>
    %c0_314 = arith.constant 0 : index
    %c0_315 = arith.constant 0 : index
    %335 = vector.load %arg8[%c0_314, %c0_315] : memref<54x100xf32, #tpu.memory_space<vmem>>, vector<54x100xf32>
    %cst_316 = arith.constant dense<0.000000e+00> : vector<1x100xf32>
    %336 = tpu.matmul %334, %335, %cst_316 {dimension_numbers = #tpu.dot_dimension_numbers<[1], [0], [0], [1], [0, 0, 1, 1], [], []>} : vector<1x54xf32>, vector<54x100xf32>, vector<1x100xf32> -> vector<1x100xf32>
    %c0_317 = arith.constant 0 : index
    %c0_318 = arith.constant 0 : index
    %337 = vector.load %arg9[%c0_317, %c0_318] : memref<1x100xf32, #tpu.memory_space<vmem>>, vector<1x100xf32>
    %338 = arith.addf %336, %337 : vector<1x100xf32>
    %c0_319 = arith.constant 0 : index
    %c0_320 = arith.constant 0 : index
    %c0_321 = arith.constant 0 : index
    %339 = vector.load %arg10[%c0_319, %c0_320, %c0_321] : memref<1x1x100xf32, #tpu.memory_space<vmem>>, vector<1x1x100xf32>
    %340 = vector.shape_cast %339 : vector<1x1x100xf32> to vector<1x100xf32>
    %341 = vector.shape_cast %338 : vector<1x100xf32> to vector<1x1x100xf32>
    tpu.vector_store %arg10[%c0_319, %c0_320, %c0_321], %341 {strides = array<i32>} : memref<1x1x100xf32, #tpu.memory_space<vmem>>, vector<1x1x100xf32>,
    return
  }
  func.func @transform_0(%arg0: i32) -> (i32, i32, i32) {
    %c0_i32 = arith.constant 0 : i32
    %c0_i32_0 = arith.constant 0 : i32
    %c0_i32_1 = arith.constant 0 : i32
    return %arg0, %c0_i32, %c0_i32_0 : i32, i32, i32
  }
  func.func @transform_1(%arg0: i32) -> (i32, i32, i32) {
    %c0_i32 = arith.constant 0 : i32
    %c0_i32_0 = arith.constant 0 : i32
    %c0_i32_1 = arith.constant 0 : i32
    %c0_i32_2 = arith.constant 0 : i32
    return %c0_i32, %c0_i32_0, %c0_i32_1 : i32, i32, i32
  }
  func.func @transform_2(%arg0: i32) -> (i32, i32) {
    %c0_i32 = arith.constant 0 : i32
    %c0_i32_0 = arith.constant 0 : i32
    %c0_i32_1 = arith.constant 0 : i32
    return %c0_i32, %c0_i32_0 : i32, i32
  }
  func.func @transform_3(%arg0: i32) -> (i32, i32, i32) {
    %c0_i32 = arith.constant 0 : i32
    %c0_i32_0 = arith.constant 0 : i32
    %c0_i32_1 = arith.constant 0 : i32
    %c0_i32_2 = arith.constant 0 : i32
    return %c0_i32, %c0_i32_0, %c0_i32_1 : i32, i32, i32
  }
  func.func @transform_4(%arg0: i32) -> (i32, i32) {
    %c0_i32 = arith.constant 0 : i32
    %c0_i32_0 = arith.constant 0 : i32
    %c0_i32_1 = arith.constant 0 : i32
    return %c0_i32, %c0_i32_0 : i32, i32
  }
  func.func @transform_5(%arg0: i32) -> (i32, i32, i32) {
    %c0_i32 = arith.constant 0 : i32
    %c0_i32_0 = arith.constant 0 : i32
    %c0_i32_1 = arith.constant 0 : i32
    %c0_i32_2 = arith.constant 0 : i32
    return %c0_i32, %c0_i32_0, %c0_i32_1 : i32, i32, i32
  }
  func.func @transform_6(%arg0: i32) -> (i32, i32) {
    %c0_i32 = arith.constant 0 : i32
    %c0_i32_0 = arith.constant 0 : i32
    %c0_i32_1 = arith.constant 0 : i32
    return %c0_i32, %c0_i32_0 : i32, i32
  }
  func.func @transform_7(%arg0: i32) -> (i32, i32) {
    %c0_i32 = arith.constant 0 : i32
    %c0_i32_0 = arith.constant 0 : i32
    %c0_i32_1 = arith.constant 0 : i32
    return %c0_i32, %c0_i32_0 : i32, i32
  }
  func.func @transform_8(%arg0: i32) -> (i32, i32) {
    %c0_i32 = arith.constant 0 : i32
    %c0_i32_0 = arith.constant 0 : i32
    %c0_i32_1 = arith.constant 0 : i32
    return %c0_i32, %c0_i32_0 : i32, i32
  }
  func.func @transform_9(%arg0: i32) -> (i32, i32, i32) {
    %c0_i32 = arith.constant 0 : i32
    %c0_i32_0 = arith.constant 0 : i32
    %c0_i32_1 = arith.constant 0 : i32
    return %arg0, %c0_i32, %c0_i32_0 : i32, i32, i32
  }
}

</mosaic_0001>

<bundles_post_ra>
// kernel: model_1k_forward.1
= control target key start
LH: loop header
LB: loop body
LE: loop exit
PB: predicated region body
PF: predicated region fallthrough
CT: control target
= control target key end

     0   :  { %14 = vsyncpa [#allocation3], 0  ;;  %s9893_s0 = inlined_call_operand.vmem [shape: f32[2,32,96], index: 0, kind: input, shape index: {}]   ;;  %s9894_s1 = inlined_call_operand.vmem [shape: f32[3,96,176], index: 1, kind: input, shape index: {}]   ;;  %s9895_s2 = inlined_call_operand.vmem [shape: f32[1,176], index: 2, kind: input, shape index: {}]   ;;  %s9896_s3 = inlined_call_operand.vmem [shape: f32[3,176,96], index: 3, kind: input, shape index: {}]   ;;  %s9897_s4 = inlined_call_operand.vmem [shape: f32[1,96], index: 4, kind: input, shape index: {}]   ;;  %s9898_s5 = inlined_call_operand.vmem [shape: f32[3,96,54], index: 5, kind: input, shape index: {}]   ;;  %s9899_s6 = inlined_call_operand.vmem [shape: f32[1,54], index: 6, kind: input, shape index: {}]   ;;  %s9900_s7 = inlined_call_operand.vmem [shape: f32[54,100], index: 7, kind: input, shape index: {}]   ;;  %s9901_s8 = inlined_call_operand.vmem [shape: f32[1,100], index: 8, kind: input, shape index: {}]   ;;  %s9902_s9 = inlined_call_operand.hbm [shape: f32[2,1,100], index: 9, kind: output, shape index: {}]  }
   0x1   :  { %16 = vsyncpa [#allocation3 + $0x1], 0  ;;  %s5991_s30 = smov 0   ;;  %s5993_s10 = smov 0  }
   0x2   :  { %s5995_s11 = smov 0   ;;  %s5997_s12 = smov 0  }
   0x3 LB: > { %s6012_s13 = sadd.s32 4294967295, %s5936_s12   ;;  %s5164_s14 = sadd.s32 4294967294, %s5936_s12   ;;  %s5936_s12 = sphi %s5997_s12, %s10352_s12   ;;  %s5932_s11 = sphi %s5995_s11, %s10351_s11   ;;  %s5928_s10 = sphi %s5993_s10, %s10350_s10   ;;  %s5924_s30 = sphi %s5991_s30, %s10349_s30  }
   0x4   : > { %s6016_s15 = sadd.s32 1, %s5936_s12   ;;  %s223_s16 = sadd.s32 1, %s5932_s11 }
   0x5   : > { %s220_s17 = ssub.s32 %s5936_s12, %s6016_s15  ;;  %p233_p0 = scmp.ne.s32.totalorder %s5932_s11, %s5928_s10 }
   0x6   : > { %p221_p1 = scmp.eq.s32.totalorder %s220_s17, 0  ;;  %p234_p2 = scmp.eq.s32.totalorder %s6012_s13, 1 }
   0x7   : > { %p239_p3 = scmp.ne.s32.totalorder %s5928_s10, %s5924_s30  ;;  %p240_p4 = scmp.eq.s32.totalorder %s5164_s14, 1 }
   0x8   : > { %s6027_s18 = scalar_select %p221_p1, %s5932_s11, %s223_s16  }
   0x9   : > { %p6029_p5 = por %p234_p2, %p233_p0  ;;  %p6033_p6 = por %p240_p4, %p239_p3 }
   0xa   : > { %p5167_p7 = scmp.ge.s32.totalorder %s5936_s12, 1  ;;  %p290_p8 = scmp.lt.s32.totalorder %s5936_s12, 3 }
   0xc   : > { %p291_p9 = pnand %p5167_p7, %p290_p8 }
   0xe   : > { %294 = sbr.rel (%p291_p9) target bundleno = 1483 (0x5cb), region = 56 }
  0x13   : > { %v6042_v0 = vld [vmem:[%s9894_s1 + $0x238] sm:$0xff]  ;;  %v6052_v2 = vld [vmem:[%s9894_s1 + $0x230] sm:$0xff]  ;;  %v6064_v4 = vld [vmem:[%s9894_s1 + $0x228] sm:$0xff]  ;;  %p325_p10 = scmp.lt.s32.totalorder %s6012_s13, 1  ;;  %vm405_vm0 = vcmask 785408   ;;  %v9903_v50 = vmov 0.0  }
  0x14   : > { %v6047_v1 = vld [vmem:[%s9894_s1 + $0x178] sm:$0xff]  ;;  %417 = vmatprep.subr.mxu0 %v6042_v0  ;;  %v6059_v3 = vld [vmem:[%s9894_s1 + $0x170] sm:$0xff]  ;;  %v6069_v5 = vld [vmem:[%s9894_s1 + $0x168] sm:$0xff]  ;;  %473 = vmatprep.mubr.f32.mxu0 %v9903_v50  ;;  %vm3115_vm1 = vcmask 392192   ;;  %vm5939_vm2 = vmmov 0   ;;  %vm5020_vm3 = vcmask 1045504  }
  0x15   : > { %491 = vmatprep.subr.mxu1 %v6047_v1  ;;  %10073 = vst [vmem:[#allocation5_spill] sm:$0xff] %v6059_v3  ;;  %10074 = vst [vmem:[#allocation6_spill] sm:$0xff] %v6069_v5  ;;  %418 = vmatpush1.msra.mxu0 %v6052_v2  ;;  %v6076_v6 = vld [vmem:[%s9894_s1 + $0x220] sm:$0xff]  ;;  %v6086_v8 = vld [vmem:[%s9894_s1 + $0x218] sm:$0xff]  ;;  %s6229_s25 = scalar_select %p325_p10, %s6012_s13, 1  ;;  %vm5016_vm4 = vcmask 441344  }
  0x16   : > { %492 = vmatpush1.msra.mxu1 %v6059_v3  ;;  %v6081_v7 = vld [vmem:[%s9894_s1 + $0x160] sm:$0xff]  ;;  %10076 = vst [vmem:[#allocation8_spill] sm:$0xff] %v6086_v8  ;;  %419 = vmatprep.subr.mxu0 %v6064_v4  ;;  %v6093_v9 = vld [vmem:[%s9894_s1 + $0x158] sm:$0xff]  ;;  %v6098_v10 = vld [vmem:[%s9894_s1 + $0x210] sm:$0xff]  ;;  %s323_s14 = sand.u32 1, %s5928_s10   ;;  %s5348_s22 = sshll.u32 %s6012_s13, 4 }
  0x17   : > { %10075 = vst [vmem:[#allocation7_spill] sm:$0xff] %v6081_v7  ;;  %493 = vmatprep.subr.mxu1 %v6069_v5  ;;  %10077 = vst [vmem:[#allocation9_spill] sm:$0xff] %v6093_v9  ;;  %v6103_v11 = vld [vmem:[%s9894_s1 + $0x150] sm:$0xff]  ;;  %420 = vmatpush1.msra.mxu0 %v6076_v6  ;;  %v6110_v12 = vld [vmem:[%s9894_s1 + $0x208] sm:$0xff]  ;;  %s5351_s16 = sshll.u32 %s6229_s25, 5  ;;  %s324_s24 = scalar_lea.vmem [#allocation2], %s323_s14 }
  0x18   : > { %10078 = vst [vmem:[#allocation10_spill] sm:$0xff] %v6098_v10  ;;  %10079 = vst [vmem:[#allocation11_spill] sm:$0xff] %v6103_v11  ;;  %494 = vmatpush1.msra.mxu1 %v6081_v7  ;;  %v6115_v13 = vld [vmem:[%s9894_s1 + $0x148] sm:$0xff]  ;;  %421 = vmatprep.subr.mxu0 %v6086_v8  ;;  %v6122_v14 = vld [vmem:[%s9894_s1 + $0x200] sm:$0xff]  ;;  %s6319_s23 = scalar_lea.vmem %s9893_s0, %s5351_s16  ;;  %s5109_s25 = sshll.u32 %s324_s24, 4  ;;  %vm5094_vm5 = vcmask 811008   ;;  %s5110_s25 = int_to_ptr.vmem [resolvable:$true] %s5109_s25 }
  0x19   : > { %10080 = vst [vmem:[#allocation12_spill] sm:$0xff] %v6110_v12  ;;  %10081 = vst [vmem:[#allocation13_spill] sm:$0xff] %v6115_v13  ;;  %495 = vmatprep.subr.mxu1 %v6093_v9  ;;  %v6127_v15 = vld [vmem:[%s9894_s1 + $0x140] sm:$0xff]  ;;  %422 = vmatpush1.msra.mxu0 %v6098_v10  ;;  %v6134_v16 = vld [vmem:[%s9894_s1 + $0x1f8] sm:$0xff]  ;;  %s9858_s16 = scalar_lea.hbm %s9902_s9, %s5348_s22  ;;  %s5097_s28 = scalar_lea.sflag [#allocation3], %s323_s14 }
  0x1a   : > { %10082 = vst [vmem:[#allocation14_spill] sm:$0xff] %v6122_v14  ;;  %10083 = vst [vmem:[#allocation15_spill] sm:$0xff] %v6127_v15  ;;  %496 = vmatpush1.msra.mxu1 %v6103_v11  ;;  %v6139_v17 = vld [vmem:[%s9894_s1 + $0x138] sm:$0xff]  ;;  %423 = vmatprep.subr.mxu0 %v6110_v12  ;;  %v6146_v18 = vld [vmem:[%s9894_s1 + $0x1f0] sm:$0xff]  ;;  %s5940_s13 = smov [#allocation2]  }
  0x1b   : > { %10084 = vst [vmem:[#allocation16_spill] sm:$0xff] %v6134_v16  ;;  %497 = vmatprep.subr.mxu1 %v6115_v13  ;;  %10085 = vst [vmem:[#allocation17_spill] sm:$0xff] %v6146_v18  ;;  %v6151_v19 = vld [vmem:[%s9894_s1 + $0x130] sm:$0xff]  ;;  %424 = vmatpush1.msra.mxu0 %v6122_v14  ;;  %v6158_v20 = vld [vmem:[%s9894_s1 + $0x1e8] sm:$0xff]  ;;  %s5880_s29 = sshll.u32 %s5940_s13, 4  ;;  %s5881_s29 = int_to_ptr.vmem [resolvable:$false] %s5880_s29 }
  0x1c   : > { %498 = vmatpush1.msra.mxu1 %v6127_v15  ;;  %10086 = vst [vmem:[#allocation18_spill] sm:$0xff] %v6158_v20  ;;  %v6163_v21 = vld [vmem:[%s9894_s1 + $0x128] sm:$0xff]  ;;  %425 = vmatprep.subr.mxu0 %v6134_v16  ;;  %v6170_v22 = vld [vmem:[%s9894_s1 + $0x1e0] sm:$0xff]  ;;  %v6183_v24 = vld [vmem:[%s9894_s1 + $0x1d8] sm:$0xff]  ;;  %s5882_s17 = scalar_lea.vmem %s5881_s29, 32  ;;  %p5883_p0 = scmp.lt.s32.totalorder %s5110_s25, %s5881_s29 }
  0x1d   : > { %499 = vmatprep.subr.mxu1 %v6139_v17  ;;  %10087 = vst [vmem:[#allocation19_spill] sm:$0xff] %v6170_v22  ;;  %v6175_v23 = vld [vmem:[%s9894_s1 + $0x120] sm:$0xff]  ;;  %426 = vmatpush1.msra.mxu0 %v6146_v18  ;;  %10089 = vst [vmem:[#allocation21_spill] sm:$0xff] %v6183_v24  ;;  %v6188_v25 = vld [vmem:[%s9894_s1 + $0x118] sm:$0xff] }
  0x1e   : > { %10088 = vst [vmem:[#allocation20_spill] sm:$0xff] %v6175_v23  ;;  %500 = vmatpush1.msra.mxu1 %v6151_v19  ;;  %427 = vmatprep.subr.mxu0 %v6158_v20  ;;  %v6195_v26 = vld [vmem:[%s9894_s1 + $0x1d0] sm:$0xff]  ;;  %v6207_v28 = vld [vmem:[%s9894_s1 + $0x1c8] sm:$0xff]  ;;  %v6219_v30 = vld [vmem:[%s9894_s1 + $0x1c0] sm:$0xff] }
  0x1f   : > { %501 = vmatprep.subr.mxu1 %v6163_v21  ;;  %10090 = vst [vmem:[#allocation22_spill] sm:$0xff] %v6195_v26  ;;  %v6200_v27 = vld [vmem:[%s9894_s1 + $0x110] sm:$0xff]  ;;  %428 = vmatpush1.msra.mxu0 %v6170_v22  ;;  %v6212_v29 = vld [vmem:[%s9894_s1 + $0x108] sm:$0xff]  ;;  %v6224_v31 = vld [vmem:[%s9894_s1 + $0x100] sm:$0xff] }
  0x20   : > { %502 = vmatpush1.msra.mxu1 %v6175_v23  ;;  %429 = vmatprep.subr.mxu0 %v6183_v24  ;;  %v6236_v32 = vld [vmem:[%s9894_s1 + $0x1b8] sm:$0xff]  ;;  %v6248_v34 = vld [vmem:[%s9894_s1 + $0x1b0] sm:$0xff]  ;;  %v6260_v36 = vld [vmem:[%s9894_s1 + $0x1a8] sm:$0xff] }
  0x21   : > { %503 = vmatprep.subr.mxu1 %v6188_v25  ;;  %430 = vmatpush1.msra.mxu0 %v6195_v26  ;;  %v6241_v33 = vld [vmem:[%s9894_s1 + $0xf8] sm:$0xff]  ;;  %10092 = vst [vmem:[#allocation24_spill] sm:$0xff] %v6248_v34  ;;  %v6253_v35 = vld [vmem:[%s9894_s1 + $0xf0] sm:$0xff]  ;;  %v6265_v37 = vld [vmem:[%s9894_s1 + $0xe8] sm:$0xff] }
  0x22   : > { %504 = vmatpush1.msra.mxu1 %v6200_v27  ;;  %10091 = vst [vmem:[#allocation23_spill] sm:$0xff] %v6241_v33  ;;  %431 = vmatprep.subr.mxu0 %v6207_v28  ;;  %10093 = vst [vmem:[#allocation25_spill] sm:$0xff] %v6253_v35  ;;  %v6272_v38 = vld [vmem:[%s9894_s1 + $0x1a0] sm:$0xff]  ;;  %v6285_v40 = vld [vmem:[%s9894_s1 + $0x198] sm:$0xff] }
  0x23   : > { %505 = vmatprep.subr.mxu1 %v6212_v29  ;;  %432 = vmatpush1.msra.mxu0 %v6219_v30  ;;  %v6277_v39 = vld [vmem:[%s9894_s1 + $0xe0] sm:$0xff]  ;;  %10094 = vst [vmem:[#allocation26_spill] sm:$0xff] %v6285_v40  ;;  %v6290_v41 = vld [vmem:[%s9894_s1 + $0xd8] sm:$0xff]  ;;  %v6297_v42 = vld [vmem:[%s9894_s1 + $0x190] sm:$0xff] }
  0x24   : > { %506 = vmatpush1.msra.mxu1 %v6224_v31  ;;  %433 = vmatprep.subr.mxu0 %v6236_v32  ;;  %10095 = vst [vmem:[#allocation27_spill] sm:$0xff] %v6297_v42  ;;  %v6302_v43 = vld [vmem:[%s9894_s1 + $0xd0] sm:$0xff]  ;;  %v6309_v44 = vld [vmem:[%s9894_s1 + $0x188] sm:$0xff]  ;;  %v6326_v46 = vld [vmem:[%s9894_s1 + $0x180] sm:$0xff] }
  0x25   : > { %507 = vmatprep.subr.mxu1 %v6241_v33  ;;  %434 = vmatpush1.msra.mxu0 %v6248_v34  ;;  %10096 = vst [vmem:[#allocation28_spill] sm:$0xff] %v6309_v44  ;;  %v6314_v45 = vld [vmem:[%s9894_s1 + $0xc8] sm:$0xff]  ;;  %10097 = vst [vmem:[#allocation29_spill] sm:$0xff] %v6326_v46  ;;  %v6333_v47 = vld [vmem:[%s9894_s1 + $0xc0] sm:$0xff] }
  0x26   : > { %508 = vmatpush1.msra.mxu1 %v6253_v35  ;;  %435 = vmatprep.subr.mxu0 %v6260_v36  ;;  %v6338_v48 = vld [vmem:[%s6319_s23 + $0x1] sm:$0x1]  ;;  %v330_v49 = vld [vmem:[%s6319_s23] sm:$0x1]  ;;  %v6346_v51 = vld [vmem:[%s9894_s1 + $0xb8] sm:$0xff] }
  0x27   : > { %509 = vmatprep.subr.mxu1 %v6265_v37  ;;  %436 = vmatpush1.msra.mxu0 %v6272_v38  ;;  %10098 = vst [vmem:[#allocation30_spill] sm:$0xff] %v6346_v51  ;;  %v6353_v52 = vld [vmem:[%s9894_s1 + $0xb0] sm:$0xff]  ;;  %v6361_v53 = vld [vmem:[%s9894_s1 + $0xa8] sm:$0xff]  ;;  %v6368_v54 = vld [vmem:[%s9894_s1 + $0xa0] sm:$0xff] }
  0x28   : > { %510 = vmatpush1.msra.mxu1 %v6277_v39  ;;  %437 = vmatprep.subr.mxu0 %v6285_v40  ;;  %10099 = vst [vmem:[#allocation31_spill] sm:$0xff] %v6353_v52  ;;  %v6375_v55 = vld [vmem:[%s9894_s1 + $0x98] sm:$0xff]  ;;  %v6382_v56 = vld [vmem:[%s9894_s1 + $0x90] sm:$0xff]  ;;  %v6389_v57 = vld [vmem:[%s9894_s1 + $0x88] sm:$0xff] }
  0x29   : > { %511 = vmatprep.subr.mxu1 %v6290_v41  ;;  %438 = vmatpush1.msra.mxu0 %v6297_v42  ;;  %10100 = vst [vmem:[#allocation32_spill] sm:$0xff] %v6382_v56  ;;  %v6396_v58 = vld [vmem:[%s9894_s1 + $0x80] sm:$0xff]  ;;  %v6403_v59 = vld [vmem:[%s9894_s1 + $0x78] sm:$0xff]  ;;  %v6410_v60 = vld [vmem:[%s9894_s1 + $0x70] sm:$0xff] }
  0x2a   : > { %512 = vmatpush1.msra.mxu1 %v6302_v43  ;;  %439 = vmatprep.subr.mxu0 %v6309_v44  ;;  %10101 = vst [vmem:[#allocation33_spill] sm:$0xff] %v6410_v60  ;;  %v6417_v61 = vld [vmem:[%s9894_s1 + $0x68] sm:$0xff]  ;;  %v6424_v62 = vld [vmem:[%s9894_s1 + $0x60] sm:$0xff]  ;;  %v6431_v63 = vld [vmem:[%s9894_s1 + $0x58] sm:$0xff] }
  0x2b   : > { %513 = vmatprep.subr.mxu1 %v6314_v45  ;;  %440 = vmatpush1.msra.mxu0 %v6326_v46  ;;  %10102 = vst [vmem:[#allocation34_spill] sm:$0xff] %v6417_v61  ;;  %10103 = vst [vmem:[#allocation35_spill] sm:$0xff] %v6424_v62 }
  0x2c   : > { %514 = vmatpush1.msra.mxu1 %v6333_v47  ;;  %547 = vmatprep.mubr.f32.mxu1 %v9903_v50  ;;  %10104 = vst [vmem:[#allocation36_spill] sm:$0xff] %v6431_v63  ;;  %v6445_v50 = vld [vmem:[%s9894_s1 + $0x48] sm:$0xff] }
  0x2d   : > { %5218 = vmatmul.mubr.msk.f32.vlgmr.msra.gmra.mxu0 %vm405_vm0, %v6338_v48  ;;  %5219 = vmatmul.mubr.msk.f32.vlgmr.msra.gmra.mxu1 %vm405_vm0, %v330_v49  ;;  %v6438_v49 = vld [vmem:[%s9894_s1 + $0x50] sm:$0xff]  ;;  %10106 = vst [vmem:[#allocation38_spill] sm:$0xff] %v6445_v50 }
  0x2e   : > { %604 = vmatprep.subr.mxu0 %v6047_v1  ;;  %675 = vmatprep.subr.mxu1 %v6346_v51  ;;  %10105 = vst [vmem:[#allocation37_spill] sm:$0xff] %v6438_v49 }
  0x2f   : > { %605 = vmatpush1.msra.mxu0 %v6059_v3  ;;  %676 = vmatpush1.msra.mxu1 %v6353_v52 }
  0x30   : > { %606 = vmatprep.subr.mxu0 %v6069_v5  ;;  %677 = vmatprep.subr.mxu1 %v6361_v53 }
  0x31   : > { %607 = vmatpush1.msra.mxu0 %v6081_v7  ;;  %678 = vmatpush1.msra.mxu1 %v6368_v54 }
  0x32   : > { %608 = vmatprep.subr.mxu0 %v6093_v9  ;;  %679 = vmatprep.subr.mxu1 %v6375_v55 }
  0x33   : > { %609 = vmatpush1.msra.mxu0 %v6103_v11  ;;  %680 = vmatpush1.msra.mxu1 %v6382_v56 }
  0x34   : > { %610 = vmatprep.subr.mxu0 %v6115_v13  ;;  %681 = vmatprep.subr.mxu1 %v6389_v57 }
  0x35   : > { %611 = vmatpush1.msra.mxu0 %v6127_v15  ;;  %682 = vmatpush1.msra.mxu1 %v6396_v58 }
  0x36   : > { %612 = vmatprep.subr.mxu0 %v6139_v17  ;;  %683 = vmatprep.subr.mxu1 %v6403_v59 }
  0x37   : > { %613 = vmatpush1.msra.mxu0 %v6151_v19  ;;  %684 = vmatpush1.msra.mxu1 %v6410_v60  ;;  %v10113_v60 = vmov 0.0  }
  0x38   : > { %614 = vmatprep.subr.mxu0 %v6163_v21  ;;  %685 = vmatprep.subr.mxu1 %v6417_v61  ;;  %v6452_v61 = vld [vmem:[%s9894_s1 + $0x40] sm:$0xff] }
  0x39   : > { %615 = vmatpush1.msra.mxu0 %v6175_v23  ;;  %686 = vmatpush1.msra.mxu1 %v6424_v62  ;;  %10107 = vst [vmem:[#allocation39_spill] sm:$0xff] %v6452_v61  ;;  %v6459_v62 = vld [vmem:[%s9894_s1 + $0x38] sm:$0xff] }
  0x3a   : > { %616 = vmatprep.subr.mxu0 %v6188_v25  ;;  %687 = vmatprep.subr.mxu1 %v6431_v63  ;;  %10108 = vst [vmem:[#allocation40_spill] sm:$0xff] %v6459_v62  ;;  %v6466_v63 = vld [vmem:[%s9894_s1 + $0x30] sm:$0xff] }
  0x3b   : > { %617 = vmatpush1.msra.mxu0 %v6200_v27  ;;  %688 = vmatpush1.msra.mxu1 %v6438_v49  ;;  %10109 = vst [vmem:[#allocation41_spill] sm:$0xff] %v6466_v63  ;;  %v6473_v49 = vld [vmem:[%s9894_s1 + $0x28] sm:$0xff] }
  0x3c   : > { %618 = vmatprep.subr.mxu0 %v6212_v29  ;;  %689 = vmatprep.subr.mxu1 %v6445_v50  ;;  %10110 = vst [vmem:[#allocation42_spill] sm:$0xff] %v6473_v49  ;;  %v6480_v50 = vld [vmem:[%s9894_s1 + $0x20] sm:$0xff] }
  0x3d   : > { %619 = vmatpush1.msra.mxu0 %v6224_v31  ;;  %690 = vmatpush1.msra.mxu1 %v6452_v61  ;;  %10111 = vst [vmem:[#allocation43_spill] sm:$0xff] %v6480_v50  ;;  %v6487_v61 = vld [vmem:[%s9894_s1 + $0x18] sm:$0xff] }
  0x3e   : > { %620 = vmatprep.subr.mxu0 %v6241_v33  ;;  %691 = vmatprep.subr.mxu1 %v6459_v62  ;;  %v6494_v62 = vld [vmem:[%s9894_s1 + $0x10] sm:$0xff] }
  0x3f   : > { %621 = vmatpush1.msra.mxu0 %v6253_v35  ;;  %692 = vmatpush1.msra.mxu1 %v6466_v63  ;;  %v6501_v63 = vld [vmem:[%s9894_s1 + $0x8] sm:$0xff] }
  0x40   : > { %622 = vmatprep.subr.mxu0 %v6265_v37  ;;  %693 = vmatprep.subr.mxu1 %v6473_v49  ;;  %v6510_v49 = vld [vmem:[%s9894_s1] sm:$0xff] }
  0x41   : > { %623 = vmatpush1.msra.mxu0 %v6277_v39  ;;  %694 = vmatpush1.msra.mxu1 %v6480_v50  ;;  %10112 = vst [vmem:[#allocation44_spill] sm:$0xff] %v6510_v49  ;;  %v332_v50 = vld [vmem:[%s6319_s23 + $0x2] sm:$0x1] }
  0x42   : > { %624 = vmatprep.subr.mxu0 %v6290_v41  ;;  %695 = vmatprep.subr.mxu1 %v6487_v61 }
  0x43   : > { %625 = vmatpush1.msra.mxu0 %v6302_v43  ;;  %696 = vmatpush1.msra.mxu1 %v6494_v62 }
  0x44   : > { %626 = vmatprep.subr.mxu0 %v6314_v45  ;;  %697 = vmatprep.subr.mxu1 %v6501_v63 }
  0x45   : > { %627 = vmatpush1.msra.mxu0 %v6333_v47  ;;  %660 = vmatprep.mubr.f32.mxu0 %v10113_v60 }
  0x46   : > { %698 = vmatpush1.msra.mxu1 %v6510_v49  ;;  %731 = vmatprep.mubr.f32.mxu1 %v10113_v60 }
  0x47   : > { %5220 = vmatmul.mubr.msk.f32.vlgmr.msra.gmra.mxu0 %vm405_vm0, %v332_v50  ;;  %5221 = vmatmul.mubr.msk.f32.vlgmr.msra.gmra.mxu1 %vm405_vm0, %v6338_v48  ;;  %v333_v48 = vld [vmem:[%s6319_s23 + $0x3] sm:$0x1]  ;;  %v334_v50 = vld [vmem:[%s6319_s23 + $0x4] sm:$0x1] }
  0x48   : > { %749 = vmatprep.subr.mxu0 %v6042_v0  ;;  %829 = vmatprep.subr.mxu1 %v6047_v1 }
  0x49   : > { %750 = vmatpush1.msra.mxu0 %v6052_v2  ;;  %830 = vmatpush1.msra.mxu1 %v6059_v3 }
  0x4a   : > { %751 = vmatprep.subr.mxu0 %v6064_v4  ;;  %831 = vmatprep.subr.mxu1 %v6069_v5 }
  0x4b   : > { %752 = vmatpush1.msra.mxu0 %v6076_v6  ;;  %832 = vmatpush1.msra.mxu1 %v6081_v7 }
  0x4c   : > { %753 = vmatprep.subr.mxu0 %v6086_v8  ;;  %833 = vmatprep.subr.mxu1 %v6093_v9 }
  0x4d   : > { %754 = vmatpush1.msra.mxu0 %v6098_v10  ;;  %834 = vmatpush1.msra.mxu1 %v6103_v11 }
  0x4e   : > { %755 = vmatprep.subr.mxu0 %v6110_v12  ;;  %835 = vmatprep.subr.mxu1 %v6115_v13 }
  0x4f   : > { %756 = vmatpush1.msra.mxu0 %v6122_v14  ;;  %836 = vmatpush1.msra.mxu1 %v6127_v15 }
  0x50   : > { %757 = vmatprep.subr.mxu0 %v6134_v16  ;;  %837 = vmatprep.subr.mxu1 %v6139_v17 }
  0x51   : > { %758 = vmatpush1.msra.mxu0 %v6146_v18  ;;  %838 = vmatpush1.msra.mxu1 %v6151_v19 }
  0x52   : > { %759 = vmatprep.subr.mxu0 %v6158_v20  ;;  %839 = vmatprep.subr.mxu1 %v6163_v21 }
  0x53   : > { %760 = vmatpush1.msra.mxu0 %v6170_v22  ;;  %840 = vmatpush1.msra.mxu1 %v6175_v23 }
  0x54   : > { %761 = vmatprep.subr.mxu0 %v6183_v24  ;;  %841 = vmatprep.subr.mxu1 %v6188_v25 }
  0x55   : > { %762 = vmatpush1.msra.mxu0 %v6195_v26  ;;  %842 = vmatpush1.msra.mxu1 %v6200_v27 }
  0x56   : > { %763 = vmatprep.subr.mxu0 %v6207_v28  ;;  %843 = vmatprep.subr.mxu1 %v6212_v29 }
  0x57   : > { %764 = vmatpush1.msra.mxu0 %v6219_v30  ;;  %844 = vmatpush1.msra.mxu1 %v6224_v31 }
  0x58   : > { %765 = vmatprep.subr.mxu0 %v6236_v32  ;;  %845 = vmatprep.subr.mxu1 %v6241_v33 }
  0x59   : > { %766 = vmatpush1.msra.mxu0 %v6248_v34  ;;  %846 = vmatpush1.msra.mxu1 %v6253_v35 }
  0x5a   : > { %767 = vmatprep.subr.mxu0 %v6260_v36  ;;  %847 = vmatprep.subr.mxu1 %v6265_v37 }
  0x5b   : > { %768 = vmatpush1.msra.mxu0 %v6272_v38  ;;  %848 = vmatpush1.msra.mxu1 %v6277_v39 }
  0x5c   : > { %769 = vmatprep.subr.mxu0 %v6285_v40  ;;  %849 = vmatprep.subr.mxu1 %v6290_v41 }
  0x5d   : > { %770 = vmatpush1.msra.mxu0 %v6297_v42  ;;  %850 = vmatpush1.msra.mxu1 %v6302_v43 }
  0x5e   : > { %771 = vmatprep.subr.mxu0 %v6309_v44  ;;  %851 = vmatprep.subr.mxu1 %v6314_v45 }
  0x5f   : > { %772 = vmatpush1.msra.mxu0 %v6326_v46  ;;  %805 = vmatprep.mubr.f32.mxu0 %v10113_v60 }
  0x60   : > { %852 = vmatpush1.msra.mxu1 %v6333_v47  ;;  %885 = vmatprep.mubr.f32.mxu1 %v10113_v60 }
  0x61   : > { %5222 = vmatmul.mubr.msk.f32.vlgmr.msra.gmra.mxu0 %vm405_vm0, %v333_v48  ;;  %5223 = vmatmul.mubr.msk.f32.vlgmr.msra.gmra.mxu1 %vm405_vm0, %v334_v50  ;;  %v10114_v50 = vld [vmem:[#allocation33_spill] sm:$0xff] }
  0x62   : > { %900 = vmatprep.subr.mxu0 %v6346_v51  ;;  %974 = vmatprep.subr.mxu1 %v6042_v0 }
  0x63   : > { %901 = vmatpush1.msra.mxu0 %v6353_v52  ;;  %975 = vmatpush1.msra.mxu1 %v6052_v2 }
  0x64   : > { %902 = vmatprep.subr.mxu0 %v6361_v53  ;;  %976 = vmatprep.subr.mxu1 %v6064_v4 }
  0x65   : > { %903 = vmatpush1.msra.mxu0 %v6368_v54  ;;  %977 = vmatpush1.msra.mxu1 %v6076_v6 }
  0x66   : > { %904 = vmatprep.subr.mxu0 %v6375_v55  ;;  %978 = vmatprep.subr.mxu1 %v6086_v8  ;;  %v10115_v8 = vld [vmem:[#allocation34_spill] sm:$0xff] }
  0x67   : > { %905 = vmatpush1.msra.mxu0 %v6382_v56  ;;  %979 = vmatpush1.msra.mxu1 %v6098_v10  ;;  %v10116_v10 = vld [vmem:[#allocation35_spill] sm:$0xff] }
  0x68   : > { %906 = vmatprep.subr.mxu0 %v6389_v57  ;;  %980 = vmatprep.subr.mxu1 %v6110_v12  ;;  %v10117_v12 = vld [vmem:[#allocation36_spill] sm:$0xff] }
  0x69   : > { %907 = vmatpush1.msra.mxu0 %v6396_v58  ;;  %981 = vmatpush1.msra.mxu1 %v6122_v14  ;;  %v10118_v14 = vld [vmem:[#allocation37_spill] sm:$0xff] }
  0x6a   : > { %908 = vmatprep.subr.mxu0 %v6403_v59  ;;  %982 = vmatprep.subr.mxu1 %v6134_v16  ;;  %v10119_v16 = vld [vmem:[#allocation38_spill] sm:$0xff] }
  0x6b   : > { %909 = vmatpush1.msra.mxu0 %v10114_v50  ;;  %983 = vmatpush1.msra.mxu1 %v6146_v18  ;;  %v10120_v18 = vld [vmem:[#allocation39_spill] sm:$0xff] }
  0x6c   : > { %910 = vmatprep.subr.mxu0 %v10115_v8  ;;  %984 = vmatprep.subr.mxu1 %v6158_v20  ;;  %v10121_v20 = vld [vmem:[#allocation40_spill] sm:$0xff] }
  0x6d   : > { %911 = vmatpush1.msra.mxu0 %v10116_v10  ;;  %985 = vmatpush1.msra.mxu1 %v6170_v22  ;;  %v10122_v22 = vld [vmem:[#allocation41_spill] sm:$0xff] }
  0x6e   : > { %912 = vmatprep.subr.mxu0 %v10117_v12  ;;  %986 = vmatprep.subr.mxu1 %v6183_v24  ;;  %v10123_v24 = vld [vmem:[#allocation42_spill] sm:$0xff] }
  0x6f   : > { %913 = vmatpush1.msra.mxu0 %v10118_v14  ;;  %987 = vmatpush1.msra.mxu1 %v6195_v26  ;;  %v10124_v26 = vld [vmem:[#allocation43_spill] sm:$0xff] }
  0x70   : > { %914 = vmatprep.subr.mxu0 %v10119_v16  ;;  %988 = vmatprep.subr.mxu1 %v6207_v28 }
  0x71   : > { %915 = vmatpush1.msra.mxu0 %v10120_v18  ;;  %989 = vmatpush1.msra.mxu1 %v6219_v30 }
  0x72   : > { %916 = vmatprep.subr.mxu0 %v10121_v20  ;;  %990 = vmatprep.subr.mxu1 %v6236_v32 }
  0x73   : > { %917 = vmatpush1.msra.mxu0 %v10122_v22  ;;  %991 = vmatpush1.msra.mxu1 %v6248_v34  ;;  %v335_v34 = vld [vmem:[%s6319_s23 + $0x5] sm:$0x1] }
  0x74   : > { %918 = vmatprep.subr.mxu0 %v10123_v24  ;;  %992 = vmatprep.subr.mxu1 %v6260_v36 }
  0x75   : > { %919 = vmatpush1.msra.mxu0 %v10124_v26  ;;  %993 = vmatpush1.msra.mxu1 %v6272_v38 }
  0x76   : > { %920 = vmatprep.subr.mxu0 %v6487_v61  ;;  %994 = vmatprep.subr.mxu1 %v6285_v40 }
  0x77   : > { %921 = vmatpush1.msra.mxu0 %v6494_v62  ;;  %995 = vmatpush1.msra.mxu1 %v6297_v42 }
  0x78   : > { %922 = vmatprep.subr.mxu0 %v6501_v63  ;;  %996 = vmatprep.subr.mxu1 %v6309_v44 }
  0x79   : > { %923 = vmatpush1.msra.mxu0 %v6510_v49  ;;  %956 = vmatprep.mubr.f32.mxu0 %v10113_v60 }
  0x7a   : > { %997 = vmatpush1.msra.mxu1 %v6326_v46  ;;  %1030 = vmatprep.mubr.f32.mxu1 %v10113_v60 }
  0x7b   : > { %5224 = vmatmul.mubr.msk.f32.vlgmr.msra.gmra.mxu0 %vm405_vm0, %v333_v48  ;;  %5225 = vmatmul.mubr.msk.f32.vlgmr.msra.gmra.mxu1 %vm405_vm0, %v335_v34  ;;  %v336_v48 = vld [vmem:[%s6319_s23 + $0x6] sm:$0x1] }
  0x7c   : > { %1054 = vmatprep.subr.mxu0 %v6047_v1  ;;  %1125 = vmatprep.subr.mxu1 %v6346_v51 }
  0x7d   : > { %1055 = vmatpush1.msra.mxu0 %v6059_v3  ;;  %1126 = vmatpush1.msra.mxu1 %v6353_v52 }
  0x7e   : > { %1056 = vmatprep.subr.mxu0 %v6069_v5  ;;  %1127 = vmatprep.subr.mxu1 %v6361_v53 }
  0x7f   : > { %1057 = vmatpush1.msra.mxu0 %v6081_v7  ;;  %1128 = vmatpush1.msra.mxu1 %v6368_v54 }
  0x80   : > { %1058 = vmatprep.subr.mxu0 %v6093_v9  ;;  %1129 = vmatprep.subr.mxu1 %v6375_v55 }
  0x81   : > { %1059 = vmatpush1.msra.mxu0 %v6103_v11  ;;  %1130 = vmatpush1.msra.mxu1 %v6382_v56 }
  0x82   : > { %1060 = vmatprep.subr.mxu0 %v6115_v13  ;;  %1131 = vmatprep.subr.mxu1 %v6389_v57 }
  0x83   : > { %1061 = vmatpush1.msra.mxu0 %v6127_v15  ;;  %1132 = vmatpush1.msra.mxu1 %v6396_v58 }
  0x84   : > { %1062 = vmatprep.subr.mxu0 %v6139_v17  ;;  %1133 = vmatprep.subr.mxu1 %v6403_v59 }
  0x85   : > { %1063 = vmatpush1.msra.mxu0 %v6151_v19  ;;  %1134 = vmatpush1.msra.mxu1 %v10114_v50 }
  0x86   : > { %1064 = vmatprep.subr.mxu0 %v6163_v21  ;;  %1135 = vmatprep.subr.mxu1 %v10115_v8 }
  0x87   : > { %1065 = vmatpush1.msra.mxu0 %v6175_v23  ;;  %1136 = vmatpush1.msra.mxu1 %v10116_v10 }
  0x88   : > { %1066 = vmatprep.subr.mxu0 %v6188_v25  ;;  %1137 = vmatprep.subr.mxu1 %v10117_v12 }
  0x89   : > { %1067 = vmatpush1.msra.mxu0 %v6200_v27  ;;  %1138 = vmatpush1.msra.mxu1 %v10118_v14 }
  0x8a   : > { %1068 = vmatprep.subr.mxu0 %v6212_v29  ;;  %1139 = vmatprep.subr.mxu1 %v10119_v16 }
  0x8b   : > { %1069 = vmatpush1.msra.mxu0 %v6224_v31  ;;  %1140 = vmatpush1.msra.mxu1 %v10120_v18 }
  0x8c   : > { %1070 = vmatprep.subr.mxu0 %v6241_v33  ;;  %1141 = vmatprep.subr.mxu1 %v10121_v20 }
  0x8d   : > { %1071 = vmatpush1.msra.mxu0 %v6253_v35  ;;  %1142 = vmatpush1.msra.mxu1 %v10122_v22 }
  0x8e   : > { %1072 = vmatprep.subr.mxu0 %v6265_v37  ;;  %1143 = vmatprep.subr.mxu1 %v10123_v24 }
  0x8f   : > { %1073 = vmatpush1.msra.mxu0 %v6277_v39  ;;  %1144 = vmatpush1.msra.mxu1 %v10124_v26 }
  0x90   : > { %1074 = vmatprep.subr.mxu0 %v6290_v41  ;;  %1145 = vmatprep.subr.mxu1 %v6487_v61 }
  0x91   : > { %1075 = vmatpush1.msra.mxu0 %v6302_v43  ;;  %1146 = vmatpush1.msra.mxu1 %v6494_v62 }
  0x92   : > { %1076 = vmatprep.subr.mxu0 %v6314_v45  ;;  %1147 = vmatprep.subr.mxu1 %v6501_v63 }
  0x93   : > { %1077 = vmatpush1.msra.mxu0 %v6333_v47  ;;  %1110 = vmatprep.mubr.f32.mxu0 %v10113_v60 }
  0x94   : > { %1148 = vmatpush1.msra.mxu1 %v6510_v49  ;;  %1181 = vmatprep.mubr.f32.mxu1 %v10113_v60  ;;  %v10125_v49 = vld [vmem:[#allocation8_spill] sm:$0xff] }
  0x95   : > { %5226 = vmatmul.mubr.msk.f32.vlgmr.msra.gmra.mxu0 %vm405_vm0, %v336_v48  ;;  %5227 = vmatmul.mubr.msk.f32.vlgmr.msra.gmra.mxu1 %vm405_vm0, %v335_v34  ;;  %v10126_v34 = vld [vmem:[#allocation10_spill] sm:$0xff]  ;;  %v10127_v48 = vld [vmem:[#allocation12_spill] sm:$0xff] }
  0x96   : > { %1199 = vmatprep.subr.mxu0 %v6042_v0  ;;  %1279 = vmatprep.subr.mxu1 %v6047_v1 }
  0x97   : > { %1200 = vmatpush1.msra.mxu0 %v6052_v2  ;;  %1280 = vmatpush1.msra.mxu1 %v6059_v3  ;;  %v10128_v3 = vld [vmem:[#allocation14_spill] sm:$0xff] }
  0x98   : > { %1201 = vmatprep.subr.mxu0 %v6064_v4  ;;  %1281 = vmatprep.subr.mxu1 %v6069_v5  ;;  %v10129_v5 = vld [vmem:[#allocation16_spill] sm:$0xff] }
  0x99   : > { %1202 = vmatpush1.msra.mxu0 %v6076_v6  ;;  %1282 = vmatpush1.msra.mxu1 %v6081_v7  ;;  %v10130_v7 = vld [vmem:[#allocation17_spill] sm:$0xff] }
  0x9a   : > { %1203 = vmatprep.subr.mxu0 %v10125_v49  ;;  %1283 = vmatprep.subr.mxu1 %v6093_v9  ;;  %v10131_v9 = vld [vmem:[#allocation18_spill] sm:$0xff] }
  0x9b   : > { %1204 = vmatpush1.msra.mxu0 %v10126_v34  ;;  %1284 = vmatpush1.msra.mxu1 %v6103_v11  ;;  %v10132_v11 = vld [vmem:[#allocation19_spill] sm:$0xff] }
  0x9c   : > { %1205 = vmatprep.subr.mxu0 %v10127_v48  ;;  %1285 = vmatprep.subr.mxu1 %v6115_v13  ;;  %v10133_v13 = vld [vmem:[#allocation21_spill] sm:$0xff] }
  0x9d   : > { %1206 = vmatpush1.msra.mxu0 %v10128_v3  ;;  %1286 = vmatpush1.msra.mxu1 %v6127_v15  ;;  %v10134_v15 = vld [vmem:[#allocation22_spill] sm:$0xff] }
  0x9e   : > { %1207 = vmatprep.subr.mxu0 %v10129_v5  ;;  %1287 = vmatprep.subr.mxu1 %v6139_v17 }
  0x9f   : > { %1208 = vmatpush1.msra.mxu0 %v10130_v7  ;;  %1288 = vmatpush1.msra.mxu1 %v6151_v19 }
  0xa0   : > { %1209 = vmatprep.subr.mxu0 %v10131_v9  ;;  %1289 = vmatprep.subr.mxu1 %v6163_v21 }
  0xa1   : > { %1210 = vmatpush1.msra.mxu0 %v10132_v11  ;;  %1290 = vmatpush1.msra.mxu1 %v6175_v23  ;;  %v10135_v23 = vld [vmem:[#allocation24_spill] sm:$0xff] }
  0xa2   : > { %1211 = vmatprep.subr.mxu0 %v10133_v13  ;;  %1291 = vmatprep.subr.mxu1 %v6188_v25 }
  0xa3   : > { %1212 = vmatpush1.msra.mxu0 %v10134_v15  ;;  %1292 = vmatpush1.msra.mxu1 %v6200_v27 }
  0xa4   : > { %1213 = vmatprep.subr.mxu0 %v6207_v28  ;;  %1293 = vmatprep.subr.mxu1 %v6212_v29 }
  0xa5   : > { %1214 = vmatpush1.msra.mxu0 %v6219_v30  ;;  %1294 = vmatpush1.msra.mxu1 %v6224_v31 }
  0xa6   : > { %1215 = vmatprep.subr.mxu0 %v6236_v32  ;;  %1295 = vmatprep.subr.mxu1 %v6241_v33  ;;  %v338_v33 = vld [vmem:[%s6319_s23 + $0x8] sm:$0x1] }
  0xa7   : > { %1216 = vmatpush1.msra.mxu0 %v10135_v23  ;;  %1296 = vmatpush1.msra.mxu1 %v6253_v35  ;;  %v337_v35 = vld [vmem:[%s6319_s23 + $0x7] sm:$0x1] }
  0xa8   : > { %1217 = vmatprep.subr.mxu0 %v6260_v36  ;;  %1297 = vmatprep.subr.mxu1 %v6265_v37 }
  0xa9   : > { %1218 = vmatpush1.msra.mxu0 %v6272_v38  ;;  %1298 = vmatpush1.msra.mxu1 %v6277_v39 }
  0xaa   : > { %1219 = vmatprep.subr.mxu0 %v6285_v40  ;;  %1299 = vmatprep.subr.mxu1 %v6290_v41 }
  0xab   : > { %1220 = vmatpush1.msra.mxu0 %v6297_v42  ;;  %1300 = vmatpush1.msra.mxu1 %v6302_v43 }
  0xac   : > { %1221 = vmatprep.subr.mxu0 %v6309_v44  ;;  %1301 = vmatprep.subr.mxu1 %v6314_v45 }
  0xad   : > { %1222 = vmatpush1.msra.mxu0 %v6326_v46  ;;  %1255 = vmatprep.mubr.f32.mxu0 %v10113_v60 }
  0xae   : > { %1302 = vmatpush1.msra.mxu1 %v6333_v47  ;;  %1335 = vmatprep.mubr.f32.mxu1 %v10113_v60 }
  0xaf   : > { %5228 = vmatmul.mubr.msk.f32.vlgmr.msra.gmra.mxu0 %vm405_vm0, %v337_v35  ;;  %5229 = vmatmul.mubr.msk.f32.vlgmr.msra.gmra.mxu1 %vm405_vm0, %v338_v33  ;;  %v339_v33 = vld [vmem:[%s6319_s23 + $0x9] sm:$0x1] }
  0xb0   : > { %1350 = vmatprep.subr.mxu0 %v6346_v51  ;;  %1424 = vmatprep.subr.mxu1 %v6042_v0 }
  0xb1   : > { %1351 = vmatpush1.msra.mxu0 %v6353_v52  ;;  %1425 = vmatpush1.msra.mxu1 %v6052_v2 }
  0xb2   : > { %1352 = vmatprep.subr.mxu0 %v6361_v53  ;;  %1426 = vmatprep.subr.mxu1 %v6064_v4 }
  0xb3   : > { %1353 = vmatpush1.msra.mxu0 %v6368_v54  ;;  %1427 = vmatpush1.msra.mxu1 %v6076_v6 }
  0xb4   : > { %1354 = vmatprep.subr.mxu0 %v6375_v55  ;;  %1428 = vmatprep.subr.mxu1 %v10125_v49 }
  0xb5   : > { %1355 = vmatpush1.msra.mxu0 %v6382_v56  ;;  %1429 = vmatpush1.msra.mxu1 %v10126_v34 }
  0xb6   : > { %1356 = vmatprep.subr.mxu0 %v6389_v57  ;;  %1430 = vmatprep.subr.mxu1 %v10127_v48 }
  0xb7   : > { %1357 = vmatpush1.msra.mxu0 %v6396_v58  ;;  %1431 = vmatpush1.msra.mxu1 %v10128_v3 }
  0xb8   : > { %1358 = vmatprep.subr.mxu0 %v6403_v59  ;;  %1432 = vmatprep.subr.mxu1 %v10129_v5 }
  0xb9   : > { %1359 = vmatpush1.msra.mxu0 %v10114_v50  ;;  %1433 = vmatpush1.msra.mxu1 %v10130_v7 }
  0xba   : > { %1360 = vmatprep.subr.mxu0 %v10115_v8  ;;  %1434 = vmatprep.subr.mxu1 %v10131_v9 }
  0xbb   : > { %1361 = vmatpush1.msra.mxu0 %v10116_v10  ;;  %1435 = vmatpush1.msra.mxu1 %v10132_v11 }
  0xbc   : > { %1362 = vmatprep.subr.mxu0 %v10117_v12  ;;  %1436 = vmatprep.subr.mxu1 %v10133_v13 }
  0xbd   : > { %1363 = vmatpush1.msra.mxu0 %v10118_v14  ;;  %1437 = vmatpush1.msra.mxu1 %v10134_v15 }
  0xbe   : > { %1364 = vmatprep.subr.mxu0 %v10119_v16  ;;  %1438 = vmatprep.subr.mxu1 %v6207_v28 }
  0xbf   : > { %1365 = vmatpush1.msra.mxu0 %v10120_v18  ;;  %1439 = vmatpush1.msra.mxu1 %v6219_v30 }
  0xc0   : > { %1366 = vmatprep.subr.mxu0 %v10121_v20  ;;  %1440 = vmatprep.subr.mxu1 %v6236_v32 }
  0xc1   : > { %1367 = vmatpush1.msra.mxu0 %v10122_v22  ;;  %1441 = vmatpush1.msra.mxu1 %v10135_v23  ;;  %v10136_v23 = vld [vmem:[#allocation44_spill] sm:$0xff] }
  0xc2   : > { %1368 = vmatprep.subr.mxu0 %v10123_v24  ;;  %1442 = vmatprep.subr.mxu1 %v6260_v36 }
  0xc3   : > { %1369 = vmatpush1.msra.mxu0 %v10124_v26  ;;  %1443 = vmatpush1.msra.mxu1 %v6272_v38 }
  0xc4   : > { %1370 = vmatprep.subr.mxu0 %v6487_v61  ;;  %1444 = vmatprep.subr.mxu1 %v6285_v40  ;;  %v10139_v40 = vld [vmem:[#allocation7_spill] sm:$0xff] }
  0xc5   : > { %1371 = vmatpush1.msra.mxu0 %v6494_v62  ;;  %1445 = vmatpush1.msra.mxu1 %v6297_v42  ;;  %v10137_v42 = vld [vmem:[#allocation5_spill] sm:$0xff] }
  0xc6   : > { %1372 = vmatprep.subr.mxu0 %v6501_v63  ;;  %1446 = vmatprep.subr.mxu1 %v6309_v44  ;;  %v10138_v44 = vld [vmem:[#allocation6_spill] sm:$0xff] }
  0xc7   : > { %1373 = vmatpush1.msra.mxu0 %v10136_v23  ;;  %1406 = vmatprep.mubr.f32.mxu0 %v10113_v60 }
  0xc8   : > { %1447 = vmatpush1.msra.mxu1 %v6326_v46  ;;  %1480 = vmatprep.mubr.f32.mxu1 %v10113_v60  ;;  %v10140_v46 = vld [vmem:[#allocation9_spill] sm:$0xff] }
  0xc9   : > { %5230 = vmatmul.mubr.msk.f32.vlgmr.msra.gmra.mxu0 %vm405_vm0, %v337_v35  ;;  %5231 = vmatmul.mubr.msk.f32.vlgmr.msra.gmra.mxu1 %vm405_vm0, %v339_v33  ;;  %v10141_v35 = vld [vmem:[#allocation11_spill] sm:$0xff] }
  0xca   : > { %1504 = vmatprep.subr.mxu0 %v6047_v1  ;;  %1575 = vmatprep.subr.mxu1 %v6346_v51  ;;  %v10142_v51 = vld [vmem:[#allocation13_spill] sm:$0xff] }
  0xcb   : > { %1505 = vmatpush1.msra.mxu0 %v10137_v42  ;;  %1576 = vmatpush1.msra.mxu1 %v6353_v52  ;;  %v10143_v52 = vld [vmem:[#allocation15_spill] sm:$0xff] }
  0xcc   : > { %1506 = vmatprep.subr.mxu0 %v10138_v44  ;;  %1577 = vmatprep.subr.mxu1 %v6361_v53 }
  0xcd   : > { %1507 = vmatpush1.msra.mxu0 %v10139_v40  ;;  %1578 = vmatpush1.msra.mxu1 %v6368_v54 }
  0xce   : > { %1508 = vmatprep.subr.mxu0 %v10140_v46  ;;  %1579 = vmatprep.subr.mxu1 %v6375_v55 }
  0xcf   : > { %1509 = vmatpush1.msra.mxu0 %v10141_v35  ;;  %1580 = vmatpush1.msra.mxu1 %v6382_v56  ;;  %v10144_v56 = vld [vmem:[#allocation20_spill] sm:$0xff] }
  0xd0   : > { %1510 = vmatprep.subr.mxu0 %v10142_v51  ;;  %1581 = vmatprep.subr.mxu1 %v6389_v57 }
  0xd1   : > { %1511 = vmatpush1.msra.mxu0 %v10143_v52  ;;  %1582 = vmatpush1.msra.mxu1 %v6396_v58 }
  0xd2   : > { %1512 = vmatprep.subr.mxu0 %v6139_v17  ;;  %1583 = vmatprep.subr.mxu1 %v6403_v59 }
  0xd3   : > { %1513 = vmatpush1.msra.mxu0 %v6151_v19  ;;  %1584 = vmatpush1.msra.mxu1 %v10114_v50 }
  0xd4   : > { %1514 = vmatprep.subr.mxu0 %v6163_v21  ;;  %1585 = vmatprep.subr.mxu1 %v10115_v8  ;;  %v10145_v8 = vld [vmem:[#allocation23_spill] sm:$0xff] }
  0xd5   : > { %1515 = vmatpush1.msra.mxu0 %v10144_v56  ;;  %1586 = vmatpush1.msra.mxu1 %v10116_v10  ;;  %v10146_v10 = vld [vmem:[#allocation25_spill] sm:$0xff] }
  0xd6   : > { %1516 = vmatprep.subr.mxu0 %v6188_v25  ;;  %1587 = vmatprep.subr.mxu1 %v10117_v12 }
  0xd7   : > { %1517 = vmatpush1.msra.mxu0 %v6200_v27  ;;  %1588 = vmatpush1.msra.mxu1 %v10118_v14 }
  0xd8   : > { %1518 = vmatprep.subr.mxu0 %v6212_v29  ;;  %1589 = vmatprep.subr.mxu1 %v10119_v16 }
  0xd9   : > { %1519 = vmatpush1.msra.mxu0 %v6224_v31  ;;  %1590 = vmatpush1.msra.mxu1 %v10120_v18 }
  0xda   : > { %1520 = vmatprep.subr.mxu0 %v10145_v8  ;;  %1591 = vmatprep.subr.mxu1 %v10121_v20 }
  0xdb   : > { %1521 = vmatpush1.msra.mxu0 %v10146_v10  ;;  %1592 = vmatpush1.msra.mxu1 %v10122_v22  ;;  %v340_v22 = vld [vmem:[%s6319_s23 + $0xa] sm:$0x1] }
  0xdc   : > { %1522 = vmatprep.subr.mxu0 %v6265_v37  ;;  %1593 = vmatprep.subr.mxu1 %v10123_v24 }
  0xdd   : > { %1523 = vmatpush1.msra.mxu0 %v6277_v39  ;;  %1594 = vmatpush1.msra.mxu1 %v10124_v26 }
  0xde   : > { %1524 = vmatprep.subr.mxu0 %v6290_v41  ;;  %1595 = vmatprep.subr.mxu1 %v6487_v61 }
  0xdf   : > { %1525 = vmatpush1.msra.mxu0 %v6302_v43  ;;  %1596 = vmatpush1.msra.mxu1 %v6494_v62 }
  0xe0   : > { %1526 = vmatprep.subr.mxu0 %v6314_v45  ;;  %1597 = vmatprep.subr.mxu1 %v6501_v63 }
  0xe1   : > { %1527 = vmatpush1.msra.mxu0 %v6333_v47  ;;  %1560 = vmatprep.mubr.f32.mxu0 %v10113_v60 }
  0xe2   : > { %1598 = vmatpush1.msra.mxu1 %v10136_v23  ;;  %1631 = vmatprep.mubr.f32.mxu1 %v10113_v60 }
  0xe3   : > { %5232 = vmatmul.mubr.msk.f32.vlgmr.msra.gmra.mxu0 %vm405_vm0, %v340_v22  ;;  %5233 = vmatmul.mubr.msk.f32.vlgmr.msra.gmra.mxu1 %vm405_vm0, %v339_v33  ;;  %v10155_v22 = vld [vmem:[#allocation32_spill] sm:$0xff]  ;;  %v7093_v33 = vld [vmem:[%s9894_s1 + $0x170] sm:$0xff] }
  0xe4   : > { %1649 = vmatprep.subr.mxu0 %v6042_v0  ;;  %1729 = vmatprep.subr.mxu1 %v6047_v1 }
  0xe5   : > { %1650 = vmatpush1.msra.mxu0 %v6052_v2  ;;  %1730 = vmatpush1.msra.mxu1 %v10137_v42  ;;  %v7017_v42 = vld [vmem:[%s9894_s1 + $0x1b8] sm:$0xff] }
  0xe6   : > { %1651 = vmatprep.subr.mxu0 %v6064_v4  ;;  %1731 = vmatprep.subr.mxu1 %v10138_v44  ;;  %v10149_v4 = vld [vmem:[#allocation26_spill] sm:$0xff]  ;;  %10164 = vst [vmem:[#allocation43_spill] sm:$0xff] %v7017_v42 }
  0xe7   : > { %1652 = vmatpush1.msra.mxu0 %v6076_v6  ;;  %1732 = vmatpush1.msra.mxu1 %v10139_v40  ;;  %v10151_v6 = vld [vmem:[#allocation28_spill] sm:$0xff]  ;;  %v7003_v40 = vld [vmem:[%s9894_s1 + $0x1c8] sm:$0xff]  ;;  %v7024_v44 = vld [vmem:[%s9894_s1 + $0x1b0] sm:$0xff] }
  0xe8   : > { %1653 = vmatprep.subr.mxu0 %v10125_v49  ;;  %1733 = vmatprep.subr.mxu1 %v10140_v46  ;;  %10162 = vst [vmem:[#allocation40_spill] sm:$0xff] %v7003_v40  ;;  %10166 = vst [vmem:[#allocation8_spill] sm:$0xff] %v7024_v44  ;;  %v7038_v46 = vld [vmem:[%s9894_s1 + $0x1a0] sm:$0xff] }
  0xe9   : > { %1654 = vmatpush1.msra.mxu0 %v10126_v34  ;;  %1734 = vmatpush1.msra.mxu1 %v10141_v35  ;;  %10168 = vst [vmem:[#allocation12_spill] sm:$0xff] %v7038_v46  ;;  %v7070_v49 = vld [vmem:[%s9894_s1 + $0x180] sm:$0xff]  ;;  %v7081_v34 = vld [vmem:[%s9894_s1 + $0x178] sm:$0xff]  ;;  %v7100_v35 = vld [vmem:[%s9894_s1 + $0x168] sm:$0xff] }
  0xea   : > { %1655 = vmatprep.subr.mxu0 %v10127_v48  ;;  %1735 = vmatprep.subr.mxu1 %v10142_v51  ;;  %v7052_v51 = vld [vmem:[%s9894_s1 + $0x190] sm:$0xff]  ;;  %10170 = vst [vmem:[#allocation16_spill] sm:$0xff] %v7070_v49  ;;  %v7087_v48 = vld [vmem:[%s9894_s1 + $0xb8] sm:$0xff] }
  0xeb   : > { %1656 = vmatpush1.msra.mxu0 %v10128_v3  ;;  %1736 = vmatpush1.msra.mxu1 %v10143_v52  ;;  %v10148_v3 = vld [vmem:[#allocation24_spill] sm:$0xff]  ;;  %v7059_v52 = vld [vmem:[%s9894_s1 + $0x188] sm:$0xff] }
  0xec   : > { %1657 = vmatprep.subr.mxu0 %v10129_v5  ;;  %1737 = vmatprep.subr.mxu1 %v6139_v17  ;;  %v10150_v5 = vld [vmem:[#allocation27_spill] sm:$0xff]  ;;  %v6919_v17 = vld [vmem:[%s9894_s1 + $0x228] sm:$0xff] }
  0xed   : > { %1658 = vmatpush1.msra.mxu0 %v10130_v7  ;;  %1738 = vmatpush1.msra.mxu1 %v6151_v19  ;;  %v475_v0 = vpop.f32.mrf.mxu0  ;;  %v549_v1 = vpop.f32.mrf.mxu1  ;;  %v6891_v7 = vld [vmem:[%s6319_s23 + $0xb] sm:$0x1]  ;;  %v6926_v19 = vld [vmem:[%s9894_s1 + $0x220] sm:$0xff] }
  0xee   : > { %1659 = vmatprep.subr.mxu0 %v10131_v9  ;;  %1739 = vmatprep.subr.mxu1 %v6163_v21  ;;  %v6864_v2 = vadd.f32 %v549_v1, %v475_v0  ;;  %v10152_v9 = vld [vmem:[#allocation29_spill] sm:$0xff]  ;;  %v6933_v21 = vld [vmem:[%s9894_s1 + $0x218] sm:$0xff] }
  0xef   : > { %1660 = vmatpush1.msra.mxu0 %v10132_v11  ;;  %1740 = vmatpush1.msra.mxu1 %v10144_v56  ;;  %v6905_v11 = vld [vmem:[%s9894_s1 + $0x238] sm:$0xff]  ;;  %v7063_v56 = vld [vmem:[%s6319_s23 + $0xd] sm:$0x1]  ;;  %v7107_v0 = vld [vmem:[%s9894_s1 + $0x160] sm:$0xff] }
  0xf0   : > { %10147 = vst [vmem:[#allocation33_spill] sm:$0xff] %v6864_v2  ;;  %1661 = vmatprep.subr.mxu0 %v10133_v13  ;;  %1741 = vmatprep.subr.mxu1 %v6188_v25  ;;  %v10154_v13 = vld [vmem:[#allocation31_spill] sm:$0xff] }
  0xf1   : > { %1662 = vmatpush1.msra.mxu0 %v10134_v15  ;;  %1742 = vmatpush1.msra.mxu1 %v6200_v27  ;;  %v6912_v15 = vld [vmem:[%s9894_s1 + $0x230] sm:$0xff]  ;;  %v6947_v27 = vld [vmem:[%s9894_s1 + $0x208] sm:$0xff]  ;;  %v7114_v1 = vld [vmem:[%s9894_s1 + $0x158] sm:$0xff] }
  0xf2   : > { %1663 = vmatprep.subr.mxu0 %v6207_v28  ;;  %1743 = vmatprep.subr.mxu1 %v6212_v29  ;;  %v6940_v25 = vld [vmem:[%s9894_s1 + $0x210] sm:$0xff]  ;;  %v6954_v28 = vld [vmem:[%s9894_s1 + $0x200] sm:$0xff]  ;;  %v6961_v29 = vld [vmem:[%s9894_s1 + $0x1f8] sm:$0xff] }
  0xf3   : > { %1664 = vmatpush1.msra.mxu0 %v6219_v30  ;;  %1744 = vmatpush1.msra.mxu1 %v6224_v31  ;;  %v6968_v30 = vld [vmem:[%s9894_s1 + $0x1f0] sm:$0xff] }
  0xf4   : > { %1665 = vmatprep.subr.mxu0 %v6236_v32  ;;  %1745 = vmatprep.subr.mxu1 %v10145_v8  ;;  %v342_v8 = vld [vmem:[%s6319_s23 + $0xc] sm:$0x1]  ;;  %v7403_v2 = vld [vmem:[%s9894_s1 + $0x50] sm:$0xff] }
  0xf5   : > { %1666 = vmatpush1.msra.mxu0 %v10148_v3  ;;  %1746 = vmatpush1.msra.mxu1 %v10146_v10  ;;  %v10153_v10 = vld [vmem:[#allocation30_spill] sm:$0xff]  ;;  %v7142_v3 = vld [vmem:[%s9894_s1 + $0x138] sm:$0xff] }
  0xf6   : > { %1667 = vmatprep.subr.mxu0 %v6260_v36  ;;  %1747 = vmatprep.subr.mxu1 %v6265_v37  ;;  %v10156_v31 = vld [vmem:[#allocation34_spill] sm:$0xff]  ;;  %v10158_v36 = vld [vmem:[#allocation35_spill] sm:$0xff]  ;;  %v6982_v37 = vld [vmem:[%s9894_s1 + $0x1e0] sm:$0xff]  ;;  %10173 = vst [vmem:[#allocation19_spill] sm:$0xff] %v7142_v3 }
  0xf7   : > { %1668 = vmatpush1.msra.mxu0 %v6272_v38  ;;  %1748 = vmatpush1.msra.mxu1 %v6277_v39  ;;  %v6975_v32 = vld [vmem:[%s9894_s1 + $0x1e8] sm:$0xff]  ;;  %10159 = vst [vmem:[#allocation37_spill] sm:$0xff] %v6982_v37  ;;  %v6989_v38 = vld [vmem:[%s9894_s1 + $0x1d8] sm:$0xff]  ;;  %v6996_v39 = vld [vmem:[%s9894_s1 + $0x1d0] sm:$0xff] }
  0xf8   : > { %1669 = vmatprep.subr.mxu0 %v10149_v4  ;;  %1749 = vmatprep.subr.mxu1 %v6290_v41  ;;  %10157 = vst [vmem:[#allocation36_spill] sm:$0xff] %v6975_v32  ;;  %10160 = vst [vmem:[#allocation38_spill] sm:$0xff] %v6989_v38  ;;  %v7010_v41 = vld [vmem:[%s9894_s1 + $0x1c0] sm:$0xff]  ;;  %v7177_v4 = vld [vmem:[%s9894_s1 + $0x110] sm:$0xff] }
  0xf9   : > { %1670 = vmatpush1.msra.mxu0 %v10150_v5  ;;  %1750 = vmatpush1.msra.mxu1 %v6302_v43  ;;  %10161 = vst [vmem:[#allocation39_spill] sm:$0xff] %v6996_v39  ;;  %10163 = vst [vmem:[#allocation42_spill] sm:$0xff] %v7010_v41  ;;  %v10165_v43 = vld [vmem:[#allocation41_spill] sm:$0xff] }
  0xfa   : > { %1671 = vmatprep.subr.mxu0 %v10151_v6  ;;  %1751 = vmatprep.subr.mxu1 %v6314_v45  ;;  %v7031_v45 = vld [vmem:[%s9894_s1 + $0x1a8] sm:$0xff]  ;;  %10178 = vst [vmem:[#allocation6_spill] sm:$0xff] %v7177_v4  ;;  %v7226_v6 = vld [vmem:[%s9894_s1 + $0xd8] sm:$0xff] }
  0xfb   : > { %1672 = vmatpush1.msra.mxu0 %v10152_v9  ;;  %1705 = vmatprep.mubr.f32.mxu0 %v10113_v60  ;;  %10167 = vst [vmem:[#allocation10_spill] sm:$0xff] %v7031_v45  ;;  %v7184_v5 = vld [vmem:[%s9894_s1 + $0x108] sm:$0xff]  ;;  %v7333_v9 = vld [vmem:[%s9894_s1 + $0xa0] sm:$0xff] }
  0xfc   : > { %1752 = vmatpush1.msra.mxu1 %v6333_v47  ;;  %1785 = vmatprep.mubr.f32.mxu1 %v10113_v60  ;;  %v7045_v47 = vld [vmem:[%s9894_s1 + $0x198] sm:$0xff]  ;;  %10179 = vst [vmem:[#allocation7_spill] sm:$0xff] %v7184_v5 }
  0xfd   : > { %5234 = vmatmul.mubr.msk.f32.vlgmr.msra.gmra.mxu0 %vm405_vm0, %v6891_v7  ;;  %5235 = vmatmul.mubr.msk.f32.vlgmr.msra.gmra.mxu1 %vm405_vm0, %v342_v8  ;;  %10169 = vst [vmem:[#allocation14_spill] sm:$0xff] %v7045_v47  ;;  %v7326_v8 = vld [vmem:[%s9894_s1 + $0xa8] sm:$0xff] }
  0xfe   : > { %1800 = vmatprep.subr.mxu0 %v10153_v10  ;;  %1874 = vmatprep.subr.mxu1 %v6905_v11  ;;  %v7340_v10 = vld [vmem:[%s9894_s1 + $0x98] sm:$0xff] }
  0xff   : > { %1801 = vmatpush1.msra.mxu0 %v10154_v13  ;;  %1875 = vmatpush1.msra.mxu1 %v6912_v15 }
 0x100   : > { %1802 = vmatprep.subr.mxu0 %v6361_v53  ;;  %1876 = vmatprep.subr.mxu1 %v6919_v17 }
 0x101   : > { %1803 = vmatpush1.msra.mxu0 %v6368_v54  ;;  %1877 = vmatpush1.msra.mxu1 %v6926_v19 }
 0x102   : > { %1804 = vmatprep.subr.mxu0 %v6375_v55  ;;  %1878 = vmatprep.subr.mxu1 %v6933_v21 }
 0x103   : > { %1805 = vmatpush1.msra.mxu0 %v10155_v22  ;;  %1879 = vmatpush1.msra.mxu1 %v6940_v25 }
 0x104   : > { %1806 = vmatprep.subr.mxu0 %v6389_v57  ;;  %1880 = vmatprep.subr.mxu1 %v6947_v27 }
 0x105   : > { %1807 = vmatpush1.msra.mxu0 %v6396_v58  ;;  %1881 = vmatpush1.msra.mxu1 %v6954_v28 }
 0x106   : > { %1808 = vmatprep.subr.mxu0 %v6403_v59  ;;  %1882 = vmatprep.subr.mxu1 %v6961_v29 }
 0x107   : > { %1809 = vmatpush1.msra.mxu0 %v10114_v50  ;;  %1883 = vmatpush1.msra.mxu1 %v6968_v30 }
 0x108   : > { %1810 = vmatprep.subr.mxu0 %v10156_v31  ;;  %1884 = vmatprep.subr.mxu1 %v6975_v32 }
 0x109   : > { %1811 = vmatpush1.msra.mxu0 %v10158_v36  ;;  %1885 = vmatpush1.msra.mxu1 %v6982_v37 }
 0x10a   : > { %1812 = vmatprep.subr.mxu0 %v10117_v12  ;;  %1886 = vmatprep.subr.mxu1 %v6989_v38 }
 0x10b   : > { %1813 = vmatpush1.msra.mxu0 %v10118_v14  ;;  %1887 = vmatpush1.msra.mxu1 %v6996_v39 }
 0x10c   : > { %1814 = vmatprep.subr.mxu0 %v10119_v16  ;;  %1888 = vmatprep.subr.mxu1 %v7003_v40 }
 0x10d   : > { %1815 = vmatpush1.msra.mxu0 %v10120_v18  ;;  %1889 = vmatpush1.msra.mxu1 %v7010_v41 }
 0x10e   : > { %1816 = vmatprep.subr.mxu0 %v10121_v20  ;;  %1890 = vmatprep.subr.mxu1 %v7017_v42 }
 0x10f   : > { %1817 = vmatpush1.msra.mxu0 %v10165_v43  ;;  %1891 = vmatpush1.msra.mxu1 %v7024_v44 }
 0x110   : > { %1818 = vmatprep.subr.mxu0 %v10123_v24  ;;  %1892 = vmatprep.subr.mxu1 %v7031_v45 }
 0x111   : > { %1819 = vmatpush1.msra.mxu0 %v10124_v26  ;;  %1893 = vmatpush1.msra.mxu1 %v7038_v46 }
 0x112   : > { %1820 = vmatprep.subr.mxu0 %v6487_v61  ;;  %1894 = vmatprep.subr.mxu1 %v7045_v47 }
 0x113   : > { %1821 = vmatpush1.msra.mxu0 %v6494_v62  ;;  %1895 = vmatpush1.msra.mxu1 %v7052_v51 }
 0x114   : > { %1822 = vmatprep.subr.mxu0 %v6501_v63  ;;  %1896 = vmatprep.subr.mxu1 %v7059_v52 }
 0x115   : > { %1823 = vmatpush1.msra.mxu0 %v10136_v23  ;;  %1856 = vmatprep.mubr.f32.mxu0 %v10113_v60 }
 0x116   : > { %1897 = vmatpush1.msra.mxu1 %v7070_v49  ;;  %1930 = vmatprep.mubr.f32.mxu1 %v10113_v60 }
 0x117   : > { %5236 = vmatmul.mubr.msk.f32.vlgmr.msra.gmra.mxu0 %vm405_vm0, %v6891_v7  ;;  %5237 = vmatmul.mubr.msk.f32.vlgmr.msra.gmra.mxu1 %vm405_vm0, %v7063_v56  ;;  %v344_v7 = vld [vmem:[%s6319_s23 + $0xe] sm:$0x1] }
 0x118   : > { %1954 = vmatprep.subr.mxu0 %v7081_v34  ;;  %2025 = vmatprep.subr.mxu1 %v7087_v48 }
 0x119   : > { %1955 = vmatpush1.msra.mxu0 %v7093_v33  ;;  %2026 = vmatpush1.msra.mxu1 %v10154_v13  ;;  %v7347_v13 = vld [vmem:[%s9894_s1 + $0x90] sm:$0xff] }
 0x11a   : > { %1956 = vmatprep.subr.mxu0 %v7100_v35  ;;  %2027 = vmatprep.subr.mxu1 %v6361_v53  ;;  %v7121_v53 = vld [vmem:[%s9894_s1 + $0x150] sm:$0xff] }
 0x11b   : > { %1957 = vmatpush1.msra.mxu0 %v7107_v0  ;;  %2028 = vmatpush1.msra.mxu1 %v6368_v54  ;;  %v7128_v54 = vld [vmem:[%s9894_s1 + $0x148] sm:$0xff] }
 0x11c   : > { %1958 = vmatprep.subr.mxu0 %v7114_v1  ;;  %2029 = vmatprep.subr.mxu1 %v6375_v55  ;;  %10171 = vst [vmem:[#allocation17_spill] sm:$0xff] %v7128_v54  ;;  %v7135_v55 = vld [vmem:[%s9894_s1 + $0x140] sm:$0xff] }
 0x11d   : > { %1959 = vmatpush1.msra.mxu0 %v7121_v53  ;;  %2030 = vmatpush1.msra.mxu1 %v10155_v22  ;;  %10172 = vst [vmem:[#allocation18_spill] sm:$0xff] %v7135_v55  ;;  %v7354_v22 = vld [vmem:[%s9894_s1 + $0x88] sm:$0xff] }
 0x11e   : > { %1960 = vmatprep.subr.mxu0 %v7128_v54  ;;  %2031 = vmatprep.subr.mxu1 %v6389_v57  ;;  %v7149_v57 = vld [vmem:[%s9894_s1 + $0x130] sm:$0xff] }
 0x11f   : > { %1961 = vmatpush1.msra.mxu0 %v7135_v55  ;;  %2032 = vmatpush1.msra.mxu1 %v6396_v58  ;;  %10174 = vst [vmem:[#allocation21_spill] sm:$0xff] %v7149_v57  ;;  %v7156_v58 = vld [vmem:[%s9894_s1 + $0x128] sm:$0xff] }
 0x120   : > { %1962 = vmatprep.subr.mxu0 %v7142_v3  ;;  %2033 = vmatprep.subr.mxu1 %v6403_v59  ;;  %10175 = vst [vmem:[#allocation22_spill] sm:$0xff] %v7156_v58  ;;  %v7163_v59 = vld [vmem:[%s9894_s1 + $0x120] sm:$0xff] }
 0x121   : > { %1963 = vmatpush1.msra.mxu0 %v7149_v57  ;;  %2034 = vmatpush1.msra.mxu1 %v10114_v50  ;;  %10176 = vst [vmem:[#allocation44_spill] sm:$0xff] %v7163_v59  ;;  %v7170_v50 = vld [vmem:[%s9894_s1 + $0x118] sm:$0xff] }
 0x122   : > { %1964 = vmatprep.subr.mxu0 %v7156_v58  ;;  %2035 = vmatprep.subr.mxu1 %v10156_v31  ;;  %10177 = vst [vmem:[#allocation5_spill] sm:$0xff] %v7170_v50  ;;  %v7361_v31 = vld [vmem:[%s9894_s1 + $0x80] sm:$0xff] }
 0x123   : > { %1965 = vmatpush1.msra.mxu0 %v7163_v59  ;;  %2036 = vmatpush1.msra.mxu1 %v10158_v36  ;;  %v7368_v36 = vld [vmem:[%s9894_s1 + $0x78] sm:$0xff] }
 0x124   : > { %1966 = vmatprep.subr.mxu0 %v7170_v50  ;;  %2037 = vmatprep.subr.mxu1 %v10117_v12  ;;  %v7191_v12 = vld [vmem:[%s9894_s1 + $0x100] sm:$0xff] }
 0x125   : > { %1967 = vmatpush1.msra.mxu0 %v7177_v4  ;;  %2038 = vmatpush1.msra.mxu1 %v10118_v14  ;;  %v7198_v14 = vld [vmem:[%s9894_s1 + $0xf8] sm:$0xff] }
 0x126   : > { %1968 = vmatprep.subr.mxu0 %v7184_v5  ;;  %2039 = vmatprep.subr.mxu1 %v10119_v16  ;;  %10180 = vst [vmem:[#allocation9_spill] sm:$0xff] %v7198_v14  ;;  %v7205_v16 = vld [vmem:[%s9894_s1 + $0xf0] sm:$0xff] }
 0x127   : > { %1969 = vmatpush1.msra.mxu0 %v7191_v12  ;;  %2040 = vmatpush1.msra.mxu1 %v10120_v18  ;;  %10181 = vst [vmem:[#allocation11_spill] sm:$0xff] %v7205_v16  ;;  %v7212_v18 = vld [vmem:[%s9894_s1 + $0xe8] sm:$0xff] }
 0x128   : > { %1970 = vmatprep.subr.mxu0 %v7198_v14  ;;  %2041 = vmatprep.subr.mxu1 %v10121_v20  ;;  %v7219_v20 = vld [vmem:[%s9894_s1 + $0xe0] sm:$0xff] }
 0x129   : > { %1971 = vmatpush1.msra.mxu0 %v7205_v16  ;;  %2042 = vmatpush1.msra.mxu1 %v10165_v43  ;;  %v7375_v43 = vld [vmem:[%s9894_s1 + $0x70] sm:$0xff] }
 0x12a   : > { %1972 = vmatprep.subr.mxu0 %v7212_v18  ;;  %2043 = vmatprep.subr.mxu1 %v10123_v24  ;;  %v7233_v24 = vld [vmem:[%s9894_s1 + $0xd0] sm:$0xff] }
 0x12b   : > { %1973 = vmatpush1.msra.mxu0 %v7219_v20  ;;  %2044 = vmatpush1.msra.mxu1 %v10124_v26  ;;  %v7240_v26 = vld [vmem:[%s9894_s1 + $0xc8] sm:$0xff] }
 0x12c   : > { %1974 = vmatprep.subr.mxu0 %v7226_v6  ;;  %2045 = vmatprep.subr.mxu1 %v6487_v61  ;;  %v7248_v61 = vld [vmem:[%s9894_s1 + $0xc0] sm:$0xff] }
 0x12d   : > { %1975 = vmatpush1.msra.mxu0 %v7233_v24  ;;  %2046 = vmatpush1.msra.mxu1 %v6494_v62  ;;  %v346_v62 = vld [vmem:[%s6319_s23 + $0x10] sm:$0x1] }
 0x12e   : > { %1976 = vmatprep.subr.mxu0 %v7240_v26  ;;  %2047 = vmatprep.subr.mxu1 %v6501_v63  ;;  %v7319_v63 = vld [vmem:[%s9894_s1 + $0xb0] sm:$0xff] }
 0x12f   : > { %1977 = vmatpush1.msra.mxu0 %v7248_v61  ;;  %2010 = vmatprep.mubr.f32.mxu0 %v10113_v60 }
 0x130   : > { %2048 = vmatpush1.msra.mxu1 %v10136_v23  ;;  %2081 = vmatprep.mubr.f32.mxu1 %v10113_v60  ;;  %v7304_v23 = vld [vmem:[%s6319_s23 + $0xf] sm:$0x1] }
 0x131   : > { %5238 = vmatmul.mubr.msk.f32.vlgmr.msra.gmra.mxu0 %vm405_vm0, %v344_v7  ;;  %5239 = vmatmul.mubr.msk.f32.vlgmr.msra.gmra.mxu1 %vm405_vm0, %v7063_v56  ;;  %v7382_v56 = vld [vmem:[%s9894_s1 + $0x68] sm:$0xff]  ;;  %v7389_v7 = vld [vmem:[%s9894_s1 + $0x60] sm:$0xff] }
 0x132   : > { %2099 = vmatprep.subr.mxu0 %v6905_v11  ;;  %2179 = vmatprep.subr.mxu1 %v7081_v34 }
 0x133   : > { %2100 = vmatpush1.msra.mxu0 %v6912_v15  ;;  %2180 = vmatpush1.msra.mxu1 %v7093_v33 }
 0x134   : > { %2101 = vmatprep.subr.mxu0 %v6919_v17  ;;  %2181 = vmatprep.subr.mxu1 %v7100_v35 }
 0x135   : > { %2102 = vmatpush1.msra.mxu0 %v6926_v19  ;;  %2182 = vmatpush1.msra.mxu1 %v7107_v0 }
 0x136   : > { %2103 = vmatprep.subr.mxu0 %v6933_v21  ;;  %2183 = vmatprep.subr.mxu1 %v7114_v1 }
 0x137   : > { %2104 = vmatpush1.msra.mxu0 %v6940_v25  ;;  %2184 = vmatpush1.msra.mxu1 %v7121_v53 }
 0x138   : > { %2105 = vmatprep.subr.mxu0 %v6947_v27  ;;  %2185 = vmatprep.subr.mxu1 %v7128_v54 }
 0x139   : > { %2106 = vmatpush1.msra.mxu0 %v6954_v28  ;;  %2186 = vmatpush1.msra.mxu1 %v7135_v55 }
 0x13a   : > { %2107 = vmatprep.subr.mxu0 %v6961_v29  ;;  %2187 = vmatprep.subr.mxu1 %v7142_v3 }
 0x13b   : > { %2108 = vmatpush1.msra.mxu0 %v6968_v30  ;;  %2188 = vmatpush1.msra.mxu1 %v7149_v57 }
 0x13c   : > { %2109 = vmatprep.subr.mxu0 %v6975_v32  ;;  %2189 = vmatprep.subr.mxu1 %v7156_v58 }
 0x13d   : > { %2110 = vmatpush1.msra.mxu0 %v6982_v37  ;;  %2190 = vmatpush1.msra.mxu1 %v7163_v59 }
 0x13e   : > { %2111 = vmatprep.subr.mxu0 %v6989_v38  ;;  %2191 = vmatprep.subr.mxu1 %v7170_v50 }
 0x13f   : > { %2112 = vmatpush1.msra.mxu0 %v6996_v39  ;;  %2192 = vmatpush1.msra.mxu1 %v7177_v4 }
 0x140   : > { %2113 = vmatprep.subr.mxu0 %v7003_v40  ;;  %2193 = vmatprep.subr.mxu1 %v7184_v5 }
 0x141   : > { %2114 = vmatpush1.msra.mxu0 %v7010_v41  ;;  %2194 = vmatpush1.msra.mxu1 %v7191_v12 }
 0x142   : > { %2115 = vmatprep.subr.mxu0 %v7017_v42  ;;  %2195 = vmatprep.subr.mxu1 %v7198_v14 }
 0x143   : > { %2116 = vmatpush1.msra.mxu0 %v7024_v44  ;;  %2196 = vmatpush1.msra.mxu1 %v7205_v16 }
 0x144   : > { %2117 = vmatprep.subr.mxu0 %v7031_v45  ;;  %2197 = vmatprep.subr.mxu1 %v7212_v18 }
 0x145   : > { %2118 = vmatpush1.msra.mxu0 %v7038_v46  ;;  %2198 = vmatpush1.msra.mxu1 %v7219_v20 }
 0x146   : > { %2119 = vmatprep.subr.mxu0 %v7045_v47  ;;  %2199 = vmatprep.subr.mxu1 %v7226_v6 }
 0x147   : > { %2120 = vmatpush1.msra.mxu0 %v7052_v51  ;;  %2200 = vmatpush1.msra.mxu1 %v7233_v24 }
 0x148   : > { %2121 = vmatprep.subr.mxu0 %v7059_v52  ;;  %2201 = vmatprep.subr.mxu1 %v7240_v26 }
 0x149   : > { %2122 = vmatpush1.msra.mxu0 %v7070_v49  ;;  %2155 = vmatprep.mubr.f32.mxu0 %v10113_v60 }
 0x14a   : > { %2202 = vmatpush1.msra.mxu1 %v7248_v61  ;;  %2235 = vmatprep.mubr.f32.mxu1 %v10113_v60 }
 0x14b   : > { %5240 = vmatmul.mubr.msk.f32.vlgmr.msra.gmra.mxu0 %vm405_vm0, %v7304_v23  ;;  %5241 = vmatmul.mubr.msk.f32.vlgmr.msra.gmra.mxu1 %vm405_vm0, %v346_v62  ;;  %v7396_v62 = vld [vmem:[%s9894_s1 + $0x58] sm:$0xff] }
 0x14c   : > { %2250 = vmatprep.subr.mxu0 %v7087_v48  ;;  %2324 = vmatprep.subr.mxu1 %v6905_v11 }
 0x14d   : > { %2251 = vmatpush1.msra.mxu0 %v7319_v63  ;;  %2325 = vmatpush1.msra.mxu1 %v6912_v15 }
 0x14e   : > { %2252 = vmatprep.subr.mxu0 %v7326_v8  ;;  %2326 = vmatprep.subr.mxu1 %v6919_v17 }
 0x14f   : > { %2253 = vmatpush1.msra.mxu0 %v7333_v9  ;;  %2327 = vmatpush1.msra.mxu1 %v6926_v19 }
 0x150   : > { %2254 = vmatprep.subr.mxu0 %v7340_v10  ;;  %2328 = vmatprep.subr.mxu1 %v6933_v21 }
 0x151   : > { %2255 = vmatpush1.msra.mxu0 %v7347_v13  ;;  %2329 = vmatpush1.msra.mxu1 %v6940_v25 }
 0x152   : > { %2256 = vmatprep.subr.mxu0 %v7354_v22  ;;  %2330 = vmatprep.subr.mxu1 %v6947_v27 }
 0x153   : > { %2257 = vmatpush1.msra.mxu0 %v7361_v31  ;;  %2331 = vmatpush1.msra.mxu1 %v6954_v28 }
 0x154   : > { %2258 = vmatprep.subr.mxu0 %v7368_v36  ;;  %2332 = vmatprep.subr.mxu1 %v6961_v29 }
 0x155   : > { %2259 = vmatpush1.msra.mxu0 %v7375_v43  ;;  %2333 = vmatpush1.msra.mxu1 %v6968_v30 }
 0x156   : > { %2260 = vmatprep.subr.mxu0 %v7382_v56  ;;  %2334 = vmatprep.subr.mxu1 %v6975_v32  ;;  %v347_v32 = vld [vmem:[%s6319_s23 + $0x11] sm:$0x1] }
 0x157   : > { %2261 = vmatpush1.msra.mxu0 %v7389_v7  ;;  %2335 = vmatpush1.msra.mxu1 %v6982_v37  ;;  %v7410_v37 = vld [vmem:[%s9894_s1 + $0x48] sm:$0xff] }
 0x158   : > { %2262 = vmatprep.subr.mxu0 %v7396_v62  ;;  %2336 = vmatprep.subr.mxu1 %v6989_v38  ;;  %v7417_v38 = vld [vmem:[%s9894_s1 + $0x40] sm:$0xff] }
 0x159   : > { %2263 = vmatpush1.msra.mxu0 %v7403_v2  ;;  %2337 = vmatpush1.msra.mxu1 %v6996_v39  ;;  %v7424_v39 = vld [vmem:[%s9894_s1 + $0x38] sm:$0xff] }
 0x15a   : > { %2264 = vmatprep.subr.mxu0 %v7410_v37  ;;  %2338 = vmatprep.subr.mxu1 %v7003_v40  ;;  %v7431_v40 = vld [vmem:[%s9894_s1 + $0x30] sm:$0xff] }
 0x15b   : > { %2265 = vmatpush1.msra.mxu0 %v7417_v38  ;;  %2339 = vmatpush1.msra.mxu1 %v7010_v41  ;;  %v7438_v41 = vld [vmem:[%s9894_s1 + $0x28] sm:$0xff] }
 0x15c   : > { %2266 = vmatprep.subr.mxu0 %v7424_v39  ;;  %2340 = vmatprep.subr.mxu1 %v7017_v42  ;;  %v7445_v42 = vld [vmem:[%s9894_s1 + $0x20] sm:$0xff] }
 0x15d   : > { %2267 = vmatpush1.msra.mxu0 %v7431_v40  ;;  %2341 = vmatpush1.msra.mxu1 %v7024_v44  ;;  %v7452_v44 = vld [vmem:[%s9894_s1 + $0x18] sm:$0xff] }
 0x15e   : > { %2268 = vmatprep.subr.mxu0 %v7438_v41  ;;  %2342 = vmatprep.subr.mxu1 %v7031_v45  ;;  %v7459_v45 = vld [vmem:[%s9894_s1 + $0x10] sm:$0xff] }
 0x15f   : > { %2269 = vmatpush1.msra.mxu0 %v7445_v42  ;;  %2343 = vmatpush1.msra.mxu1 %v7038_v46  ;;  %v7466_v46 = vld [vmem:[%s9894_s1 + $0x8] sm:$0xff] }
 0x160   : > { %2270 = vmatprep.subr.mxu0 %v7452_v44  ;;  %2344 = vmatprep.subr.mxu1 %v7045_v47  ;;  %v7474_v47 = vld [vmem:[%s9894_s1] sm:$0xff] }
 0x161   : > { %2271 = vmatpush1.msra.mxu0 %v7459_v45  ;;  %2345 = vmatpush1.msra.mxu1 %v7052_v51 }
 0x162   : > { %2272 = vmatprep.subr.mxu0 %v7466_v46  ;;  %2346 = vmatprep.subr.mxu1 %v7059_v52 }
 0x163   : > { %2273 = vmatpush1.msra.mxu0 %v7474_v47  ;;  %2306 = vmatprep.mubr.f32.mxu0 %v10113_v60 }
 0x164   : > { %2347 = vmatpush1.msra.mxu1 %v7070_v49  ;;  %2380 = vmatprep.mubr.f32.mxu1 %v10113_v60 }
 0x165   : > { %5242 = vmatmul.mubr.msk.f32.vlgmr.msra.gmra.mxu0 %vm405_vm0, %v7304_v23  ;;  %5243 = vmatmul.mubr.msk.f32.vlgmr.msra.gmra.mxu1 %vm405_vm0, %v347_v32  ;;  %v348_v23 = vld [vmem:[%s6319_s23 + $0x12] sm:$0x1] }
 0x166   : > { %2404 = vmatprep.subr.mxu0 %v7081_v34  ;;  %2475 = vmatprep.subr.mxu1 %v7087_v48 }
 0x167   : > { %2405 = vmatpush1.msra.mxu0 %v7093_v33  ;;  %2476 = vmatpush1.msra.mxu1 %v7319_v63 }
 0x168   : > { %2406 = vmatprep.subr.mxu0 %v7100_v35  ;;  %2477 = vmatprep.subr.mxu1 %v7326_v8 }
 0x169   : > { %2407 = vmatpush1.msra.mxu0 %v7107_v0  ;;  %2478 = vmatpush1.msra.mxu1 %v7333_v9 }
 0x16a   : > { %2408 = vmatprep.subr.mxu0 %v7114_v1  ;;  %2479 = vmatprep.subr.mxu1 %v7340_v10 }
 0x16b   : > { %2409 = vmatpush1.msra.mxu0 %v7121_v53  ;;  %2480 = vmatpush1.msra.mxu1 %v7347_v13 }
 0x16c   : > { %2410 = vmatprep.subr.mxu0 %v7128_v54  ;;  %2481 = vmatprep.subr.mxu1 %v7354_v22 }
 0x16d   : > { %2411 = vmatpush1.msra.mxu0 %v7135_v55  ;;  %2482 = vmatpush1.msra.mxu1 %v7361_v31 }
 0x16e   : > { %2412 = vmatprep.subr.mxu0 %v7142_v3  ;;  %2483 = vmatprep.subr.mxu1 %v7368_v36 }
 0x16f   : > { %2413 = vmatpush1.msra.mxu0 %v7149_v57  ;;  %2484 = vmatpush1.msra.mxu1 %v7375_v43 }
 0x170   : > { %2414 = vmatprep.subr.mxu0 %v7156_v58  ;;  %2485 = vmatprep.subr.mxu1 %v7382_v56 }
 0x171   : > { %2415 = vmatpush1.msra.mxu0 %v7163_v59  ;;  %2486 = vmatpush1.msra.mxu1 %v7389_v7 }
 0x172   : > { %2416 = vmatprep.subr.mxu0 %v7170_v50  ;;  %2487 = vmatprep.subr.mxu1 %v7396_v62 }
 0x173   : > { %2417 = vmatpush1.msra.mxu0 %v7177_v4  ;;  %2488 = vmatpush1.msra.mxu1 %v7403_v2 }
 0x174   : > { %2418 = vmatprep.subr.mxu0 %v7184_v5  ;;  %2489 = vmatprep.subr.mxu1 %v7410_v37 }
 0x175   : > { %2419 = vmatpush1.msra.mxu0 %v7191_v12  ;;  %2490 = vmatpush1.msra.mxu1 %v7417_v38 }
 0x176   : > { %2420 = vmatprep.subr.mxu0 %v7198_v14  ;;  %2491 = vmatprep.subr.mxu1 %v7424_v39 }
 0x177   : > { %2421 = vmatpush1.msra.mxu0 %v7205_v16  ;;  %2492 = vmatpush1.msra.mxu1 %v7431_v40 }
 0x178   : > { %2422 = vmatprep.subr.mxu0 %v7212_v18  ;;  %2493 = vmatprep.subr.mxu1 %v7438_v41 }
 0x179   : > { %2423 = vmatpush1.msra.mxu0 %v7219_v20  ;;  %2494 = vmatpush1.msra.mxu1 %v7445_v42 }
 0x17a   : > { %2424 = vmatprep.subr.mxu0 %v7226_v6  ;;  %2495 = vmatprep.subr.mxu1 %v7452_v44 }
 0x17b   : > { %2425 = vmatpush1.msra.mxu0 %v7233_v24  ;;  %2496 = vmatpush1.msra.mxu1 %v7459_v45 }
 0x17c   : > { %2426 = vmatprep.subr.mxu0 %v7240_v26  ;;  %2497 = vmatprep.subr.mxu1 %v7466_v46 }
 0x17d   : > { %2427 = vmatpush1.msra.mxu0 %v7248_v61  ;;  %2460 = vmatprep.mubr.f32.mxu0 %v10113_v60 }
 0x17e   : > { %2498 = vmatpush1.msra.mxu1 %v7474_v47  ;;  %2531 = vmatprep.mubr.f32.mxu1 %v10113_v60 }
 0x17f   : > { %5244 = vmatmul.mubr.msk.f32.vlgmr.msra.gmra.mxu0 %vm405_vm0, %v348_v23  ;;  %5245 = vmatmul.mubr.msk.f32.vlgmr.msra.gmra.mxu1 %vm405_vm0, %v347_v32  ;;  %v10182_v32 = vld [vmem:[#allocation36_spill] sm:$0xff]  ;;  %v10183_v23 = vld [vmem:[#allocation37_spill] sm:$0xff] }
 0x180   : > { %2549 = vmatprep.subr.mxu0 %v6905_v11  ;;  %2629 = vmatprep.subr.mxu1 %v7081_v34 }
 0x181   : > { %2550 = vmatpush1.msra.mxu0 %v6912_v15  ;;  %2630 = vmatpush1.msra.mxu1 %v7093_v33 }
 0x182   : > { %2551 = vmatprep.subr.mxu0 %v6919_v17  ;;  %2631 = vmatprep.subr.mxu1 %v7100_v35 }
 0x183   : > { %2552 = vmatpush1.msra.mxu0 %v6926_v19  ;;  %2632 = vmatpush1.msra.mxu1 %v7107_v0 }
 0x184   : > { %2553 = vmatprep.subr.mxu0 %v6933_v21  ;;  %2633 = vmatprep.subr.mxu1 %v7114_v1 }
 0x185   : > { %2554 = vmatpush1.msra.mxu0 %v6940_v25  ;;  %2634 = vmatpush1.msra.mxu1 %v7121_v53 }
 0x186   : > { %2555 = vmatprep.subr.mxu0 %v6947_v27  ;;  %2635 = vmatprep.subr.mxu1 %v7128_v54  ;;  %v10184_v54 = vld [vmem:[#allocation38_spill] sm:$0xff] }
 0x187   : > { %2556 = vmatpush1.msra.mxu0 %v6954_v28  ;;  %2636 = vmatpush1.msra.mxu1 %v7135_v55  ;;  %v10185_v55 = vld [vmem:[#allocation39_spill] sm:$0xff] }
 0x188   : > { %2557 = vmatprep.subr.mxu0 %v6961_v29  ;;  %2637 = vmatprep.subr.mxu1 %v7142_v3  ;;  %v10186_v3 = vld [vmem:[#allocation40_spill] sm:$0xff] }
 0x189   : > { %2558 = vmatpush1.msra.mxu0 %v6968_v30  ;;  %2638 = vmatpush1.msra.mxu1 %v7149_v57  ;;  %v10187_v57 = vld [vmem:[#allocation42_spill] sm:$0xff] }
 0x18a   : > { %2559 = vmatprep.subr.mxu0 %v10182_v32  ;;  %2639 = vmatprep.subr.mxu1 %v7156_v58  ;;  %v10188_v58 = vld [vmem:[#allocation43_spill] sm:$0xff] }
 0x18b   : > { %2560 = vmatpush1.msra.mxu0 %v10183_v23  ;;  %2640 = vmatpush1.msra.mxu1 %v7163_v59  ;;  %v10189_v59 = vld [vmem:[#allocation8_spill] sm:$0xff] }
 0x18c   : > { %2561 = vmatprep.subr.mxu0 %v10184_v54  ;;  %2641 = vmatprep.subr.mxu1 %v7170_v50  ;;  %v10190_v50 = vld [vmem:[#allocation10_spill] sm:$0xff] }
 0x18d   : > { %2562 = vmatpush1.msra.mxu0 %v10185_v55  ;;  %2642 = vmatpush1.msra.mxu1 %v7177_v4  ;;  %v10191_v4 = vld [vmem:[#allocation12_spill] sm:$0xff] }
 0x18e   : > { %2563 = vmatprep.subr.mxu0 %v10186_v3  ;;  %2643 = vmatprep.subr.mxu1 %v7184_v5  ;;  %v10192_v5 = vld [vmem:[#allocation14_spill] sm:$0xff] }
 0x18f   : > { %2564 = vmatpush1.msra.mxu0 %v10187_v57  ;;  %2644 = vmatpush1.msra.mxu1 %v7191_v12 }
 0x190   : > { %2565 = vmatprep.subr.mxu0 %v10188_v58  ;;  %2645 = vmatprep.subr.mxu1 %v7198_v14  ;;  %v350_v14 = vld [vmem:[%s6319_s23 + $0x14] sm:$0x1] }
 0x191   : > { %2566 = vmatpush1.msra.mxu0 %v10189_v59  ;;  %2646 = vmatpush1.msra.mxu1 %v7205_v16  ;;  %v349_v16 = vld [vmem:[%s6319_s23 + $0x13] sm:$0x1] }
 0x192   : > { %2567 = vmatprep.subr.mxu0 %v10190_v50  ;;  %2647 = vmatprep.subr.mxu1 %v7212_v18 }
 0x193   : > { %2568 = vmatpush1.msra.mxu0 %v10191_v4  ;;  %2648 = vmatpush1.msra.mxu1 %v7219_v20 }
 0x194   : > { %2569 = vmatprep.subr.mxu0 %v10192_v5  ;;  %2649 = vmatprep.subr.mxu1 %v7226_v6 }
 0x195   : > { %2570 = vmatpush1.msra.mxu0 %v7052_v51  ;;  %2650 = vmatpush1.msra.mxu1 %v7233_v24 }
 0x196   : > { %2571 = vmatprep.subr.mxu0 %v7059_v52  ;;  %2651 = vmatprep.subr.mxu1 %v7240_v26 }
 0x197   : > { %2572 = vmatpush1.msra.mxu0 %v7070_v49  ;;  %2605 = vmatprep.mubr.f32.mxu0 %v10113_v60 }
 0x198   : > { %2652 = vmatpush1.msra.mxu1 %v7248_v61  ;;  %2685 = vmatprep.mubr.f32.mxu1 %v10113_v60 }
 0x199   : > { %5246 = vmatmul.mubr.msk.f32.vlgmr.msra.gmra.mxu0 %vm405_vm0, %v349_v16  ;;  %5247 = vmatmul.mubr.msk.f32.vlgmr.msra.gmra.mxu1 %vm405_vm0, %v350_v14  ;;  %v7637_v14 = vld [vmem:[%s6319_s23 + $0x15] sm:$0x1] }
 0x19a   : > { %2700 = vmatprep.subr.mxu0 %v7087_v48  ;;  %2774 = vmatprep.subr.mxu1 %v6905_v11 }
 0x19b   : > { %2701 = vmatpush1.msra.mxu0 %v7319_v63  ;;  %2775 = vmatpush1.msra.mxu1 %v6912_v15 }
 0x19c   : > { %2702 = vmatprep.subr.mxu0 %v7326_v8  ;;  %2776 = vmatprep.subr.mxu1 %v6919_v17 }
 0x19d   : > { %2703 = vmatpush1.msra.mxu0 %v7333_v9  ;;  %2777 = vmatpush1.msra.mxu1 %v6926_v19 }
 0x19e   : > { %2704 = vmatprep.subr.mxu0 %v7340_v10  ;;  %2778 = vmatprep.subr.mxu1 %v6933_v21 }
 0x19f   : > { %2705 = vmatpush1.msra.mxu0 %v7347_v13  ;;  %2779 = vmatpush1.msra.mxu1 %v6940_v25 }
 0x1a0   : > { %2706 = vmatprep.subr.mxu0 %v7354_v22  ;;  %2780 = vmatprep.subr.mxu1 %v6947_v27 }
 0x1a1   : > { %2707 = vmatpush1.msra.mxu0 %v7361_v31  ;;  %2781 = vmatpush1.msra.mxu1 %v6954_v28 }
 0x1a2   : > { %2708 = vmatprep.subr.mxu0 %v7368_v36  ;;  %2782 = vmatprep.subr.mxu1 %v6961_v29 }
 0x1a3   : > { %2709 = vmatpush1.msra.mxu0 %v7375_v43  ;;  %2783 = vmatpush1.msra.mxu1 %v6968_v30 }
 0x1a4   : > { %2710 = vmatprep.subr.mxu0 %v7382_v56  ;;  %2784 = vmatprep.subr.mxu1 %v10182_v32 }
 0x1a5   : > { %2711 = vmatpush1.msra.mxu0 %v7389_v7  ;;  %2785 = vmatpush1.msra.mxu1 %v10183_v23 }
 0x1a6   : > { %2712 = vmatprep.subr.mxu0 %v7396_v62  ;;  %2786 = vmatprep.subr.mxu1 %v10184_v54 }
 0x1a7   : > { %2713 = vmatpush1.msra.mxu0 %v7403_v2  ;;  %2787 = vmatpush1.msra.mxu1 %v10185_v55 }
 0x1a8   : > { %2714 = vmatprep.subr.mxu0 %v7410_v37  ;;  %2788 = vmatprep.subr.mxu1 %v10186_v3 }
 0x1a9   : > { %2715 = vmatpush1.msra.mxu0 %v7417_v38  ;;  %2789 = vmatpush1.msra.mxu1 %v10187_v57 }
 0x1aa   : > { %2716 = vmatprep.subr.mxu0 %v7424_v39  ;;  %2790 = vmatprep.subr.mxu1 %v10188_v58 }
 0x1ab   : > { %2717 = vmatpush1.msra.mxu0 %v7431_v40  ;;  %2791 = vmatpush1.msra.mxu1 %v10189_v59 }
 0x1ac   : > { %2718 = vmatprep.subr.mxu0 %v7438_v41  ;;  %2792 = vmatprep.subr.mxu1 %v10190_v50 }
 0x1ad   : > { %2719 = vmatpush1.msra.mxu0 %v7445_v42  ;;  %2793 = vmatpush1.msra.mxu1 %v10191_v4 }
 0x1ae   : > { %2720 = vmatprep.subr.mxu0 %v7452_v44  ;;  %2794 = vmatprep.subr.mxu1 %v10192_v5 }
 0x1af   : > { %2721 = vmatpush1.msra.mxu0 %v7459_v45  ;;  %2795 = vmatpush1.msra.mxu1 %v7052_v51 }
 0x1b0   : > { %2722 = vmatprep.subr.mxu0 %v7466_v46  ;;  %2796 = vmatprep.subr.mxu1 %v7059_v52 }
 0x1b1   : > { %2723 = vmatpush1.msra.mxu0 %v7474_v47  ;;  %2756 = vmatprep.mubr.f32.mxu0 %v10113_v60 }
 0x1b2   : > { %2797 = vmatpush1.msra.mxu1 %v7070_v49  ;;  %2830 = vmatprep.mubr.f32.mxu1 %v10113_v60  ;;  %v7652_v49 = vpop.f32.mrf.mxu0 }
 0x1b3   : > { %5248 = vmatmul.mubr.msk.f32.vlgmr.msra.gmra.mxu0 %vm405_vm0, %v349_v16  ;;  %5249 = vmatmul.mubr.msk.f32.vlgmr.msra.gmra.mxu1 %vm405_vm0, %v7637_v14 }
 0x1b4   : > { %2854 = vmatprep.subr.mxu0 %v7081_v34  ;;  %2925 = vmatprep.subr.mxu1 %v7087_v48  ;;  %v7658_v34 = vpop.f32.mrf.mxu0  ;;  %v10193_v48 = vld [vmem:[#allocation17_spill] sm:$0xff] }
 0x1b5   : > { %2855 = vmatpush1.msra.mxu0 %v7093_v33  ;;  %2926 = vmatpush1.msra.mxu1 %v7319_v63  ;;  %v7664_v33 = vpop.f32.mrf.mxu1  ;;  %v10196_v63 = vld [vmem:[#allocation21_spill] sm:$0xff] }
 0x1b6   : > { %2856 = vmatprep.subr.mxu0 %v7100_v35  ;;  %2927 = vmatprep.subr.mxu1 %v7326_v8  ;;  %v10194_v35 = vld [vmem:[#allocation18_spill] sm:$0xff] }
 0x1b7   : > { %2857 = vmatpush1.msra.mxu0 %v7107_v0  ;;  %2928 = vmatpush1.msra.mxu1 %v7333_v9  ;;  %v555_v0 = vlaneseq  ;;  %v7670_v16 = vpop.f32.mrf.mxu1  ;;  %v10197_v8 = vld [vmem:[#allocation22_spill] sm:$0xff] }
 0x1b8   : > { %2858 = vmatprep.subr.mxu0 %v7114_v1  ;;  %2929 = vmatprep.subr.mxu1 %v7340_v10  ;;  %v10195_v1 = vld [vmem:[#allocation19_spill] sm:$0xff]  ;;  %v10198_v10 = vld [vmem:[#allocation44_spill] sm:$0xff] }
 0x1b9   : > { %2859 = vmatpush1.msra.mxu0 %v7121_v53  ;;  %2930 = vmatpush1.msra.mxu1 %v7347_v13  ;;  %v664_v53 = vpop.f32.mrf.mxu0  ;;  %v7680_v13 = vshrl.u32 %v555_v0, 7  ;;  %v7943_v0 = vld [vmem:[%s9896_s3 + $0xf8] sm:$0xff] }
 0x1ba   : > { %2860 = vmatprep.subr.mxu0 %v10193_v48  ;;  %2931 = vmatprep.subr.mxu1 %v7354_v22  ;;  %v10199_v22 = vld [vmem:[#allocation5_spill] sm:$0xff] }
 0x1bb   : > { %2861 = vmatpush1.msra.mxu0 %v10194_v35  ;;  %2932 = vmatpush1.msra.mxu1 %v7361_v31  ;;  %v7676_v9 = vpop.f32.mrf.mxu0  ;;  %v735_v31 = vpop.f32.mrf.mxu1  ;;  %v10202_v35 = vld [vmem:[#allocation9_spill] sm:$0xff] }
 0x1bc   : > { %2862 = vmatprep.subr.mxu0 %v10195_v1  ;;  %2933 = vmatprep.subr.mxu1 %v7368_v36  ;;  %v10200_v36 = vld [vmem:[#allocation6_spill] sm:$0xff]  ;;  %v736_v48 = vadd.f32 %v735_v31, %v664_v53 }
 0x1bd   : > { %2863 = vmatpush1.msra.mxu0 %v10196_v63  ;;  %2934 = vmatpush1.msra.mxu1 %v7375_v43  ;;  %v10201_v43 = vld [vmem:[#allocation7_spill] sm:$0xff] }
 0x1be   : > { %2864 = vmatprep.subr.mxu0 %v10197_v8  ;;  %2935 = vmatprep.subr.mxu1 %v7382_v56  ;;  %v809_v56 = vpop.f32.mrf.mxu0  ;;  %v7955_v63 = vld [vmem:[%s9896_s3 + $0x1f0] sm:$0xff] }
 0x1bf   : > { %2865 = vmatpush1.msra.mxu0 %v10198_v10  ;;  %2936 = vmatpush1.msra.mxu1 %v7389_v7  ;;  %v561_v7 = vsub.s32 1, %v7680_v13  ;;  %v7960_v8 = vld [vmem:[%s9896_s3 + $0xf0] sm:$0xff] }
 0x1c0   : > { %2866 = vmatprep.subr.mxu0 %v10199_v22  ;;  %2937 = vmatprep.subr.mxu1 %v7396_v62  ;;  %v10203_v62 = vld [vmem:[#allocation11_spill] sm:$0xff]  ;;  %v7979_v22 = vld [vmem:[%s9896_s3 + $0xe8] sm:$0xff] }
 0x1c1   : > { %2867 = vmatpush1.msra.mxu0 %v10200_v36  ;;  %2938 = vmatpush1.msra.mxu1 %v7403_v2  ;;  %v7696_v2 = vld [vmem:[%s9895_s2] sm:$0x3]  ;;  %10211 = vst [vmem:[#allocation26_spill] sm:$0xff] %v7979_v22 }
 0x1c2   : > { %2868 = vmatprep.subr.mxu0 %v10201_v43  ;;  %2939 = vmatprep.subr.mxu1 %v7410_v37  ;;  %v813_v37 = vadd.f32 %v809_v56, %v736_v48  ;;  %v7991_v43 = vld [vmem:[%s9896_s3 + $0x1e0] sm:$0xff] }
 0x1c3   : > { %2869 = vmatpush1.msra.mxu0 %v7191_v12  ;;  %2940 = vmatpush1.msra.mxu1 %v7417_v38  ;;  %v7705_v38 = vrot.slane %v7696_v2, %v561_v7  ;;  %10212 = vst [vmem:[#allocation27_spill] sm:$0xff] %v7991_v43  ;;  %v7996_v56 = vld [vmem:[%s9896_s3 + $0xe0] sm:$0xff] }
 0x1c4   : > { %2870 = vmatprep.subr.mxu0 %v10202_v35  ;;  %2941 = vmatprep.subr.mxu1 %v7424_v39  ;;  %10213 = vst [vmem:[#allocation28_spill] sm:$0xff] %v7996_v56  ;;  %v8008_v35 = vld [vmem:[%s9896_s3 + $0xd8] sm:$0xff] }
 0x1c5   : > { %2871 = vmatpush1.msra.mxu0 %v10203_v62  ;;  %2942 = vmatpush1.msra.mxu1 %v7431_v40  ;;  %v7712_v39 = vadd.f32 %v813_v37, %v7705_v38  ;;  %v352_v40 = vld [vmem:[%s6319_s23 + $0x16] sm:$0x1] }
 0x1c6   : > { %2872 = vmatprep.subr.mxu0 %v7212_v18  ;;  %2943 = vmatprep.subr.mxu1 %v7438_v41  ;;  %v7724_v41 = vld [vmem:[%s9896_s3 + $0x1d8] sm:$0xff] }
 0x1c7   : > { %2873 = vmatpush1.msra.mxu0 %v7219_v20  ;;  %2944 = vmatpush1.msra.mxu1 %v7445_v42  ;;  %v10019_v42 = vmax.f32 %v7712_v39, 0.0  ;;  %v7904_v20 = vld [vmem:[%s9896_s3 + $0x208] sm:$0xff] }
 0x1c8   : > { %2874 = vmatprep.subr.mxu0 %v7226_v6  ;;  %2945 = vmatprep.subr.mxu1 %v7452_v44  ;;  %v7737_v44 = vld [vmem:[%s9896_s3 + $0x1d0] sm:$0xff]  ;;  %v7909_v6 = vld [vmem:[%s9896_s3 + $0x108] sm:$0xff] }
 0x1c9   : > { %2875 = vmatpush1.msra.mxu0 %v7233_v24  ;;  %2946 = vmatpush1.msra.mxu1 %v7459_v45 }
 0x1ca   : > { %2876 = vmatprep.subr.mxu0 %v7240_v26  ;;  %2947 = vmatprep.subr.mxu1 %v7466_v46  ;;  %v7832_v46 = vld [vmem:[%s9896_s3 + $0x180] sm:$0xff]  ;;  %v557_v26 = vsub.s32 0, %v7680_v13  ;;  %v7974_v13 = vld [vmem:[%s9896_s3 + $0x1e8] sm:$0xff] }
 0x1cb   : > { %2877 = vmatpush1.msra.mxu0 %v7248_v61  ;;  %2910 = vmatprep.mubr.f32.mxu0 %v10113_v60  ;;  %v734_v61 = vadd.f32 %v7670_v16, %v7658_v34 }
 0x1cc   : > { %2948 = vmatpush1.msra.mxu1 %v7474_v47  ;;  %2981 = vmatprep.mubr.f32.mxu1 %v10113_v60  ;;  %v353_v47 = vld [vmem:[%s6319_s23 + $0x17] sm:$0x1]  ;;  %v7948_v16 = vrot.slane %v7696_v2, %v557_v26  ;;  %v8061_v26 = vld [vmem:[%s9896_s3 + $0xb8] sm:$0xff]  ;;  %s5876_s23 = scalar_lea.vmem %s5110_s25, 16 }
 0x1cd   : > { %5250 = vmatmul.mubr.msk.f32.vlgmr.msra.gmra.mxu0 %vm405_vm0, %v352_v40  ;;  %5251 = vmatmul.mubr.msk.f32.vlgmr.msra.gmra.mxu1 %vm405_vm0, %v7637_v14  ;;  %v7928_v14 = vld [vmem:[%s9896_s3 + $0x100] sm:$0xff]  ;;  %v812_v34 = vadd.f32 %v7676_v9, %v734_v61  ;;  %10218 = vst [vmem:[#allocation34_spill] sm:$0xff] %v8061_v26  ;;  %p5877_p11 = scmp.ne.s32.totalorder %s5110_s25, %s5876_s23  ;;  %p5884_p1 = scmp.lt.s32.totalorder %s5882_s17, %s5876_s23 }
 0x1ce   : > { %2999 = vmatprep.subr.mxu0 %v6905_v11  ;;  %3119 = vmatprep.subr.mxu1 %v10113_v60  ;;  %v7748_v11 = vld [vmem:[%s9896_s3 + $0x1c8] sm:$0xff] }
 0x1cf   : > { %3000 = vmatpush1.msra.mxu0 %v6912_v15  ;;  %3120 = vmatpush1.msra.mxu1 %v7724_v41  ;;  %v7757_v15 = vld [vmem:[%s9896_s3 + $0x1c0] sm:$0xff]  ;;  %v7967_v10 = vadd.f32 %v812_v34, %v7948_v16  ;;  %p5878_p12 = pnand %p5877_p11, %p6029_p5  ;;  %p5885_p2 = por %p5884_p1, %p5883_p0 }
 0x1d0   : > { %5297 = vmatprep.mubr.msk.f32.mxu1 %vm3115_vm1, %v10019_v42  ;;  %3001 = vmatprep.subr.mxu0 %v6919_v17  ;;  %v7766_v17 = vld [vmem:[%s9896_s3 + $0x1b8] sm:$0xff]  ;;  %v8107_v42 = vld [vmem:[%s9896_s3 + $0x148] sm:$0xff] }
 0x1d1   : > { %3121 = vmatprep.subr.mxu1 %v10113_v60  ;;  %3002 = vmatpush1.msra.mxu0 %v6926_v19  ;;  %10204 = vst [vmem:[#allocation13_spill] sm:$0xff] %v7766_v17  ;;  %v7775_v19 = vld [vmem:[%s9896_s3 + $0x1b0] sm:$0xff]  ;;  %v10018_v48 = vmax.f32 %v7967_v10, 0.0  ;;  %10223 = vst [vmem:[#allocation38_spill] sm:$0xff] %v8107_v42  ;;  %p5879_p13 = pneg %p5878_p12 }
 0x1d2   : > { %3122 = vmatpush1.msra.mxu1 %v7737_v44  ;;  %3003 = vmatprep.subr.mxu0 %v6933_v21  ;;  %10205 = vst [vmem:[#allocation15_spill] sm:$0xff] %v7775_v19  ;;  %v7784_v21 = vld [vmem:[%s9896_s3 + $0x1a8] sm:$0xff] }
 0x1d3   : > { %3123 = vmatprep.subr.mxu1 %v10113_v60  ;;  %3004 = vmatpush1.msra.mxu0 %v6940_v25  ;;  %10206 = vst [vmem:[#allocation20_spill] sm:$0xff] %v7784_v21  ;;  %v7793_v25 = vld [vmem:[%s9896_s3 + $0x1a0] sm:$0xff]  ;;  %p5886_p3 = pnand %p5885_p2, %p5879_p13 }
 0x1d4   : > { %3124 = vmatpush1.msra.mxu1 %v7748_v11  ;;  %3005 = vmatprep.subr.mxu0 %v6947_v27  ;;  %10207 = vst [vmem:[#allocation23_spill] sm:$0xff] %v7793_v25  ;;  %v7802_v27 = vld [vmem:[%s9896_s3 + $0x198] sm:$0xff] }
 0x1d5   : > { %3125 = vmatprep.subr.mxu1 %v10113_v60  ;;  %3006 = vmatpush1.msra.mxu0 %v6954_v28  ;;  %10208 = vst [vmem:[#allocation25_spill] sm:$0xff] %v7802_v27  ;;  %v552_v28 = vadd.f32 %v7664_v33, %v7652_v49  ;;  %v10210_v49 = vld [vmem:[#allocation16_spill] sm:$0xff] }
 0x1d6   : > { %3126 = vmatpush1.msra.mxu1 %v7757_v15  ;;  %3007 = vmatprep.subr.mxu0 %v6961_v29  ;;  %v7813_v29 = vld [vmem:[%s9896_s3 + $0x190] sm:$0xff]  ;;  %v7938_v33 = vld [vmem:[%s9896_s3 + $0x1f8] sm:$0xff] }
 0x1d7   : > { %3127 = vmatprep.subr.mxu1 %v10113_v60  ;;  %3008 = vmatpush1.msra.mxu0 %v6968_v30  ;;  %10209 = vst [vmem:[#allocation24_spill] sm:$0xff] %v7813_v29  ;;  %v7822_v30 = vld [vmem:[%s9896_s3 + $0x188] sm:$0xff]  ;;  %v566_v45 = vadd.f32 %v7705_v38, %v552_v28  ;;  %v8026_v28 = vld [vmem:[%s9896_s3 + $0xd0] sm:$0xff] }
 0x1d8   : > { %3128 = vmatpush1.msra.mxu1 %v7766_v17  ;;  %3009 = vmatprep.subr.mxu0 %v10182_v32 }
 0x1d9   : > { %3129 = vmatprep.subr.mxu1 %v10113_v60  ;;  %3010 = vmatpush1.msra.mxu0 %v10183_v23  ;;  %v7923_v23 = vld [vmem:[%s9896_s3 + $0x200] sm:$0xff] }
 0x1da   : > { %3130 = vmatpush1.msra.mxu1 %v7775_v19  ;;  %3011 = vmatprep.subr.mxu0 %v10184_v54  ;;  %v7842_v54 = vld [vmem:[%s9896_s3 + $0x178] sm:$0xff] }
 0x1db   : > { %3131 = vmatprep.subr.mxu1 %v10113_v60  ;;  %3012 = vmatpush1.msra.mxu0 %v10185_v55  ;;  %v7858_v55 = vld [vmem:[%s9896_s3 + $0x170] sm:$0xff] }
 0x1dc   : > { %3132 = vmatpush1.msra.mxu1 %v7784_v21  ;;  %3013 = vmatprep.subr.mxu0 %v10186_v3  ;;  %v7863_v3 = vld [vmem:[%s9896_s3 + $0x120] sm:$0xff] }
 0x1dd   : > { %3133 = vmatprep.subr.mxu1 %v10113_v60  ;;  %3014 = vmatpush1.msra.mxu0 %v10187_v57  ;;  %v7865_v57 = vpop.f32.mrf.mxu1 }
 0x1de   : > { %3134 = vmatpush1.msra.mxu1 %v7793_v25  ;;  %3015 = vmatprep.subr.mxu0 %v10188_v58  ;;  %v7867_v58 = vpop.f32.mrf.mxu0 }
 0x1df   : > { %3135 = vmatprep.subr.mxu1 %v10113_v60  ;;  %3016 = vmatpush1.msra.mxu0 %v10189_v59  ;;  %v7876_v59 = vld [vmem:[%s9896_s3 + $0x168] sm:$0xff]  ;;  %v889_v12 = vpop.f32.mrf.mxu1 }
 0x1e0   : > { %3136 = vmatpush1.msra.mxu1 %v7802_v27  ;;  %3017 = vmatprep.subr.mxu0 %v10190_v50  ;;  %v7881_v50 = vld [vmem:[%s9896_s3 + $0x118] sm:$0xff]  ;;  %v960_v18 = vpop.f32.mrf.mxu0 }
 0x1e1   : > { %3137 = vmatprep.subr.mxu1 %v10113_v60  ;;  %3018 = vmatpush1.msra.mxu0 %v10191_v4  ;;  %v7890_v4 = vld [vmem:[%s9896_s3 + $0x160] sm:$0xff]  ;;  %v7911_v24 = vpop.f32.mrf.mxu1  ;;  %v961_v32 = vadd.f32 %v960_v18, %v889_v12 }
 0x1e2   : > { %3138 = vmatpush1.msra.mxu1 %v7813_v29  ;;  %3019 = vmatprep.subr.mxu0 %v10192_v5  ;;  %v7895_v5 = vld [vmem:[%s9896_s3 + $0x110] sm:$0xff]  ;;  %v7962_v9 = vpop.f32.mrf.mxu0  ;;  %v8050_v12 = vld [vmem:[%s9896_s3 + $0xc0] sm:$0xff] }
 0x1e3   : > { %3139 = vmatprep.subr.mxu1 %v10113_v60  ;;  %3020 = vmatpush1.msra.mxu0 %v7052_v51  ;;  %v7849_v51 = vld [vmem:[%s9896_s3 + $0x128] sm:$0xff]  ;;  %v1034_v1 = vpop.f32.mrf.mxu1 }
 0x1e4   : > { %3140 = vmatpush1.msra.mxu1 %v7822_v30  ;;  %3021 = vmatprep.subr.mxu0 %v7059_v52  ;;  %v568_v52 = vmax.f32 %v566_v45, 0.0  ;;  %v1038_v53 = vadd.f32 %v1034_v1, %v961_v32  ;;  %v7998_v7 = vpop.f32.mrf.mxu0  ;;  %v8072_v32 = vld [vmem:[%s9896_s3 + $0xb0] sm:$0xff] }
 0x1e5   : > { %3141 = vmatprep.subr.mxu1 %v10113_v60  ;;  %3022 = vmatpush1.msra.mxu0 %v10210_v49  ;;  %v7981_v31 = vpop.f32.mrf.mxu1  ;;  %10219 = vst [vmem:[#allocation35_spill] sm:$0xff] %v8072_v32 }
 0x1e6   : > { %3055 = vmatprep.mubr.f32.mxu0 %v10113_v60  ;;  %3142 = vmatpush1.msra.mxu1 %v7832_v46  ;;  %v1040_v36 = vadd.f32 %v1038_v53, %v7705_v38  ;;  %v8012_v62 = vpop.f32.mrf.mxu0  ;;  %v8085_v53 = vld [vmem:[%s9896_s3 + $0x158] sm:$0xff] }
 0x1e7   : > { %5252 = vmatmul.mubr.msk.f32.vlgmr.msra.gmra.mxu0 %vm405_vm0, %v353_v47  ;;  %3143 = vmatprep.subr.mxu1 %v10113_v60  ;;  %v8010_v2 = vpop.f32.mrf.mxu1  ;;  %v8037_v47 = vld [vmem:[%s9896_s3 + $0xc8] sm:$0xff] }
 0x1e8   : > { %3192 = vmatprep.subr.mxu0 %v10113_v60  ;;  %3144 = vmatpush1.msra.mxu1 %v7842_v54  ;;  %v1042_v37 = vmax.f32 %v1040_v36, 0.0  ;;  %v8030_v45 = vpop.f32.mrf.mxu0  ;;  %10215 = vst [vmem:[#allocation30_spill] sm:$0xff] %v8037_v47 }
 0x1e9   : > { %3193 = vmatpush1.msra.mxu0 %v7849_v51  ;;  %5298 = vmatprep.mubr.msk.f32.mxu0 %vm3115_vm1, %v568_v52  ;;  %v8019_v40 = vpop.f32.mrf.mxu1 }
 0x1ea   : > { %3145 = vmatprep.subr.mxu1 %v10113_v60  ;;  %3194 = vmatprep.subr.mxu0 %v10113_v60  ;;  %10214 = vst [vmem:[#allocation29_spill] sm:$0xff] %v8019_v40  ;;  %v8043_v52 = vpop.f32.mrf.mxu0 }
 0x1eb   : > { %3146 = vmatpush1.msra.mxu1 %v7858_v55  ;;  %3195 = vmatpush1.msra.mxu0 %v7863_v3  ;;  %v8041_v49 = vpop.f32.mrf.mxu1  ;;  %10216 = vst [vmem:[#allocation31_spill] sm:$0xff] %v8043_v52 }
 0x1ec   : > { %3147 = vmatprep.subr.mxu1 %v10113_v60  ;;  %3196 = vmatprep.subr.mxu0 %v10113_v60  ;;  %v8065_v61 = vpop.f32.mrf.mxu0 }
 0x1ed   : > { %3148 = vmatpush1.msra.mxu1 %v7876_v59  ;;  %3197 = vmatpush1.msra.mxu0 %v7881_v50  ;;  %v8054_v18 = vpop.f32.mrf.mxu1 }
 0x1ee   : > { %3149 = vmatprep.subr.mxu1 %v10113_v60  ;;  %3198 = vmatprep.subr.mxu0 %v10113_v60  ;;  %10217 = vst [vmem:[#allocation32_spill] sm:$0xff] %v8054_v18  ;;  %v8078_v1 = vpop.f32.mrf.mxu0  ;;  %v10227_v18 = vld [vmem:[#allocation33_spill] sm:$0xff] }
 0x1ef   : > { %3150 = vmatpush1.msra.mxu1 %v7890_v4  ;;  %3199 = vmatpush1.msra.mxu0 %v7895_v5  ;;  %v8076_v34 = vpop.f32.mrf.mxu1  ;;  %10220 = vst [vmem:[#allocation41_spill] sm:$0xff] %v8078_v1  ;;  %v565_v52 = vadd.f32 %v7948_v16, %v10227_v18  ;;  %v8144_v18 = vld [vmem:[%s9896_s3 + $0x130] sm:$0xff] }
 0x1f0   : > { %3171 = vmatprep.subr.mxu1 %v10113_v60  ;;  %3200 = vmatprep.subr.mxu0 %v10113_v60 }
 0x1f1   : > { %3172 = vmatpush2.msra.mxu1 %v7904_v20  ;;  %3201 = vmatpush1.msra.mxu0 %v7909_v6  ;;  %v8089_v36 = vpop.f32.mrf.mxu1 }
 0x1f2   : > { %3173 = vmatprep.subr.mxu1 %v10113_v60  ;;  %3202 = vmatprep.subr.mxu0 %v10113_v60  ;;  %10221 = vst [vmem:[#allocation36_spill] sm:$0xff] %v8089_v36 }
 0x1f3   : > { %3174 = vmatpush2.msra.mxu1 %v7923_v23  ;;  %3203 = vmatpush1.msra.mxu0 %v7928_v14  ;;  %v8111_v36 = vpop.f32.mrf.mxu1 }
 0x1f4   : > { %3175 = vmatprep.subr.mxu1 %v10113_v60  ;;  %3204 = vmatprep.subr.mxu0 %v10113_v60  ;;  %10224 = vst [vmem:[#allocation39_spill] sm:$0xff] %v8111_v36 }
 0x1f5   : > { %3176 = vmatpush2.msra.mxu1 %v7938_v33  ;;  %3205 = vmatpush1.msra.mxu0 %v7943_v0  ;;  %v8126_v40 = vpop.f32.mrf.mxu1 }
 0x1f6   : > { %3177 = vmatprep.subr.mxu1 %v10113_v60  ;;  %3206 = vmatprep.subr.mxu0 %v10113_v60  ;;  %10228 = vst [vmem:[#allocation43_spill] sm:$0xff] %v8126_v40  ;;  %v567_v40 = vmax.f32 %v565_v52, 0.0  ;;  %v8169_v52 = vld [vmem:[%s9896_s3 + $0x70] sm:$0xff] }
 0x1f7   : > { %3178 = vmatpush2.msra.mxu1 %v7955_v63  ;;  %3207 = vmatpush1.msra.mxu0 %v7960_v8 }
 0x1f8   : > { %3179 = vmatprep.subr.mxu1 %v10113_v60  ;;  %3208 = vmatprep.subr.mxu0 %v10113_v60 }
 0x1f9   : > { %3180 = vmatpush2.msra.mxu1 %v7974_v13  ;;  %3209 = vmatpush1.msra.mxu0 %v7979_v22 }
 0x1fa   : > { %3181 = vmatprep.subr.mxu1 %v10113_v60  ;;  %3210 = vmatprep.subr.mxu0 %v10113_v60 }
 0x1fb   : > { %3182 = vmatpush2.msra.mxu1 %v7991_v43  ;;  %3211 = vmatpush1.msra.mxu0 %v7996_v56  ;;  %v8148_v43 = vpop.f32.mrf.mxu1 }
 0x1fc   : > { %3184 = vmatmul.mubr.f32.vlgmr.msra.gmra.mxu1 %v10018_v48  ;;  %3212 = vmatprep.subr.mxu0 %v10113_v60  ;;  %v8100_v48 = vpop.f32.mrf.mxu0  ;;  %10230 = vst [vmem:[#allocation10_spill] sm:$0xff] %v8148_v43  ;;  %v10234_v43 = vmax.f32 %v7712_v39, 0.0  ;;  %v8195_v39 = vld [vmem:[%s9896_s3 + $0x60] sm:$0xff] }
 0x1fd   : > { %3289 = vmatprep.subr.mxu1 %v10113_v60  ;;  %3213 = vmatpush1.msra.mxu0 %v8008_v35  ;;  %10222 = vst [vmem:[#allocation37_spill] sm:$0xff] %v8100_v48  ;;  %v8120_v48 = vld [vmem:[%s9896_s3 + $0x140] sm:$0xff]  ;;  %10238 = vst [vmem:[#allocation22_spill] sm:$0xff] %v8195_v39 }
 0x1fe   : > { %3290 = vmatpush1.msra.mxu1 %v7849_v51  ;;  %5299 = vmatprep.mubr.msk.f32.mxu1 %vm3115_vm1, %v1042_v37  ;;  %v8096_v37 = vld [vmem:[%s9896_s3 + $0x150] sm:$0xff]  ;;  %v8113_v1 = vpop.f32.mrf.mxu0  ;;  %10226 = vst [vmem:[#allocation42_spill] sm:$0xff] %v8120_v48 }
 0x1ff   : > { %3214 = vmatprep.subr.mxu0 %v10113_v60  ;;  %3291 = vmatprep.subr.mxu1 %v10113_v60  ;;  %10225 = vst [vmem:[#allocation40_spill] sm:$0xff] %v8113_v1  ;;  %v8133_v1 = vld [vmem:[%s9896_s3 + $0x138] sm:$0xff] }
 0x200   : > { %3215 = vmatpush1.msra.mxu0 %v8026_v28  ;;  %3292 = vmatpush1.msra.mxu1 %v7863_v3  ;;  %v8137_v36 = vpop.f32.mrf.mxu0 }
 0x201   : > { %3216 = vmatprep.subr.mxu0 %v10113_v60  ;;  %3293 = vmatprep.subr.mxu1 %v10113_v60  ;;  %10229 = vst [vmem:[#allocation8_spill] sm:$0xff] %v8137_v36  ;;  %v8159_v36 = vld [vmem:[%s9896_s3 + $0x78] sm:$0xff] }
 0x202   : > { %3217 = vmatpush1.msra.mxu0 %v8037_v47  ;;  %3294 = vmatpush1.msra.mxu1 %v7881_v50 }
 0x203   : > { %3218 = vmatprep.subr.mxu0 %v10113_v60  ;;  %3295 = vmatprep.subr.mxu1 %v10113_v60 }
 0x204   : > { %3219 = vmatpush1.msra.mxu0 %v8050_v12  ;;  %3296 = vmatpush1.msra.mxu1 %v7895_v5 }
 0x205   : > { %3220 = vmatprep.subr.mxu0 %v10113_v60  ;;  %3297 = vmatprep.subr.mxu1 %v10113_v60 }
 0x206   : > { %3221 = vmatpush1.msra.mxu0 %v8061_v26  ;;  %3298 = vmatpush1.msra.mxu1 %v7909_v6 }
 0x207   : > { %3222 = vmatprep.subr.mxu0 %v10113_v60  ;;  %3299 = vmatprep.subr.mxu1 %v10113_v60 }
 0x208   : > { %3223 = vmatpush1.msra.mxu0 %v8072_v32  ;;  %3300 = vmatpush1.msra.mxu1 %v7928_v14 }
 0x209   : > { %3244 = vmatprep.subr.mxu0 %v10113_v60  ;;  %3301 = vmatprep.subr.mxu1 %v10113_v60 }
 0x20a   : > { %3245 = vmatpush2.msra.mxu0 %v8085_v53  ;;  %3302 = vmatpush1.msra.mxu1 %v7943_v0 }
 0x20b   : > { %3246 = vmatprep.subr.mxu0 %v10113_v60  ;;  %3303 = vmatprep.subr.mxu1 %v10113_v60 }
 0x20c   : > { %3247 = vmatpush2.msra.mxu0 %v8096_v37  ;;  %3304 = vmatpush1.msra.mxu1 %v7960_v8 }
 0x20d   : > { %3248 = vmatprep.subr.mxu0 %v10113_v60  ;;  %3305 = vmatprep.subr.mxu1 %v10113_v60 }
 0x20e   : > { %3249 = vmatpush2.msra.mxu0 %v8107_v42  ;;  %3306 = vmatpush1.msra.mxu1 %v7979_v22  ;;  %v8150_v22 = vpop.f32.mrf.mxu0 }
 0x20f   : > { %3250 = vmatprep.subr.mxu0 %v10113_v60  ;;  %3307 = vmatprep.subr.mxu1 %v10113_v60  ;;  %10231 = vst [vmem:[#allocation12_spill] sm:$0xff] %v8150_v22 }
 0x210   : > { %3251 = vmatpush2.msra.mxu0 %v8120_v48  ;;  %3308 = vmatpush1.msra.mxu1 %v7996_v56  ;;  %v8161_v56 = vpop.f32.mrf.mxu1  ;;  %v8171_v22 = vpop.f32.mrf.mxu0 }
 0x211   : > { %3252 = vmatprep.subr.mxu0 %v10113_v60  ;;  %3309 = vmatprep.subr.mxu1 %v10113_v60  ;;  %10232 = vst [vmem:[#allocation14_spill] sm:$0xff] %v8161_v56  ;;  %10233 = vst [vmem:[#allocation17_spill] sm:$0xff] %v8171_v22 }
 0x212   : > { %3253 = vmatpush2.msra.mxu0 %v8133_v1  ;;  %3310 = vmatpush1.msra.mxu1 %v8008_v35  ;;  %v8184_v56 = vpop.f32.mrf.mxu1 }
 0x213   : > { %3254 = vmatprep.subr.mxu0 %v10113_v60  ;;  %3311 = vmatprep.subr.mxu1 %v10113_v60  ;;  %10236 = vst [vmem:[#allocation19_spill] sm:$0xff] %v8184_v56  ;;  %v8208_v56 = vld [vmem:[%s9896_s3 + $0x58] sm:$0xff] }
 0x214   : > { %3255 = vmatpush2.msra.mxu0 %v8144_v18  ;;  %3312 = vmatpush1.msra.mxu1 %v8026_v28  ;;  %10240 = vst [vmem:[#allocation5_spill] sm:$0xff] %v8208_v56 }
 0x215   : > { %3257 = vmatmul.mubr.f32.vlgmr.msra.gmra.mxu0 %v567_v40  ;;  %3313 = vmatprep.subr.mxu1 %v10113_v60  ;;  %v8182_v40 = vld [vmem:[%s9896_s3 + $0x68] sm:$0xff] }
 0x216   : > { %3359 = vmatprep.subr.mxu0 %v10113_v60  ;;  %3314 = vmatpush1.msra.mxu1 %v8037_v47  ;;  %10235 = vst [vmem:[#allocation18_spill] sm:$0xff] %v8182_v40  ;;  %v8186_v47 = vpop.f32.mrf.mxu0 }
 0x217   : > { %3360 = vmatpush1.msra.mxu0 %v8159_v36  ;;  %5300 = vmatprep.mubr.msk.f32.mxu0 %vm3115_vm1, %v10234_v43  ;;  %10237 = vst [vmem:[#allocation21_spill] sm:$0xff] %v8186_v47  ;;  %v8197_v43 = vpop.f32.mrf.mxu1  ;;  %v959_v47 = vadd.f32 %v7867_v58, %v7865_v57  ;;  %v8219_v57 = vld [vmem:[%s9896_s3 + $0x50] sm:$0xff] }
 0x218   : > { %3315 = vmatprep.subr.mxu1 %v10113_v60  ;;  %3361 = vmatprep.subr.mxu0 %v10113_v60  ;;  %10239 = vst [vmem:[#allocation44_spill] sm:$0xff] %v8197_v43  ;;  %v8210_v22 = vpop.f32.mrf.mxu0  ;;  %10242 = vst [vmem:[#allocation7_spill] sm:$0xff] %v8219_v57 }
 0x219   : > { %3316 = vmatpush1.msra.mxu1 %v8050_v12  ;;  %3362 = vmatpush1.msra.mxu0 %v8169_v52  ;;  %10241 = vst [vmem:[#allocation6_spill] sm:$0xff] %v8210_v22  ;;  %v8221_v58 = vpop.f32.mrf.mxu1  ;;  %v1037_v22 = vadd.f32 %v7911_v24, %v959_v47  ;;  %v8245_v24 = vld [vmem:[%s9896_s3 + $0x40] sm:$0xff] }
 0x21a   : > { %3317 = vmatprep.subr.mxu1 %v10113_v60  ;;  %3363 = vmatprep.subr.mxu0 %v10113_v60  ;;  %10243 = vst [vmem:[#allocation9_spill] sm:$0xff] %v8221_v58  ;;  %v8223_v43 = vpop.f32.mrf.mxu0  ;;  %10246 = vst [vmem:[#allocation33_spill] sm:$0xff] %v8245_v24 }
 0x21b   : > { %3318 = vmatpush1.msra.mxu1 %v8061_v26  ;;  %3364 = vmatpush1.msra.mxu0 %v8182_v40  ;;  %10244 = vst [vmem:[#allocation11_spill] sm:$0xff] %v8223_v43  ;;  %v8235_v26 = vld [vmem:[%s9896_s3 + $0x48] sm:$0xff]  ;;  %v2237_v58 = vpop.f32.mrf.mxu1 }
 0x21c   : > { %3319 = vmatprep.subr.mxu1 %v10113_v60  ;;  %3365 = vmatprep.subr.mxu0 %v10113_v60  ;;  %10245 = vst [vmem:[#allocation16_spill] sm:$0xff] %v8235_v26 }
 0x21d   : > { %3320 = vmatpush1.msra.mxu1 %v8072_v32  ;;  %3366 = vmatpush1.msra.mxu0 %v8195_v39  ;;  %v1186_v32 = vadd.f32 %v8010_v2, %v7998_v7  ;;  %v8247_v7 = vpop.f32.mrf.mxu0  ;;  %v1039_v2 = vadd.f32 %v1037_v22, %v7948_v16  ;;  %v8259_v47 = vpop.f32.mrf.mxu1  ;;  %v8271_v22 = vld [vmem:[%s9896_s3 + $0x30] sm:$0xff] }
 0x21e   : > { %3341 = vmatprep.subr.mxu1 %v10113_v60  ;;  %3367 = vmatprep.subr.mxu0 %v10113_v60  ;;  %10247 = vst [vmem:[#allocation45_spill] sm:$0xff] %v8247_v7  ;;  %10248 = vst [vmem:[#allocation46_spill] sm:$0xff] %v8259_v47 }
 0x21f   : > { %3342 = vmatpush2.msra.mxu1 %v8085_v53  ;;  %3368 = vmatpush1.msra.mxu0 %v8208_v56  ;;  %v1263_v43 = vadd.f32 %v8030_v45, %v1186_v32  ;;  %v8257_v45 = vld [vmem:[%s9896_s3 + $0x38] sm:$0xff] }
 0x220   : > { %3343 = vmatprep.subr.mxu1 %v10113_v60  ;;  %3369 = vmatprep.subr.mxu0 %v10113_v60 }
 0x221   : > { %3344 = vmatpush2.msra.mxu1 %v8096_v37  ;;  %3370 = vmatpush1.msra.mxu0 %v8219_v57  ;;  %v8264_v7 = vadd.f32 %v1263_v43, %v7705_v38  ;;  %v8280_v43 = vld [vmem:[%s9896_s3 + $0x28] sm:$0xff] }
 0x222   : > { %3345 = vmatprep.subr.mxu1 %v10113_v60  ;;  %3371 = vmatprep.subr.mxu0 %v10113_v60 }
 0x223   : > { %3346 = vmatpush2.msra.mxu1 %v8107_v42  ;;  %3372 = vmatpush1.msra.mxu0 %v8235_v26 }
 0x224   : > { %3347 = vmatprep.subr.mxu1 %v10113_v60  ;;  %3373 = vmatprep.subr.mxu0 %v10113_v60 }
 0x225   : > { %3348 = vmatpush2.msra.mxu1 %v8120_v48  ;;  %3374 = vmatpush1.msra.mxu0 %v8245_v24  ;;  %v2308_v32 = vpop.f32.mrf.mxu0  ;;  %v2382_v47 = vpop.f32.mrf.mxu1  ;;  %v1041_v48 = vmax.f32 %v1039_v2, 0.0  ;;  %v8293_v2 = vld [vmem:[%s9896_s3 + $0x20] sm:$0xff] }
 0x226   : > { %3349 = vmatprep.subr.mxu1 %v10113_v60  ;;  %3375 = vmatprep.subr.mxu0 %v10113_v60  ;;  %v2309_v42 = vadd.f32 %v2308_v32, %v2237_v58  ;;  %v10038_v58 = vmax.f32 %v8264_v7, 0.0  ;;  %10250 = vst [vmem:[#allocation48_spill] sm:$0xff] %v8293_v2  ;;  %v8331_v32 = vld [vmem:[%s9896_s3] sm:$0xff] }
 0x227   : > { %3350 = vmatpush2.msra.mxu1 %v8133_v1  ;;  %3376 = vmatpush1.msra.mxu0 %v8257_v45 }
 0x228   : > { %3351 = vmatprep.subr.mxu1 %v10113_v60  ;;  %3377 = vmatprep.subr.mxu0 %v10113_v60  ;;  %v8282_v24 = vadd.f32 %v2382_v47, %v2309_v42  ;;  %v8304_v42 = vld [vmem:[%s9896_s3 + $0x18] sm:$0xff]  ;;  %v8322_v47 = vld [vmem:[%s9896_s3 + $0x8] sm:$0xff] }
 0x229   : > { %3352 = vmatpush2.msra.mxu1 %v8144_v18  ;;  %3378 = vmatpush1.msra.mxu0 %v8271_v22  ;;  %10251 = vst [vmem:[#allocation49_spill] sm:$0xff] %v8304_v42 }
 0x22a   : > { %10249 = vst [vmem:[#allocation47_spill] sm:$0xff] %v8282_v24  ;;  %3354 = vmatmul.mubr.f32.vlgmr.msra.gmra.mxu1 %v1041_v48  ;;  %3379 = vmatprep.subr.mxu0 %v10113_v60  ;;  %v8313_v48 = vld [vmem:[%s9896_s3 + $0x10] sm:$0xff]  ;;  %v1411_v24 = vadd.f32 %v8065_v61, %v8041_v49  ;;  %v8360_v49 = vld [vmem:[%s9896_s3 + $0x98] sm:$0xff] }
 0x22b   : > { %3432 = vmatprep.subr.mxu1 %v10113_v60  ;;  %3380 = vmatpush1.msra.mxu0 %v8280_v43 }
 0x22c   : > { %3433 = vmatpush1.msra.mxu1 %v7724_v41  ;;  %5301 = vmatprep.mubr.msk.f32.mxu1 %vm3115_vm1, %v10038_v58  ;;  %v8340_v58 = vld [vmem:[%s9896_s3 + $0xa8] sm:$0xff]  ;;  %v1488_v61 = vadd.f32 %v8076_v34, %v1411_v24 }
 0x22d   : > { %3381 = vmatprep.subr.mxu0 %v10113_v60  ;;  %3434 = vmatprep.subr.mxu1 %v10113_v60  ;;  %v8383_v34 = vld [vmem:[%s9896_s3 + $0x88] sm:$0xff] }
 0x22e   : > { %3382 = vmatpush1.msra.mxu0 %v8293_v2  ;;  %3435 = vmatpush1.msra.mxu1 %v7737_v44  ;;  %v1490_v24 = vadd.f32 %v1488_v61, %v7705_v38 }
 0x22f   : > { %3383 = vmatprep.subr.mxu0 %v10113_v60  ;;  %3436 = vmatprep.subr.mxu1 %v10113_v60 }
 0x230   : > { %3384 = vmatpush1.msra.mxu0 %v8304_v42  ;;  %3437 = vmatpush1.msra.mxu1 %v7748_v11  ;;  %v1492_v61 = vmax.f32 %v1490_v24, 0.0  ;;  %v10259_v24 = vld [vmem:[#allocation28_spill] sm:$0xff] }
 0x231   : > { %3385 = vmatprep.subr.mxu0 %v10113_v60  ;;  %3438 = vmatprep.subr.mxu1 %v10113_v60 }
 0x232   : > { %3386 = vmatpush1.msra.mxu0 %v8313_v48  ;;  %3439 = vmatpush1.msra.mxu1 %v7757_v15 }
 0x233   : > { %3387 = vmatprep.subr.mxu0 %v10113_v60  ;;  %3440 = vmatprep.subr.mxu1 %v10113_v60 }
 0x234   : > { %3388 = vmatpush1.msra.mxu0 %v8322_v47  ;;  %3441 = vmatpush1.msra.mxu1 %v7766_v17  ;;  %v8351_v17 = vld [vmem:[%s9896_s3 + $0xa0] sm:$0xff] }
 0x235   : > { %3389 = vmatprep.subr.mxu0 %v10113_v60  ;;  %3442 = vmatprep.subr.mxu1 %v10113_v60  ;;  %10252 = vst [vmem:[#allocation50_spill] sm:$0xff] %v8351_v17 }
 0x236   : > { %3390 = vmatpush1.msra.mxu0 %v8331_v32  ;;  %3443 = vmatpush1.msra.mxu1 %v7775_v19  ;;  %v8374_v19 = vpop.f32.mrf.mxu0 }
 0x237   : > { %3411 = vmatprep.subr.mxu0 %v10113_v60  ;;  %3444 = vmatprep.subr.mxu1 %v10113_v60  ;;  %10253 = vst [vmem:[#allocation51_spill] sm:$0xff] %v8374_v19 }
 0x238   : > { %3412 = vmatpush2.msra.mxu0 %v8340_v58  ;;  %3445 = vmatpush1.msra.mxu1 %v7784_v21  ;;  %v8370_v21 = vld [vmem:[%s9896_s3 + $0x90] sm:$0xff] }
 0x239   : > { %3413 = vmatprep.subr.mxu0 %v10113_v60  ;;  %3446 = vmatprep.subr.mxu1 %v10113_v60 }
 0x23a   : > { %3414 = vmatpush2.msra.mxu0 %v8351_v17  ;;  %3447 = vmatpush1.msra.mxu1 %v7793_v25  ;;  %v8376_v17 = vpop.f32.mrf.mxu1 }
 0x23b   : > { %3415 = vmatprep.subr.mxu0 %v10113_v60  ;;  %3448 = vmatprep.subr.mxu1 %v10113_v60  ;;  %10254 = vst [vmem:[#allocation52_spill] sm:$0xff] %v8376_v17  ;;  %v8393_v17 = vld [vmem:[%s9896_s3 + $0x80] sm:$0xff] }
 0x23c   : > { %3416 = vmatpush2.msra.mxu0 %v8360_v49  ;;  %3449 = vmatpush1.msra.mxu1 %v7802_v27 }
 0x23d   : > { %3417 = vmatprep.subr.mxu0 %v10113_v60  ;;  %3450 = vmatprep.subr.mxu1 %v10113_v60 }
 0x23e   : > { %3418 = vmatpush2.msra.mxu0 %v8370_v21  ;;  %3451 = vmatpush1.msra.mxu1 %v7813_v29  ;;  %v10255_v29 = vmax.f32 %v7967_v10, 0.0 }
 0x23f   : > { %3419 = vmatprep.subr.mxu0 %v10113_v60  ;;  %3452 = vmatprep.subr.mxu1 %v10113_v60  ;;  %v2462_v19 = vpop.f32.mrf.mxu0  ;;  %v2533_v27 = vpop.f32.mrf.mxu1 }
 0x240   : > { %3420 = vmatpush2.msra.mxu0 %v8383_v34  ;;  %3453 = vmatpush1.msra.mxu1 %v7822_v30  ;;  %v2534_v25 = vadd.f32 %v2533_v27, %v2462_v19  ;;  %v1184_v19 = vadd.f32 %v7981_v31, %v7962_v9  ;;  %v10256_v9 = vld [vmem:[#allocation26_spill] sm:$0xff] }
 0x241   : > { %3421 = vmatprep.subr.mxu0 %v10113_v60  ;;  %3454 = vmatprep.subr.mxu1 %v10113_v60  ;;  %v8449_v31 = vpop.f32.mrf.mxu0 }
 0x242   : > { %3422 = vmatpush2.msra.mxu0 %v8393_v17  ;;  %3455 = vmatpush1.msra.mxu1 %v7832_v46  ;;  %v1262_v27 = vadd.f32 %v8012_v62, %v1184_v19  ;;  %10257 = vst [vmem:[#allocation26_spill] sm:$0xff] %v8449_v31  ;;  %v10258_v62 = vld [vmem:[#allocation27_spill] sm:$0xff]  ;;  %v10260_v19 = vmax.f32 %v8264_v7, 0.0  ;;  %v10264_v7 = vld [vmem:[#allocation29_spill] sm:$0xff]  ;;  %v10267_v31 = vld [vmem:[#allocation32_spill] sm:$0xff] }
 0x243   : > { %3424 = vmatmul.mubr.f32.vlgmr.msra.gmra.mxu0 %v10255_v29  ;;  %3456 = vmatprep.subr.mxu1 %v10113_v60 }
 0x244   : > { %3508 = vmatprep.subr.mxu0 %v10113_v60  ;;  %3457 = vmatpush1.msra.mxu1 %v7842_v54  ;;  %v8436_v29 = vadd.f32 %v1262_v27, %v7948_v16 }
 0x245   : > { %3509 = vmatpush1.msra.mxu0 %v7849_v51  ;;  %5302 = vmatprep.mubr.msk.f32.mxu0 %vm3115_vm1, %v1492_v61 }
 0x246   : > { %3458 = vmatprep.subr.mxu1 %v10113_v60  ;;  %3510 = vmatprep.subr.mxu0 %v10113_v60  ;;  %v10047_v10 = vmax.f32 %v8436_v29, 0.0 }
 0x247   : > { %3459 = vmatpush1.msra.mxu1 %v7858_v55  ;;  %3511 = vmatpush1.msra.mxu0 %v7863_v3 }
 0x248   : > { %3460 = vmatprep.subr.mxu1 %v10113_v60  ;;  %3512 = vmatprep.subr.mxu0 %v10113_v60 }
 0x249   : > { %3461 = vmatpush1.msra.mxu1 %v7876_v59  ;;  %3513 = vmatpush1.msra.mxu0 %v7881_v50 }
 0x24a   : > { %3462 = vmatprep.subr.mxu1 %v10113_v60  ;;  %3514 = vmatprep.subr.mxu0 %v10113_v60 }
 0x24b   : > { %3463 = vmatpush1.msra.mxu1 %v7890_v4  ;;  %3515 = vmatpush1.msra.mxu0 %v7895_v5 }
 0x24c   : > { %3484 = vmatprep.subr.mxu1 %v10113_v60  ;;  %3516 = vmatprep.subr.mxu0 %v10113_v60 }
 0x24d   : > { %3485 = vmatpush2.msra.mxu1 %v7904_v20  ;;  %3517 = vmatpush1.msra.mxu0 %v7909_v6 }
 0x24e   : > { %3486 = vmatprep.subr.mxu1 %v10113_v60  ;;  %3518 = vmatprep.subr.mxu0 %v10113_v60 }
 0x24f   : > { %3487 = vmatpush2.msra.mxu1 %v7923_v23  ;;  %3519 = vmatpush1.msra.mxu0 %v7928_v14 }
 0x250   : > { %3488 = vmatprep.subr.mxu1 %v10113_v60  ;;  %3520 = vmatprep.subr.mxu0 %v10113_v60 }
 0x251   : > { %3489 = vmatpush2.msra.mxu1 %v7938_v33  ;;  %3521 = vmatpush1.msra.mxu0 %v7943_v0 }
 0x252   : > { %3490 = vmatprep.subr.mxu1 %v10113_v60  ;;  %3522 = vmatprep.subr.mxu0 %v10113_v60 }
 0x253   : > { %3491 = vmatpush2.msra.mxu1 %v7955_v63  ;;  %3523 = vmatpush1.msra.mxu0 %v7960_v8 }
 0x254   : > { %3492 = vmatprep.subr.mxu1 %v10113_v60  ;;  %3524 = vmatprep.subr.mxu0 %v10113_v60 }
 0x255   : > { %3493 = vmatpush2.msra.mxu1 %v7974_v13  ;;  %3525 = vmatpush1.msra.mxu0 %v10256_v9 }
 0x256   : > { %3494 = vmatprep.subr.mxu1 %v10113_v60  ;;  %3526 = vmatprep.subr.mxu0 %v10113_v60 }
 0x257   : > { %3495 = vmatpush2.msra.mxu1 %v10258_v62  ;;  %3527 = vmatpush1.msra.mxu0 %v10259_v24 }
 0x258   : > { %3497 = vmatmul.mubr.f32.vlgmr.msra.gmra.mxu1 %v10047_v10  ;;  %3528 = vmatprep.subr.mxu0 %v10113_v60  ;;  %v10262_v10 = vld [vmem:[#allocation30_spill] sm:$0xff] }
 0x259   : > { %3578 = vmatprep.subr.mxu1 %v10113_v60  ;;  %3529 = vmatpush1.msra.mxu0 %v8008_v35  ;;  %v2607_v61 = vpop.f32.mrf.mxu0 }
 0x25a   : > { %3579 = vmatpush1.msra.mxu1 %v8159_v36  ;;  %5303 = vmatprep.mubr.msk.f32.mxu1 %vm3115_vm1, %v10260_v19  ;;  %v8462_v27 = vadd.f32 %v2607_v61, %v2534_v25  ;;  %v10263_v25 = vld [vmem:[#allocation34_spill] sm:$0xff]  ;;  %v10265_v61 = vld [vmem:[#allocation31_spill] sm:$0xff] }
 0x25b   : > { %3530 = vmatprep.subr.mxu0 %v10113_v60  ;;  %3580 = vmatprep.subr.mxu1 %v10113_v60  ;;  %v1409_v19 = vadd.f32 %v10265_v61, %v10264_v7  ;;  %v10269_v7 = vld [vmem:[#allocation39_spill] sm:$0xff] }
 0x25c   : > { %10261 = vst [vmem:[#allocation27_spill] sm:$0xff] %v8462_v27  ;;  %3531 = vmatpush1.msra.mxu0 %v8026_v28  ;;  %3581 = vmatpush1.msra.mxu1 %v8169_v52  ;;  %v10266_v27 = vld [vmem:[#allocation35_spill] sm:$0xff] }
 0x25d   : > { %3532 = vmatprep.subr.mxu0 %v10113_v60  ;;  %3582 = vmatprep.subr.mxu1 %v10113_v60 }
 0x25e   : > { %3533 = vmatpush1.msra.mxu0 %v10262_v10  ;;  %3583 = vmatpush1.msra.mxu1 %v8182_v40 }
 0x25f   : > { %3534 = vmatprep.subr.mxu0 %v10113_v60  ;;  %3584 = vmatprep.subr.mxu1 %v10113_v60 }
 0x260   : > { %3535 = vmatpush1.msra.mxu0 %v8050_v12  ;;  %3585 = vmatpush1.msra.mxu1 %v8195_v39  ;;  %v10268_v39 = vld [vmem:[#allocation37_spill] sm:$0xff] }
 0x261   : > { %3536 = vmatprep.subr.mxu0 %v10113_v60  ;;  %3586 = vmatprep.subr.mxu1 %v10113_v60  ;;  %v1636_v61 = vadd.f32 %v10269_v7, %v10268_v39 }
 0x262   : > { %3537 = vmatpush1.msra.mxu0 %v10263_v25  ;;  %3587 = vmatpush1.msra.mxu1 %v8208_v56  ;;  %v1487_v56 = vadd.f32 %v10267_v31, %v1409_v19  ;;  %v8503_v31 = vpop.f32.mrf.mxu1  ;;  %v10274_v19 = vld [vmem:[#allocation42_spill] sm:$0xff] }
 0x263   : > { %3538 = vmatprep.subr.mxu0 %v10113_v60  ;;  %3588 = vmatprep.subr.mxu1 %v10113_v60  ;;  %10273 = vst [vmem:[#allocation28_spill] sm:$0xff] %v8503_v31 }
 0x264   : > { %3539 = vmatpush1.msra.mxu0 %v10266_v27  ;;  %3589 = vmatpush1.msra.mxu1 %v8219_v57  ;;  %v10270_v57 = vld [vmem:[#allocation33_spill] sm:$0xff]  ;;  %v10271_v27 = vld [vmem:[#allocation8_spill] sm:$0xff]  ;;  %v1489_v39 = vadd.f32 %v1487_v56, %v7948_v16  ;;  %v2687_v7 = vpop.f32.mrf.mxu1 }
 0x265   : > { %3560 = vmatprep.subr.mxu0 %v10113_v60  ;;  %3590 = vmatprep.subr.mxu1 %v10113_v60  ;;  %v1713_v40 = vadd.f32 %v10271_v27, %v1636_v61  ;;  %v8521_v61 = vpop.f32.mrf.mxu0 }
 0x266   : > { %3561 = vmatpush2.msra.mxu0 %v8085_v53  ;;  %3591 = vmatpush1.msra.mxu1 %v8235_v26  ;;  %v10272_v26 = vld [vmem:[#allocation38_spill] sm:$0xff]  ;;  %v1491_v56 = vmax.f32 %v1489_v39, 0.0  ;;  %10275 = vst [vmem:[#allocation30_spill] sm:$0xff] %v8521_v61  ;;  %v2689_v31 = vpop.f32.mrf.mxu1 }
 0x267   : > { %3562 = vmatprep.subr.mxu0 %v10113_v60  ;;  %3592 = vmatprep.subr.mxu1 %v10113_v60  ;;  %v8510_v27 = vadd.f32 %v1713_v40, %v7705_v38 }
 0x268   : > { %3563 = vmatpush2.msra.mxu0 %v8096_v37  ;;  %3593 = vmatpush1.msra.mxu1 %v10270_v57 }
 0x269   : > { %3564 = vmatprep.subr.mxu0 %v10113_v60  ;;  %3594 = vmatprep.subr.mxu1 %v10113_v60  ;;  %v10057_v40 = vmax.f32 %v8510_v27, 0.0 }
 0x26a   : > { %3565 = vmatpush2.msra.mxu0 %v10272_v26  ;;  %3595 = vmatpush1.msra.mxu1 %v8257_v45 }
 0x26b   : > { %3566 = vmatprep.subr.mxu0 %v10113_v60  ;;  %3596 = vmatprep.subr.mxu1 %v10113_v60 }
 0x26c   : > { %3567 = vmatpush2.msra.mxu0 %v10274_v19  ;;  %3597 = vmatpush1.msra.mxu1 %v8271_v22 }
 0x26d   : > { %3568 = vmatprep.subr.mxu0 %v10113_v60  ;;  %3598 = vmatprep.subr.mxu1 %v10113_v60 }
 0x26e   : > { %3569 = vmatpush2.msra.mxu0 %v8133_v1  ;;  %3599 = vmatpush1.msra.mxu1 %v8280_v43 }
 0x26f   : > { %3570 = vmatprep.subr.mxu0 %v10113_v60  ;;  %3600 = vmatprep.subr.mxu1 %v10113_v60 }
 0x270   : > { %3571 = vmatpush2.msra.mxu0 %v8144_v18  ;;  %3601 = vmatpush1.msra.mxu1 %v8293_v2 }
 0x271   : > { %3573 = vmatmul.mubr.f32.vlgmr.msra.gmra.mxu0 %v1491_v56  ;;  %3602 = vmatprep.subr.mxu1 %v10113_v60 }
 0x272   : > { %3651 = vmatprep.subr.mxu0 %v10113_v60  ;;  %3603 = vmatpush1.msra.mxu1 %v8304_v42 }
 0x273   : > { %3652 = vmatpush1.msra.mxu0 %v7724_v41  ;;  %5304 = vmatprep.mubr.msk.f32.mxu0 %vm3115_vm1, %v10057_v40  ;;  %v2758_v39 = vpop.f32.mrf.mxu0  ;;  %v2832_v2 = vpop.f32.mrf.mxu1 }
 0x274   : > { %3604 = vmatprep.subr.mxu1 %v10113_v60  ;;  %3653 = vmatprep.subr.mxu0 %v10113_v60  ;;  %v2759_v61 = vadd.f32 %v2758_v39, %v2687_v7  ;;  %v10278_v39 = vld [vmem:[#allocation17_spill] sm:$0xff] }
 0x275   : > { %3605 = vmatpush1.msra.mxu1 %v8313_v48  ;;  %3654 = vmatpush1.msra.mxu0 %v7737_v44  ;;  %v2760_v56 = vpop.f32.mrf.mxu0  ;;  %v2834_v40 = vpop.f32.mrf.mxu1  ;;  %v10277_v44 = vld [vmem:[#allocation10_spill] sm:$0xff] }
 0x276   : > { %3606 = vmatprep.subr.mxu1 %v10113_v60  ;;  %3655 = vmatprep.subr.mxu0 %v10113_v60  ;;  %v8536_v41 = vadd.f32 %v2832_v2, %v2759_v61  ;;  %v2761_v42 = vadd.f32 %v2760_v56, %v2689_v31  ;;  %v1861_v2 = vadd.f32 %v10278_v39, %v10277_v44  ;;  %v10281_v31 = vld [vmem:[#allocation15_spill] sm:$0xff]  ;;  %v10283_v61 = vld [vmem:[#allocation20_spill] sm:$0xff]  ;;  %v10285_v39 = vld [vmem:[#allocation25_spill] sm:$0xff] }
 0x277   : > { %3607 = vmatpush1.msra.mxu1 %v8322_v47  ;;  %3656 = vmatpush1.msra.mxu0 %v7748_v11  ;;  %v10279_v11 = vld [vmem:[#allocation13_spill] sm:$0xff]  ;;  %v10284_v56 = vld [vmem:[#allocation23_spill] sm:$0xff] }
 0x278   : > { %10276 = vst [vmem:[#allocation34_spill] sm:$0xff] %v8536_v41  ;;  %3608 = vmatprep.subr.mxu1 %v10113_v60  ;;  %3657 = vmatprep.subr.mxu0 %v10113_v60  ;;  %v8542_v7 = vadd.f32 %v2834_v40, %v2761_v42  ;;  %v10280_v42 = vld [vmem:[#allocation50_spill] sm:$0xff] }
 0x279   : > { %3609 = vmatpush1.msra.mxu1 %v8331_v32  ;;  %3658 = vmatpush1.msra.mxu0 %v7757_v15  ;;  %v10282_v15 = vld [vmem:[#allocation19_spill] sm:$0xff]  ;;  %v9067_v41 = vld [vmem:[%s9896_s3 + $0x48] sm:$0xff] }
 0x27a   : > { %3630 = vmatprep.subr.mxu1 %v10113_v60  ;;  %3659 = vmatprep.subr.mxu0 %v10113_v60  ;;  %v1938_v40 = vadd.f32 %v10282_v15, %v1861_v2  ;;  %v10286_v2 = vld [vmem:[#allocation24_spill] sm:$0xff]  ;;  %10320 = vst [vmem:[#allocation42_spill] sm:$0xff] %v9067_v41 }
 0x27b   : > { %3631 = vmatpush2.msra.mxu1 %v8340_v58  ;;  %3660 = vmatpush1.msra.mxu0 %v10279_v11 }
 0x27c   : > { %3632 = vmatprep.subr.mxu1 %v10113_v60  ;;  %3661 = vmatprep.subr.mxu0 %v10113_v60  ;;  %v1940_v44 = vadd.f32 %v1938_v40, %v7705_v38  ;;  %v10305_v40 = vld [vmem:[#allocation16_spill] sm:$0xff] }
 0x27d   : > { %3633 = vmatpush2.msra.mxu1 %v10280_v42  ;;  %3662 = vmatpush1.msra.mxu0 %v10281_v31  ;;  %v10287_v31 = vmax.f32 %v8436_v29, 0.0 }
 0x27e   : > { %3634 = vmatprep.subr.mxu1 %v10113_v60  ;;  %3663 = vmatprep.subr.mxu0 %v10113_v60  ;;  %v1942_v11 = vmax.f32 %v1940_v44, 0.0 }
 0x27f   : > { %3635 = vmatpush2.msra.mxu1 %v8360_v49  ;;  %3664 = vmatpush1.msra.mxu0 %v10283_v61 }
 0x280   : > { %3636 = vmatprep.subr.mxu1 %v10113_v60  ;;  %3665 = vmatprep.subr.mxu0 %v10113_v60 }
 0x281   : > { %3637 = vmatpush2.msra.mxu1 %v8370_v21  ;;  %3666 = vmatpush1.msra.mxu0 %v10284_v56  ;;  %v8731_v56 = vld [vmem:[%s9896_s3 + $0x1c0] sm:$0xff] }
 0x282   : > { %3638 = vmatprep.subr.mxu1 %v10113_v60  ;;  %3667 = vmatprep.subr.mxu0 %v10113_v60 }
 0x283   : > { %3639 = vmatpush2.msra.mxu1 %v8383_v34  ;;  %3668 = vmatpush1.msra.mxu0 %v10285_v39  ;;  %v8742_v39 = vld [vmem:[%s9896_s3 + $0x1b8] sm:$0xff] }
 0x284   : > { %3640 = vmatprep.subr.mxu1 %v10113_v60  ;;  %3669 = vmatprep.subr.mxu0 %v10113_v60 }
 0x285   : > { %3641 = vmatpush2.msra.mxu1 %v8393_v17  ;;  %3670 = vmatpush1.msra.mxu0 %v10286_v2 }
 0x286   : > { %3643 = vmatmul.mubr.f32.vlgmr.msra.gmra.mxu1 %v10287_v31  ;;  %3671 = vmatprep.subr.mxu0 %v10113_v60  ;;  %v10308_v31 = vld [vmem:[#allocation46_spill] sm:$0xff] }
 0x287   : > { %3727 = vmatprep.subr.mxu1 %v10113_v60  ;;  %3672 = vmatpush1.msra.mxu0 %v7822_v30 }
 0x288   : > { %3728 = vmatpush1.msra.mxu1 %v7849_v51  ;;  %5305 = vmatprep.mubr.msk.f32.mxu1 %vm3115_vm1, %v1942_v11  ;;  %v8751_v11 = vld [vmem:[%s9896_s3 + $0x1b0] sm:$0xff] }
 0x289   : > { %3673 = vmatprep.subr.mxu0 %v10113_v60  ;;  %3729 = vmatprep.subr.mxu1 %v10113_v60 }
 0x28a   : > { %3674 = vmatpush1.msra.mxu0 %v7832_v46  ;;  %3730 = vmatpush1.msra.mxu1 %v7863_v3 }
 0x28b   : > { %3675 = vmatprep.subr.mxu0 %v10113_v60  ;;  %3731 = vmatprep.subr.mxu1 %v10113_v60 }
 0x28c   : > { %3676 = vmatpush1.msra.mxu0 %v7842_v54  ;;  %3732 = vmatpush1.msra.mxu1 %v7881_v50  ;;  %v10289_v50 = vld [vmem:[#allocation36_spill] sm:$0xff] }
 0x28d   : > { %3677 = vmatprep.subr.mxu0 %v10113_v60  ;;  %3733 = vmatprep.subr.mxu1 %v10113_v60  ;;  %v2912_v30 = vpop.f32.mrf.mxu0  ;;  %v2983_v51 = vpop.f32.mrf.mxu1 }
 0x28e   : > { %3678 = vmatpush1.msra.mxu0 %v7858_v55  ;;  %3734 = vmatpush1.msra.mxu1 %v7895_v5  ;;  %v2984_v46 = vadd.f32 %v2983_v51, %v2912_v30  ;;  %v10288_v55 = vld [vmem:[#allocation41_spill] sm:$0xff]  ;;  %v10309_v30 = vld [vmem:[#allocation51_spill] sm:$0xff] }
 0x28f   : > { %3679 = vmatprep.subr.mxu0 %v10113_v60  ;;  %3735 = vmatprep.subr.mxu1 %v10113_v60  ;;  %v2914_v3 = vpop.f32.mrf.mxu0  ;;  %v2985_v29 = vpop.f32.mrf.mxu1  ;;  %v1634_v5 = vadd.f32 %v10289_v50, %v10288_v55  ;;  %v2311_v51 = vadd.f32 %v10309_v30, %v10308_v31  ;;  %v8781_v55 = vld [vmem:[%s9896_s3 + $0x198] sm:$0xff]  ;;  %v8790_v50 = vld [vmem:[%s9896_s3 + $0x190] sm:$0xff]  ;;  %v8941_v30 = vld [vmem:[%s9896_s3 + $0x1e8] sm:$0xff] }
 0x290   : > { %3680 = vmatpush1.msra.mxu0 %v7876_v59  ;;  %3736 = vmatpush1.msra.mxu1 %v7909_v6  ;;  %v8597_v54 = vadd.f32 %v2985_v29, %v2914_v3  ;;  %v10290_v59 = vld [vmem:[#allocation40_spill] sm:$0xff]  ;;  %v8933_v31 = vld [vmem:[%s9896_s3 + $0xf0] sm:$0xff] }
 0x291   : > { %3681 = vmatprep.subr.mxu0 %v10113_v60  ;;  %3737 = vmatprep.subr.mxu1 %v10113_v60  ;;  %v1712_v6 = vadd.f32 %v10290_v59, %v1634_v5  ;;  %v8771_v3 = vld [vmem:[%s9896_s3 + $0x1a0] sm:$0xff]  ;;  %v8800_v59 = vld [vmem:[%s9896_s3 + $0x188] sm:$0xff] }
 0x292   : > { %3682 = vmatpush1.msra.mxu0 %v7890_v4  ;;  %3738 = vmatpush1.msra.mxu1 %v7928_v14  ;;  %v10292_v14 = vld [vmem:[#allocation18_spill] sm:$0xff]  ;;  %v10310_v29 = vld [vmem:[#allocation52_spill] sm:$0xff] }
 0x293   : > { %3703 = vmatprep.subr.mxu0 %v10113_v60  ;;  %3739 = vmatprep.subr.mxu1 %v10113_v60  ;;  %v8619_v4 = vadd.f32 %v1712_v6, %v7948_v16  ;;  %v8809_v6 = vld [vmem:[%s9896_s3 + $0x180] sm:$0xff] }
 0x294   : > { %3704 = vmatpush2.msra.mxu0 %v7904_v20  ;;  %3740 = vmatpush1.msra.mxu1 %v7943_v0  ;;  %v10294_v0 = vld [vmem:[#allocation12_spill] sm:$0xff] }
 0x295   : > { %3705 = vmatprep.subr.mxu0 %v10113_v60  ;;  %3741 = vmatprep.subr.mxu1 %v10113_v60  ;;  %v1716_v20 = vmax.f32 %v8619_v4, 0.0  ;;  %v8834_v4 = vld [vmem:[%s9896_s3 + $0x170] sm:$0xff] }
 0x296   : > { %3706 = vmatpush2.msra.mxu0 %v7923_v23  ;;  %3742 = vmatpush1.msra.mxu1 %v7960_v8  ;;  %v10291_v23 = vmax.f32 %v8510_v27, 0.0  ;;  %v10295_v8 = vld [vmem:[#allocation35_spill] sm:$0xff] }
 0x297   : > { %3707 = vmatprep.subr.mxu0 %v10113_v60  ;;  %3743 = vmatprep.subr.mxu1 %v10113_v60  ;;  %v10303_v27 = vld [vmem:[#allocation7_spill] sm:$0xff] }
 0x298   : > { %3708 = vmatpush2.msra.mxu0 %v7938_v33  ;;  %3744 = vmatpush1.msra.mxu1 %v10256_v9  ;;  %v10293_v33 = vld [vmem:[#allocation43_spill] sm:$0xff] }
 0x299   : > { %3709 = vmatprep.subr.mxu0 %v10113_v60  ;;  %3745 = vmatprep.subr.mxu1 %v10113_v60 }
 0x29a   : > { %3710 = vmatpush2.msra.mxu0 %v7955_v63  ;;  %3746 = vmatpush1.msra.mxu1 %v10259_v24  ;;  %v1859_v63 = vadd.f32 %v10294_v0, %v10293_v33  ;;  %v8825_v33 = vld [vmem:[%s9896_s3 + $0x128] sm:$0xff] }
 0x29b   : > { %3711 = vmatprep.subr.mxu0 %v10113_v60  ;;  %3747 = vmatprep.subr.mxu1 %v10113_v60  ;;  %v8848_v0 = vld [vmem:[%s9896_s3 + $0x168] sm:$0xff] }
 0x29c   : > { %3712 = vmatpush2.msra.mxu0 %v7974_v13  ;;  %3748 = vmatpush1.msra.mxu1 %v8008_v35  ;;  %v10296_v13 = vld [vmem:[#allocation22_spill] sm:$0xff] }
 0x29d   : > { %3713 = vmatprep.subr.mxu0 %v10113_v60  ;;  %3749 = vmatprep.subr.mxu1 %v10113_v60 }
 0x29e   : > { %3714 = vmatpush2.msra.mxu0 %v10258_v62  ;;  %3750 = vmatpush1.msra.mxu1 %v8026_v28  ;;  %v10301_v62 = vld [vmem:[#allocation9_spill] sm:$0xff] }
 0x29f   : > { %3716 = vmatmul.mubr.f32.vlgmr.msra.gmra.mxu0 %v1716_v20  ;;  %3751 = vmatprep.subr.mxu1 %v10113_v60 }
 0x2a0   : > { %3797 = vmatprep.subr.mxu0 %v10113_v60  ;;  %3752 = vmatpush1.msra.mxu1 %v10262_v10  ;;  %v10300_v10 = vld [vmem:[#allocation6_spill] sm:$0xff] }
 0x2a1   : > { %3798 = vmatpush1.msra.mxu0 %v8159_v36  ;;  %5306 = vmatprep.mubr.msk.f32.mxu0 %vm3115_vm1, %v10291_v23  ;;  %v2086_v24 = vadd.f32 %v10301_v62, %v10300_v10  ;;  %v8881_v10 = vld [vmem:[%s9896_s3 + $0x208] sm:$0xff] }
 0x2a2   : > { %3753 = vmatprep.subr.mxu1 %v10113_v60  ;;  %3799 = vmatprep.subr.mxu0 %v10113_v60  ;;  %v8887_v62 = vld [vmem:[%s9896_s3 + $0x108] sm:$0xff] }
 0x2a3   : > { %3754 = vmatpush1.msra.mxu1 %v8050_v12  ;;  %3800 = vmatpush1.msra.mxu0 %v8169_v52  ;;  %v10298_v12 = vld [vmem:[#allocation5_spill] sm:$0xff]  ;;  %v10299_v52 = vld [vmem:[#allocation14_spill] sm:$0xff] }
 0x2a4   : > { %3755 = vmatprep.subr.mxu1 %v10113_v60  ;;  %3801 = vmatprep.subr.mxu0 %v10113_v60  ;;  %v1937_v9 = vadd.f32 %v10299_v52, %v1859_v63  ;;  %v8854_v63 = vld [vmem:[%s9896_s3 + $0x118] sm:$0xff] }
 0x2a5   : > { %3756 = vmatpush1.msra.mxu1 %v10263_v25  ;;  %3802 = vmatpush1.msra.mxu0 %v10292_v14  ;;  %v8819_v14 = vld [vmem:[%s9896_s3 + $0x178] sm:$0xff] }
 0x2a6   : > { %3757 = vmatprep.subr.mxu1 %v10113_v60  ;;  %3803 = vmatprep.subr.mxu0 %v10113_v60  ;;  %v1939_v61 = vadd.f32 %v1937_v9, %v7948_v16 }
 0x2a7   : > { %3758 = vmatpush1.msra.mxu1 %v10295_v8  ;;  %3804 = vmatpush1.msra.mxu0 %v10296_v13  ;;  %v3057_v35 = vpop.f32.mrf.mxu0  ;;  %v8862_v8 = vld [vmem:[%s9896_s3 + $0x160] sm:$0xff]  ;;  %v8868_v13 = vld [vmem:[%s9896_s3 + $0x110] sm:$0xff] }
 0x2a8   : > { %3779 = vmatprep.subr.mxu1 %v10113_v60  ;;  %3805 = vmatprep.subr.mxu0 %v10113_v60  ;;  %v8659_v28 = vadd.f32 %v3057_v35, %v2984_v46  ;;  %v8762_v46 = vld [vmem:[%s9896_s3 + $0x1a8] sm:$0xff] }
 0x2a9   : > { %3780 = vmatpush2.msra.mxu1 %v8085_v53  ;;  %3806 = vmatpush1.msra.mxu0 %v10298_v12  ;;  %v3059_v36 = vpop.f32.mrf.mxu0  ;;  %v10304_v53 = vld [vmem:[#allocation45_spill] sm:$0xff] }
 0x2aa   : > { %10297 = vst [vmem:[#allocation29_spill] sm:$0xff] %v8659_v28  ;;  %3781 = vmatprep.subr.mxu1 %v10113_v60  ;;  %3807 = vmatprep.subr.mxu0 %v10113_v60  ;;  %v8669_v25 = vadd.f32 %v3059_v36, %v8597_v54  ;;  %v2163_v15 = vadd.f32 %v10304_v53, %v2086_v24  ;;  %v10311_v12 = vld [vmem:[#allocation21_spill] sm:$0xff]  ;;  %v10312_v36 = vld [vmem:[#allocation44_spill] sm:$0xff]  ;;  %v9047_v28 = vld [vmem:[%s9896_s3 + $0xb0] sm:$0xff] }
 0x2ab   : > { %3782 = vmatpush2.msra.mxu1 %v8096_v37  ;;  %3808 = vmatpush1.msra.mxu0 %v10303_v27  ;;  %v2388_v54 = vadd.f32 %v10310_v29, %v2311_v51  ;;  %v2084_v52 = vadd.f32 %v10312_v36, %v10311_v12  ;;  %v10314_v27 = vld [vmem:[#allocation11_spill] sm:$0xff]  ;;  %v8947_v51 = vld [vmem:[%s9896_s3 + $0xe8] sm:$0xff]  ;;  %10317 = vst [vmem:[#allocation33_spill] sm:$0xff] %v9047_v28 }
 0x2ac   : > { %10302 = vst [vmem:[#allocation31_spill] sm:$0xff] %v8669_v25  ;;  %3783 = vmatprep.subr.mxu1 %v10113_v60  ;;  %3809 = vmatprep.subr.mxu0 %v10113_v60  ;;  %v8684_v37 = vadd.f32 %v2163_v15, %v7705_v38  ;;  %v8896_v15 = vld [vmem:[%s9896_s3 + $0x200] sm:$0xff]  ;;  %v8989_v12 = vld [vmem:[%s9896_s3 + $0xd0] sm:$0xff] }
 0x2ad   : > { %3784 = vmatpush2.msra.mxu1 %v10272_v26  ;;  %3810 = vmatpush1.msra.mxu0 %v10305_v40  ;;  %v1941_v26 = vmax.f32 %v1939_v61, 0.0  ;;  %v2390_v5 = vadd.f32 %v2388_v54, %v7705_v38  ;;  %v2162_v53 = vadd.f32 %v10314_v27, %v2084_v52  ;;  %v8902_v40 = vld [vmem:[%s9896_s3 + $0x100] sm:$0xff]  ;;  %v8910_v61 = vld [vmem:[%s9896_s3 + $0x1f8] sm:$0xff]  ;;  %v8995_v36 = vld [vmem:[%s9896_s3 + $0x70] sm:$0xff] }
 0x2ae   : > { %3785 = vmatprep.subr.mxu1 %v10113_v60  ;;  %3811 = vmatprep.subr.mxu0 %v10113_v60  ;;  %v8956_v54 = vld [vmem:[%s9896_s3 + $0x1e0] sm:$0xff]  ;;  %v9053_v25 = vld [vmem:[%s9896_s3 + $0x50] sm:$0xff] }
 0x2af   : > { %3786 = vmatpush2.msra.mxu1 %v10274_v19  ;;  %3812 = vmatpush1.msra.mxu0 %v10270_v57  ;;  %v2167_v57 = vmax.f32 %v8684_v37, 0.0  ;;  %v8722_v19 = vld [vmem:[%s9896_s3 + $0x1c8] sm:$0xff]  ;;  %v2392_v23 = vmax.f32 %v2390_v5, 0.0  ;;  %v8962_v5 = vld [vmem:[%s9896_s3 + $0xe0] sm:$0xff]  ;;  %10318 = vst [vmem:[#allocation8_spill] sm:$0xff] %v9053_v25 }
 0x2b0   : > { %3787 = vmatprep.subr.mxu1 %v10113_v60  ;;  %3813 = vmatprep.subr.mxu0 %v10113_v60  ;;  %v9003_v37 = vld [vmem:[%s9896_s3 + $0xc8] sm:$0xff]  ;;  %v9017_v52 = vld [vmem:[%s9896_s3 + $0xc0] sm:$0xff] }
 0x2b1   : > { %3788 = vmatpush2.msra.mxu1 %v8133_v1  ;;  %3814 = vmatpush1.msra.mxu0 %v8257_v45  ;;  %v8701_v1 = vld [vmem:[%s9896_s3 + $0x1d8] sm:$0xff]  ;;  %v8713_v45 = vld [vmem:[%s9896_s3 + $0x1d0] sm:$0xff] }
 0x2b2   : > { %3789 = vmatprep.subr.mxu1 %v10113_v60  ;;  %3815 = vmatprep.subr.mxu0 %v10113_v60 }
 0x2b3   : > { %3790 = vmatpush2.msra.mxu1 %v8144_v18  ;;  %3816 = vmatpush1.msra.mxu0 %v8271_v22  ;;  %v10306_v18 = vld [vmem:[#allocation48_spill] sm:$0xff]  ;;  %v10307_v22 = vld [vmem:[#allocation49_spill] sm:$0xff] }
 0x2b4   : > { %3792 = vmatmul.mubr.f32.vlgmr.msra.gmra.mxu1 %v1941_v26  ;;  %3817 = vmatprep.subr.mxu0 %v10113_v60  ;;  %v8916_v26 = vld [vmem:[%s9896_s3 + $0xf8] sm:$0xff] }
 0x2b5   : > { %3870 = vmatprep.subr.mxu1 %v10113_v60  ;;  %3818 = vmatpush1.msra.mxu0 %v8280_v43 }
 0x2b6   : > { %3871 = vmatpush1.msra.mxu1 %v8701_v1  ;;  %5307 = vmatprep.mubr.msk.f32.mxu1 %vm3115_vm1, %v2167_v57 }
 0x2b7   : > { %3819 = vmatprep.subr.mxu0 %v10113_v60  ;;  %3872 = vmatprep.subr.mxu1 %v10113_v60 }
 0x2b8   : > { %3820 = vmatpush1.msra.mxu0 %v10306_v18  ;;  %3873 = vmatpush1.msra.mxu1 %v8713_v45 }
 0x2b9   : > { %3821 = vmatprep.subr.mxu0 %v10113_v60  ;;  %3874 = vmatprep.subr.mxu1 %v10113_v60 }
 0x2ba   : > { %3822 = vmatpush1.msra.mxu0 %v10307_v22  ;;  %3875 = vmatpush1.msra.mxu1 %v8722_v19 }
 0x2bb   : > { %3823 = vmatprep.subr.mxu0 %v10113_v60  ;;  %3876 = vmatprep.subr.mxu1 %v10113_v60 }
 0x2bc   : > { %3824 = vmatpush1.msra.mxu0 %v8313_v48  ;;  %3877 = vmatpush1.msra.mxu1 %v8731_v56  ;;  %v8734_v44 = vpop.f32.mrf.mxu1 }
 0x2bd   : > { %3825 = vmatprep.subr.mxu0 %v10113_v60  ;;  %3878 = vmatprep.subr.mxu1 %v10113_v60 }
 0x2be   : > { %3826 = vmatpush1.msra.mxu0 %v8322_v47  ;;  %3879 = vmatpush1.msra.mxu1 %v8742_v39  ;;  %v3187_v2 = vpop.f32.mrf.mxu1 }
 0x2bf   : > { %3827 = vmatprep.subr.mxu0 %v10113_v60  ;;  %3880 = vmatprep.subr.mxu1 %v10113_v60  ;;  %v8927_v2 = vld [vmem:[%s9896_s3 + $0x1f0] sm:$0xff] }
 0x2c0   : > { %3828 = vmatpush1.msra.mxu0 %v8331_v32  ;;  %3881 = vmatpush1.msra.mxu1 %v8751_v11 }
 0x2c1   : > { %3849 = vmatprep.subr.mxu0 %v10113_v60  ;;  %3882 = vmatprep.subr.mxu1 %v10113_v60 }
 0x2c2   : > { %3850 = vmatpush2.msra.mxu0 %v8340_v58  ;;  %3883 = vmatpush1.msra.mxu1 %v8762_v46 }
 0x2c3   : > { %3851 = vmatprep.subr.mxu0 %v10113_v60  ;;  %3884 = vmatprep.subr.mxu1 %v10113_v60 }
 0x2c4   : > { %3852 = vmatpush2.msra.mxu0 %v10280_v42  ;;  %3885 = vmatpush1.msra.mxu1 %v8771_v3 }
 0x2c5   : > { %3853 = vmatprep.subr.mxu0 %v10113_v60  ;;  %3886 = vmatprep.subr.mxu1 %v10113_v60 }
 0x2c6   : > { %3854 = vmatpush2.msra.mxu0 %v8360_v49  ;;  %3887 = vmatpush1.msra.mxu1 %v8781_v55 }
 0x2c7   : > { %3855 = vmatprep.subr.mxu0 %v10113_v60  ;;  %3888 = vmatprep.subr.mxu1 %v10113_v60 }
 0x2c8   : > { %3856 = vmatpush2.msra.mxu0 %v8370_v21  ;;  %3889 = vmatpush1.msra.mxu1 %v8790_v50 }
 0x2c9   : > { %3857 = vmatprep.subr.mxu0 %v10113_v60  ;;  %3890 = vmatprep.subr.mxu1 %v10113_v60 }
 0x2ca   : > { %3858 = vmatpush2.msra.mxu0 %v8383_v34  ;;  %3891 = vmatpush1.msra.mxu1 %v8800_v59 }
 0x2cb   : > { %3859 = vmatprep.subr.mxu0 %v10113_v60  ;;  %3892 = vmatprep.subr.mxu1 %v10113_v60 }
 0x2cc   : > { %3860 = vmatpush2.msra.mxu0 %v8393_v17  ;;  %3893 = vmatpush1.msra.mxu1 %v8809_v6 }
 0x2cd   : > { %3862 = vmatmul.mubr.f32.vlgmr.msra.gmra.mxu0 %v1716_v20  ;;  %3894 = vmatprep.subr.mxu1 %v10113_v60  ;;  %v8840_v20 = vld [vmem:[%s9896_s3 + $0x120] sm:$0xff] }
 0x2ce   : > { %3946 = vmatprep.subr.mxu0 %v10113_v60  ;;  %3895 = vmatpush1.msra.mxu1 %v8819_v14 }
 0x2cf   : > { %3947 = vmatpush1.msra.mxu0 %v8825_v33  ;;  %5308 = vmatprep.mubr.msk.f32.mxu0 %vm3115_vm1, %v2392_v23  ;;  %v8972_v23 = vld [vmem:[%s9896_s3 + $0xd8] sm:$0xff] }
 0x2d0   : > { %3896 = vmatprep.subr.mxu1 %v10113_v60  ;;  %3948 = vmatprep.subr.mxu0 %v10113_v60 }
 0x2d1   : > { %3897 = vmatpush1.msra.mxu1 %v8834_v4  ;;  %3949 = vmatpush1.msra.mxu0 %v8840_v20 }
 0x2d2   : > { %3898 = vmatprep.subr.mxu1 %v10113_v60  ;;  %3950 = vmatprep.subr.mxu0 %v10113_v60 }
 0x2d3   : > { %3899 = vmatpush1.msra.mxu1 %v8848_v0  ;;  %3951 = vmatpush1.msra.mxu0 %v8854_v63 }
 0x2d4   : > { %3900 = vmatprep.subr.mxu1 %v10113_v60  ;;  %3952 = vmatprep.subr.mxu0 %v10113_v60 }
 0x2d5   : > { %3901 = vmatpush1.msra.mxu1 %v8862_v8  ;;  %3953 = vmatpush1.msra.mxu0 %v8868_v13  ;;  %v3258_v35 = vpop.f32.mrf.mxu0 }
 0x2d6   : > { %3922 = vmatprep.subr.mxu1 %v10113_v60  ;;  %3954 = vmatprep.subr.mxu0 %v10113_v60  ;;  %v8876_v9 = vadd.f32 %v3258_v35, %v8734_v44  ;;  %v8920_v44 = vadd.f32 %v2162_v53, %v7948_v16  ;;  %v8978_v35 = vld [vmem:[%s9896_s3 + $0x78] sm:$0xff] }
 0x2d7   : > { %3923 = vmatpush2.msra.mxu1 %v8881_v10  ;;  %3955 = vmatpush1.msra.mxu0 %v8887_v62  ;;  %v3260_v24 = vpop.f32.mrf.mxu0  ;;  %v9033_v53 = vld [vmem:[%s9896_s3 + $0xb8] sm:$0xff] }
 0x2d8   : > { %10313 = vst [vmem:[#allocation32_spill] sm:$0xff] %v8876_v9  ;;  %3924 = vmatprep.subr.mxu1 %v10113_v60  ;;  %3956 = vmatprep.subr.mxu0 %v10113_v60  ;;  %v10058_v29 = vmax.f32 %v8920_v44, 0.0  ;;  %v9023_v24 = vld [vmem:[%s9896_s3 + $0x60] sm:$0xff] }
 0x2d9   : > { %3925 = vmatpush2.msra.mxu1 %v8896_v15  ;;  %3957 = vmatpush1.msra.mxu0 %v8902_v40  ;;  %10315 = vst [vmem:[#allocation37_spill] sm:$0xff] %v9023_v24 }
 0x2da   : > { %3926 = vmatprep.subr.mxu1 %v10113_v60  ;;  %3958 = vmatprep.subr.mxu0 %v10113_v60 }
 0x2db   : > { %3927 = vmatpush2.msra.mxu1 %v8910_v61  ;;  %3959 = vmatpush1.msra.mxu0 %v8916_v26 }
 0x2dc   : > { %3928 = vmatprep.subr.mxu1 %v10113_v60  ;;  %3960 = vmatprep.subr.mxu0 %v10113_v60 }
 0x2dd   : > { %3929 = vmatpush2.msra.mxu1 %v8927_v2  ;;  %3961 = vmatpush1.msra.mxu0 %v8933_v31 }
 0x2de   : > { %3930 = vmatprep.subr.mxu1 %v10113_v60  ;;  %3962 = vmatprep.subr.mxu0 %v10113_v60 }
 0x2df   : > { %3931 = vmatpush2.msra.mxu1 %v8941_v30  ;;  %3963 = vmatpush1.msra.mxu0 %v8947_v51 }
 0x2e0   : > { %3932 = vmatprep.subr.mxu1 %v10113_v60  ;;  %3964 = vmatprep.subr.mxu0 %v10113_v60 }
 0x2e1   : > { %3933 = vmatpush2.msra.mxu1 %v8956_v54  ;;  %3965 = vmatpush1.msra.mxu0 %v8962_v5 }
 0x2e2   : > { %3935 = vmatmul.mubr.f32.vlgmr.msra.gmra.mxu1 %v10058_v29  ;;  %3966 = vmatprep.subr.mxu0 %v10113_v60  ;;  %v9039_v29 = vld [vmem:[%s9896_s3 + $0x58] sm:$0xff] }
 0x2e3   : > { %4016 = vmatprep.subr.mxu1 %v10113_v60  ;;  %3967 = vmatpush1.msra.mxu0 %v8972_v23  ;;  %10316 = vst [vmem:[#allocation39_spill] sm:$0xff] %v9039_v29 }
 0x2e4   : > { %4017 = vmatpush1.msra.mxu1 %v8978_v35  ;;  %5309 = vmatprep.mubr.msk.f32.mxu1 %vm3115_vm1, %v2167_v57  ;;  %v9009_v57 = vld [vmem:[%s9896_s3 + $0x68] sm:$0xff] }
 0x2e5   : > { %3968 = vmatprep.subr.mxu0 %v10113_v60  ;;  %4018 = vmatprep.subr.mxu1 %v10113_v60 }
 0x2e6   : > { %3969 = vmatpush1.msra.mxu0 %v8989_v12  ;;  %4019 = vmatpush1.msra.mxu1 %v8995_v36 }
 0x2e7   : > { %3970 = vmatprep.subr.mxu0 %v10113_v60  ;;  %4020 = vmatprep.subr.mxu1 %v10113_v60 }
 0x2e8   : > { %3971 = vmatpush1.msra.mxu0 %v9003_v37  ;;  %4021 = vmatpush1.msra.mxu1 %v9009_v57 }
 0x2e9   : > { %3972 = vmatprep.subr.mxu0 %v10113_v60  ;;  %4022 = vmatprep.subr.mxu1 %v10113_v60 }
 0x2ea   : > { %3973 = vmatpush1.msra.mxu0 %v9017_v52  ;;  %4023 = vmatpush1.msra.mxu1 %v9023_v24  ;;  %v9026_v27 = vpop.f32.mrf.mxu1 }
 0x2eb   : > { %3974 = vmatprep.subr.mxu0 %v10113_v60  ;;  %4024 = vmatprep.subr.mxu1 %v10113_v60 }
 0x2ec   : > { %3975 = vmatpush1.msra.mxu0 %v9033_v53  ;;  %4025 = vmatpush1.msra.mxu1 %v9039_v29  ;;  %v3357_v9 = vpop.f32.mrf.mxu1  ;;  %v10321_v29 = vld [vmem:[#allocation26_spill] sm:$0xff] }
 0x2ed   : > { %3976 = vmatprep.subr.mxu0 %v10113_v60  ;;  %4026 = vmatprep.subr.mxu1 %v10113_v60  ;;  %v9061_v9 = vld [vmem:[%s9896_s3 + $0x158] sm:$0xff] }
 0x2ee   : > { %3977 = vmatpush1.msra.mxu0 %v9047_v28  ;;  %4027 = vmatpush1.msra.mxu1 %v9053_v25  ;;  %10319 = vst [vmem:[#allocation38_spill] sm:$0xff] %v9061_v9  ;;  %v10322_v25 = vld [vmem:[#allocation28_spill] sm:$0xff]  ;;  %v9077_v28 = vld [vmem:[%s9896_s3 + $0x150] sm:$0xff] }
 0x2ef   : > { %3998 = vmatprep.subr.mxu0 %v10113_v60  ;;  %4028 = vmatprep.subr.mxu1 %v10113_v60  ;;  %v2536_v24 = vadd.f32 %v10322_v25, %v10321_v29  ;;  %10323 = vst [vmem:[#allocation10_spill] sm:$0xff] %v9077_v28  ;;  %v9092_v29 = vld [vmem:[%s9896_s3 + $0x148] sm:$0xff] }
 0x2f0   : > { %3999 = vmatpush2.msra.mxu0 %v9061_v9  ;;  %4029 = vmatpush1.msra.mxu1 %v9067_v41  ;;  %v9083_v9 = vld [vmem:[%s9896_s3 + $0x40] sm:$0xff]  ;;  %v10325_v41 = vld [vmem:[#allocation30_spill] sm:$0xff]  ;;  %10326 = vst [vmem:[#allocation13_spill] sm:$0xff] %v9092_v29 }
 0x2f1   : > { %4000 = vmatprep.subr.mxu0 %v10113_v60  ;;  %4030 = vmatprep.subr.mxu1 %v10113_v60  ;;  %10324 = vst [vmem:[#allocation17_spill] sm:$0xff] %v9083_v9  ;;  %v2613_v25 = vadd.f32 %v10325_v41, %v2536_v24  ;;  %v10328_v41 = vld [vmem:[#allocation47_spill] sm:$0xff] }
 0x2f2   : > { %4001 = vmatpush2.msra.mxu0 %v9077_v28  ;;  %4031 = vmatpush1.msra.mxu1 %v9083_v9  ;;  %v9098_v28 = vld [vmem:[%s9896_s3 + $0x38] sm:$0xff]  ;;  %v2389_v24 = vadd.f32 %v10328_v41, %v7948_v16  ;;  %v9108_v9 = vld [vmem:[%s9896_s3 + $0x140] sm:$0xff] }
 0x2f3   : > { %4002 = vmatprep.subr.mxu0 %v10113_v60  ;;  %4032 = vmatprep.subr.mxu1 %v10113_v60  ;;  %10327 = vst [vmem:[#allocation50_spill] sm:$0xff] %v9098_v28  ;;  %10329 = vst [vmem:[#allocation15_spill] sm:$0xff] %v9108_v9  ;;  %v9118_v41 = vadd.f32 %v2613_v25, %v7705_v38  ;;  %v9134_v25 = vld [vmem:[%s9896_s3 + $0x130] sm:$0xff] }
 0x2f4   : > { %4003 = vmatpush2.msra.mxu0 %v9092_v29  ;;  %4033 = vmatpush1.msra.mxu1 %v9098_v28  ;;  %v9114_v29 = vld [vmem:[%s9896_s3 + $0x30] sm:$0xff]  ;;  %v9125_v28 = vld [vmem:[%s9896_s3 + $0x138] sm:$0xff] }
 0x2f5   : > { %4004 = vmatprep.subr.mxu0 %v10113_v60  ;;  %4034 = vmatprep.subr.mxu1 %v10113_v60  ;;  %10330 = vst [vmem:[#allocation19_spill] sm:$0xff] %v9114_v29 }
 0x2f6   : > { %4005 = vmatpush2.msra.mxu0 %v9108_v9  ;;  %4035 = vmatpush1.msra.mxu1 %v9114_v29  ;;  %v2391_v9 = vmax.f32 %v2389_v24, 0.0  ;;  %v2617_v29 = vmax.f32 %v9118_v41, 0.0  ;;  %v9420_v24 = vld [vmem:[%s9898_s5 + $0xf0] sm:$0xff]  ;;  %v9429_v41 = vld [vmem:[%s9898_s5 + $0xe8] sm:$0xff] }
 0x2f7   : > { %4006 = vmatprep.subr.mxu0 %v10113_v60  ;;  %4036 = vmatprep.subr.mxu1 %v10113_v60 }
 0x2f8   : > { %4007 = vmatpush2.msra.mxu0 %v9125_v28  ;;  %4037 = vmatpush1.msra.mxu1 %v8280_v43 }
 0x2f9   : > { %4008 = vmatprep.subr.mxu0 %v10113_v60  ;;  %4038 = vmatprep.subr.mxu1 %v10113_v60 }
 0x2fa   : > { %4009 = vmatpush2.msra.mxu0 %v9134_v25  ;;  %4039 = vmatpush1.msra.mxu1 %v10306_v18 }
 0x2fb   : > { %4011 = vmatmul.mubr.f32.vlgmr.msra.gmra.mxu0 %v2391_v9  ;;  %4040 = vmatprep.subr.mxu1 %v10113_v60 }
 0x2fc   : > { %4089 = vmatprep.subr.mxu0 %v10113_v60  ;;  %4041 = vmatpush1.msra.mxu1 %v10307_v22  ;;  %v10333_v22 = vld [vmem:[#allocation33_spill] sm:$0xff] }
 0x2fd   : > { %4090 = vmatpush1.msra.mxu0 %v8701_v1  ;;  %5310 = vmatprep.mubr.msk.f32.mxu0 %vm3115_vm1, %v2617_v29 }
 0x2fe   : > { %4042 = vmatprep.subr.mxu1 %v10113_v60  ;;  %4091 = vmatprep.subr.mxu0 %v10113_v60 }
 0x2ff   : > { %4043 = vmatpush1.msra.mxu1 %v8313_v48  ;;  %4092 = vmatpush1.msra.mxu0 %v8713_v45 }
 0x300   : > { %4044 = vmatprep.subr.mxu1 %v10113_v60  ;;  %4093 = vmatprep.subr.mxu0 %v10113_v60 }
 0x301   : > { %4045 = vmatpush1.msra.mxu1 %v8322_v47  ;;  %4094 = vmatpush1.msra.mxu0 %v8722_v19 }
 0x302   : > { %4046 = vmatprep.subr.mxu1 %v10113_v60  ;;  %4095 = vmatprep.subr.mxu0 %v10113_v60 }
 0x303   : > { %4047 = vmatpush1.msra.mxu1 %v8331_v32  ;;  %4096 = vmatpush1.msra.mxu0 %v8731_v56  ;;  %v3425_v43 = vpop.f32.mrf.mxu0  ;;  %v10331_v32 = vmax.f32 %v8920_v44, 0.0  ;;  %v10339_v44 = vld [vmem:[#allocation13_spill] sm:$0xff] }
 0x304   : > { %4068 = vmatprep.subr.mxu1 %v10113_v60  ;;  %4097 = vmatprep.subr.mxu0 %v10113_v60  ;;  %v3426_v48 = vadd.f32 %v3425_v43, %v9026_v27 }
 0x305   : > { %4069 = vmatpush2.msra.mxu1 %v8340_v58  ;;  %4098 = vmatpush1.msra.mxu0 %v8742_v39  ;;  %v3427_v47 = vpop.f32.mrf.mxu0  ;;  %v2840_v58 = vadd.f32 %v8542_v7, %v7705_v38  ;;  %v10332_v7 = vld [vmem:[#allocation27_spill] sm:$0xff] }
 0x306   : > { %4070 = vmatprep.subr.mxu1 %v10113_v60  ;;  %4099 = vmatprep.subr.mxu0 %v10113_v60  ;;  %v9481_v47 = vld [vmem:[%s9898_s5 + $0xb8] sm:$0xff] }
 0x307   : > { %4071 = vmatpush2.msra.mxu1 %v10280_v42  ;;  %4100 = vmatpush1.msra.mxu0 %v8751_v11  ;;  %v9228_v42 = vadd.f32 %v10332_v7, %v7948_v16  ;;  %v9538_v7 = vld [vmem:[%s9898_s5 + $0x90] sm:$0xff] }
 0x308   : > { %4072 = vmatprep.subr.mxu1 %v10113_v60  ;;  %4101 = vmatprep.subr.mxu0 %v10113_v60 }
 0x309   : > { %4073 = vmatpush2.msra.mxu1 %v8360_v49  ;;  %4102 = vmatpush1.msra.mxu0 %v8762_v46  ;;  %v2616_v18 = vmax.f32 %v9228_v42, 0.0 }
 0x30a   : > { %4074 = vmatprep.subr.mxu1 %v10113_v60  ;;  %4103 = vmatprep.subr.mxu0 %v10113_v60 }
 0x30b   : > { %4075 = vmatpush2.msra.mxu1 %v8370_v21  ;;  %4104 = vmatpush1.msra.mxu0 %v8771_v3  ;;  %v2842_v21 = vmax.f32 %v2840_v58, 0.0  ;;  %v9496_v58 = vld [vmem:[%s9898_s5 + $0xb0] sm:$0xff] }
 0x30c   : > { %4076 = vmatprep.subr.mxu1 %v10113_v60  ;;  %4105 = vmatprep.subr.mxu0 %v10113_v60 }
 0x30d   : > { %4077 = vmatpush2.msra.mxu1 %v8383_v34  ;;  %4106 = vmatpush1.msra.mxu0 %v8781_v55 }
 0x30e   : > { %4078 = vmatprep.subr.mxu1 %v10113_v60  ;;  %4107 = vmatprep.subr.mxu0 %v10113_v60 }
 0x30f   : > { %4079 = vmatpush2.msra.mxu1 %v8393_v17  ;;  %4108 = vmatpush1.msra.mxu0 %v8790_v50 }
 0x310   : > { %4081 = vmatmul.mubr.f32.vlgmr.msra.gmra.mxu1 %v10331_v32  ;;  %4109 = vmatprep.subr.mxu0 %v10113_v60  ;;  %v9507_v32 = vld [vmem:[%s9898_s5 + $0xa8] sm:$0xff] }
 0x311   : > { %4165 = vmatprep.subr.mxu1 %v10113_v60  ;;  %4110 = vmatpush1.msra.mxu0 %v8800_v59 }
 0x312   : > { %4166 = vmatpush1.msra.mxu1 %v8825_v33  ;;  %5311 = vmatprep.mubr.msk.f32.mxu1 %vm3115_vm1, %v2842_v21  ;;  %v10334_v33 = vld [vmem:[#allocation37_spill] sm:$0xff] }
 0x313   : > { %4111 = vmatprep.subr.mxu0 %v10113_v60  ;;  %4167 = vmatprep.subr.mxu1 %v10113_v60 }
 0x314   : > { %4112 = vmatpush1.msra.mxu0 %v8809_v6  ;;  %4168 = vmatpush1.msra.mxu1 %v8840_v20 }
 0x315   : > { %4113 = vmatprep.subr.mxu0 %v10113_v60  ;;  %4169 = vmatprep.subr.mxu1 %v10113_v60 }
 0x316   : > { %4114 = vmatpush1.msra.mxu0 %v8819_v14  ;;  %4170 = vmatpush1.msra.mxu1 %v8854_v63  ;;  %v10335_v63 = vld [vmem:[#allocation38_spill] sm:$0xff] }
 0x317   : > { %4115 = vmatprep.subr.mxu0 %v10113_v60  ;;  %4171 = vmatprep.subr.mxu1 %v10113_v60 }
 0x318   : > { %4116 = vmatpush1.msra.mxu0 %v8834_v4  ;;  %4172 = vmatpush1.msra.mxu1 %v8868_v13  ;;  %v3498_v17 = vpop.f32.mrf.mxu1  ;;  %v10336_v13 = vld [vmem:[#allocation39_spill] sm:$0xff] }
 0x319   : > { %4117 = vmatprep.subr.mxu0 %v10113_v60  ;;  %4173 = vmatprep.subr.mxu1 %v10113_v60  ;;  %v9206_v49 = vadd.f32 %v3498_v17, %v3426_v48  ;;  %v9518_v17 = vld [vmem:[%s9898_s5 + $0xa0] sm:$0xff] }
 0x31a   : > { %4118 = vmatpush1.msra.mxu0 %v8848_v0  ;;  %4174 = vmatpush1.msra.mxu1 %v8887_v62  ;;  %v3500_v34 = vpop.f32.mrf.mxu1 }
 0x31b   : > { %4119 = vmatprep.subr.mxu0 %v10113_v60  ;;  %4175 = vmatprep.subr.mxu1 %v10113_v60 }
 0x31c   : > { %4120 = vmatpush1.msra.mxu0 %v8862_v8  ;;  %4176 = vmatpush1.msra.mxu1 %v8902_v40  ;;  %v10337_v40 = vld [vmem:[#allocation10_spill] sm:$0xff] }
 0x31d   : > { %4141 = vmatprep.subr.mxu0 %v10113_v60  ;;  %4177 = vmatprep.subr.mxu1 %v10113_v60 }
 0x31e   : > { %4142 = vmatpush2.msra.mxu0 %v8881_v10  ;;  %4178 = vmatpush1.msra.mxu1 %v8916_v26  ;;  %v10338_v26 = vld [vmem:[#allocation8_spill] sm:$0xff] }
 0x31f   : > { %4143 = vmatprep.subr.mxu0 %v10113_v60  ;;  %4179 = vmatprep.subr.mxu1 %v10113_v60 }
 0x320   : > { %4144 = vmatpush2.msra.mxu0 %v8896_v15  ;;  %4180 = vmatpush1.msra.mxu1 %v8933_v31  ;;  %v10340_v31 = vld [vmem:[#allocation42_spill] sm:$0xff] }
 0x321   : > { %4145 = vmatprep.subr.mxu0 %v10113_v60  ;;  %4181 = vmatprep.subr.mxu1 %v10113_v60 }
 0x322   : > { %4146 = vmatpush2.msra.mxu0 %v8910_v61  ;;  %4182 = vmatpush1.msra.mxu1 %v8947_v51  ;;  %v10341_v51 = vld [vmem:[#allocation34_spill] sm:$0xff] }
 0x323   : > { %4147 = vmatprep.subr.mxu0 %v10113_v60  ;;  %4183 = vmatprep.subr.mxu1 %v10113_v60 }
 0x324   : > { %4148 = vmatpush2.msra.mxu0 %v8927_v2  ;;  %4184 = vmatpush1.msra.mxu1 %v8962_v5  ;;  %v2839_v5 = vadd.f32 %v10341_v51, %v7948_v16 }
 0x325   : > { %4149 = vmatprep.subr.mxu0 %v10113_v60  ;;  %4185 = vmatprep.subr.mxu1 %v10113_v60 }
 0x326   : > { %4150 = vmatpush2.msra.mxu0 %v8941_v30  ;;  %4186 = vmatpush1.msra.mxu1 %v8972_v23  ;;  %v10342_v23 = vld [vmem:[#allocation15_spill] sm:$0xff] }
 0x327   : > { %4151 = vmatprep.subr.mxu0 %v10113_v60  ;;  %4187 = vmatprep.subr.mxu1 %v10113_v60 }
 0x328   : > { %4152 = vmatpush2.msra.mxu0 %v8956_v54  ;;  %4188 = vmatpush1.msra.mxu1 %v8989_v12  ;;  %v10344_v12 = vld [vmem:[#allocation31_spill] sm:$0xff] }
 0x329   : > { %4154 = vmatmul.mubr.f32.vlgmr.msra.gmra.mxu0 %v2616_v18  ;;  %4189 = vmatprep.subr.mxu1 %v10113_v60 }
 0x32a   : > { %4235 = vmatprep.subr.mxu0 %v10113_v60  ;;  %4190 = vmatpush1.msra.mxu1 %v9003_v37  ;;  %v10345_v37 = vld [vmem:[#allocation50_spill] sm:$0xff] }
 0x32b   : > { %4236 = vmatpush1.msra.mxu0 %v8978_v35  ;;  %5312 = vmatprep.mubr.msk.f32.mxu0 %vm3115_vm1, %v2617_v29  ;;  %v10343_v35 = vld [vmem:[#allocation17_spill] sm:$0xff] }
 0x32c   : > { %4191 = vmatprep.subr.mxu1 %v10113_v60  ;;  %4237 = vmatprep.subr.mxu0 %v10113_v60  ;;  %v5871_v29 = vld [vmem:[%s9896_s3 + $0xa0] sm:$0xff] }
 0x32d   : > { %4192 = vmatpush1.msra.mxu1 %v9017_v52  ;;  %4238 = vmatpush1.msra.mxu0 %v8995_v36  ;;  %v3065_v36 = vadd.f32 %v10344_v12, %v7705_v38  ;;  %v10346_v52 = vld [vmem:[#allocation19_spill] sm:$0xff]  ;;  %v5864_v38 = vld [vmem:[%s9896_s3 + $0x28] sm:$0xff] }
 0x32e   : > { %4193 = vmatprep.subr.mxu1 %v10113_v60  ;;  %4239 = vmatprep.subr.mxu0 %v10113_v60  ;;  %v9631_v12 = vld [vmem:[%s9898_s5 + $0x48] sm:$0xff] }
 0x32f   : > { %4194 = vmatpush1.msra.mxu1 %v9033_v53  ;;  %4240 = vmatpush1.msra.mxu0 %v9009_v57  ;;  %v2841_v57 = vmax.f32 %v2839_v5, 0.0  ;;  %v3067_v27 = vmax.f32 %v3065_v36, 0.0  ;;  %v5867_v53 = vld [vmem:[%s9896_s3 + $0x10] sm:$0xff]  ;;  %v9610_v5 = vld [vmem:[%s9898_s5 + $0x58] sm:$0xff]  ;;  %v9639_v36 = vld [vmem:[%s9898_s5 + $0x40] sm:$0xff] }
 0x330   : > { %4195 = vmatprep.subr.mxu1 %v10113_v60  ;;  %4241 = vmatprep.subr.mxu0 %v10113_v60 }
 0x331   : > { %4196 = vmatpush1.msra.mxu1 %v10333_v22  ;;  %4242 = vmatpush1.msra.mxu0 %v10334_v33  ;;  %v9264_v20 = vpop.f32.mrf.mxu0  ;;  %v9556_v22 = vld [vmem:[%s9898_s5 + $0x80] sm:$0xff]  ;;  %v9565_v33 = vld [vmem:[%s9898_s5 + $0x78] sm:$0xff] }
 0x332   : > { %4217 = vmatprep.subr.mxu1 %v10113_v60  ;;  %4243 = vmatprep.subr.mxu0 %v10113_v60 }
 0x333   : > { %4218 = vmatpush2.msra.mxu1 %v10335_v63  ;;  %4244 = vmatpush1.msra.mxu0 %v10336_v13  ;;  %v3576_v62 = vpop.f32.mrf.mxu0  ;;  %v9574_v63 = vld [vmem:[%s9898_s5 + $0x70] sm:$0xff] }
 0x334   : > { %4219 = vmatprep.subr.mxu1 %v10113_v60  ;;  %4245 = vmatprep.subr.mxu0 %v10113_v60  ;;  %v10348_v62 = vld [vmem:[#allocation32_spill] sm:$0xff] }
 0x335   : > { %4220 = vmatpush2.msra.mxu1 %v10337_v40  ;;  %4246 = vmatpush1.msra.mxu0 %v10338_v26  ;;  %v9587_v26 = vld [vmem:[%s9898_s5 + $0x68] sm:$0xff] }
 0x336   : > { %4221 = vmatprep.subr.mxu1 %v10113_v60  ;;  %4247 = vmatprep.subr.mxu0 %v10113_v60 }
 0x337   : > { %4222 = vmatpush2.msra.mxu1 %v10339_v44  ;;  %4248 = vmatpush1.msra.mxu0 %v10340_v31 }
 0x338   : > { %4223 = vmatprep.subr.mxu1 %v10113_v60  ;;  %4249 = vmatprep.subr.mxu0 %v10113_v60 }
 0x339   : > { %4224 = vmatpush2.msra.mxu1 %v10342_v23  ;;  %4250 = vmatpush1.msra.mxu0 %v10343_v35  ;;  %v9621_v23 = vld [vmem:[%s9898_s5 + $0x50] sm:$0xff] }
 0x33a   : > { %4225 = vmatprep.subr.mxu1 %v10113_v60  ;;  %4251 = vmatprep.subr.mxu0 %v10113_v60 }
 0x33b   : > { %4226 = vmatpush2.msra.mxu1 %v9125_v28  ;;  %4252 = vmatpush1.msra.mxu0 %v10345_v37  ;;  %v5865_v28 = vld [vmem:[%s9896_s3 + $0x20] sm:$0xff]  ;;  %v9648_v37 = vld [vmem:[%s9898_s5 + $0x38] sm:$0xff] }
 0x33c   : > { %4227 = vmatprep.subr.mxu1 %v10113_v60  ;;  %4253 = vmatprep.subr.mxu0 %v10113_v60 }
 0x33d   : > { %4228 = vmatpush2.msra.mxu1 %v9134_v25  ;;  %4254 = vmatpush1.msra.mxu0 %v10346_v52  ;;  %v9657_v52 = vld [vmem:[%s9898_s5 + $0x30] sm:$0xff] }
 0x33e   : > { %4230 = vmatmul.mubr.f32.vlgmr.msra.gmra.mxu1 %v2841_v57  ;;  %4255 = vmatprep.subr.mxu0 %v10113_v60 }
 0x33f   : > { %4308 = vmatprep.subr.mxu1 %v10113_v60  ;;  %4256 = vmatpush1.msra.mxu0 %v5864_v38  ;;  %v9667_v38 = vld [vmem:[%s9898_s5 + $0x28] sm:$0xff] }
 0x340   : > { %4309 = vmatpush1.msra.mxu1 %v8701_v1  ;;  %5313 = vmatprep.mubr.msk.f32.mxu1 %vm3115_vm1, %v3067_v27  ;;  %v5866_v1 = vld [vmem:[%s9896_s3 + $0x18] sm:$0xff] }
 0x341   : > { %4257 = vmatprep.subr.mxu0 %v10113_v60  ;;  %4310 = vmatprep.subr.mxu1 %v10113_v60 }
 0x342   : > { %4258 = vmatpush1.msra.mxu0 %v5865_v28  ;;  %4311 = vmatpush1.msra.mxu1 %v8713_v45  ;;  %v9676_v28 = vld [vmem:[%s9898_s5 + $0x20] sm:$0xff] }
 0x343   : > { %4259 = vmatprep.subr.mxu0 %v10113_v60  ;;  %4312 = vmatprep.subr.mxu1 %v10113_v60 }
 0x344   : > { %4260 = vmatpush1.msra.mxu0 %v5866_v1  ;;  %4313 = vmatpush1.msra.mxu1 %v8722_v19  ;;  %v5868_v19 = vld [vmem:[%s9896_s3 + $0x8] sm:$0xff]  ;;  %v9685_v1 = vld [vmem:[%s9898_s5 + $0x18] sm:$0xff] }
 0x345   : > { %4261 = vmatprep.subr.mxu0 %v10113_v60  ;;  %4314 = vmatprep.subr.mxu1 %v10113_v60 }
 0x346   : > { %4262 = vmatpush1.msra.mxu0 %v5867_v53  ;;  %4315 = vmatpush1.msra.mxu1 %v8731_v56  ;;  %v9319_v45 = vpop.f32.mrf.mxu1  ;;  %v5869_v56 = vld [vmem:[%s9896_s3] sm:$0xff]  ;;  %v9694_v53 = vld [vmem:[%s9898_s5 + $0x10] sm:$0xff] }
 0x347   : > { %4263 = vmatprep.subr.mxu0 %v10113_v60  ;;  %4316 = vmatprep.subr.mxu1 %v10113_v60  ;;  %v3645_v13 = vadd.f32 %v9319_v45, %v9264_v20  ;;  %v9597_v20 = vld [vmem:[%s9898_s5 + $0x60] sm:$0xff]  ;;  %v9703_v45 = vld [vmem:[%s9898_s5 + $0x8] sm:$0xff] }
 0x348   : > { %4264 = vmatpush1.msra.mxu0 %v5868_v19  ;;  %4317 = vmatpush1.msra.mxu1 %v8742_v39  ;;  %v3646_v9 = vpop.f32.mrf.mxu1  ;;  %v5870_v39 = vld [vmem:[%s9896_s3 + $0xa8] sm:$0xff]  ;;  %v9712_v19 = vld [vmem:[%s9898_s5] sm:$0xff] }
 0x349   : > { %4265 = vmatprep.subr.mxu0 %v10113_v60  ;;  %4318 = vmatprep.subr.mxu1 %v10113_v60 }
 0x34a   : > { %4266 = vmatpush1.msra.mxu0 %v5869_v56  ;;  %4319 = vmatpush1.msra.mxu1 %v8751_v11  ;;  %v5872_v11 = vld [vmem:[%s9896_s3 + $0x98] sm:$0xff] }
 0x34b   : > { %4287 = vmatprep.subr.mxu0 %v10113_v60  ;;  %4320 = vmatprep.subr.mxu1 %v10113_v60 }
 0x34c   : > { %4288 = vmatpush2.msra.mxu0 %v5870_v39  ;;  %4321 = vmatpush1.msra.mxu1 %v8762_v46  ;;  %v5873_v46 = vld [vmem:[%s9896_s3 + $0x90] sm:$0xff] }
 0x34d   : > { %4289 = vmatprep.subr.mxu0 %v10113_v60  ;;  %4322 = vmatprep.subr.mxu1 %v10113_v60 }
 0x34e   : > { %4290 = vmatpush2.msra.mxu0 %v5871_v29  ;;  %4323 = vmatpush1.msra.mxu1 %v8771_v3  ;;  %v5874_v3 = vld [vmem:[%s9896_s3 + $0x88] sm:$0xff] }
 0x34f   : > { %4291 = vmatprep.subr.mxu0 %v10113_v60  ;;  %4324 = vmatprep.subr.mxu1 %v10113_v60 }
 0x350   : > { %4292 = vmatpush2.msra.mxu0 %v5872_v11  ;;  %4325 = vmatpush1.msra.mxu1 %v8781_v55  ;;  %v5875_v55 = vld [vmem:[%s9896_s3 + $0x80] sm:$0xff] }
 0x351   : > { %4293 = vmatprep.subr.mxu0 %v10113_v60  ;;  %4326 = vmatprep.subr.mxu1 %v10113_v60 }
 0x352   : > { %4294 = vmatpush2.msra.mxu0 %v5873_v46  ;;  %4327 = vmatpush1.msra.mxu1 %v8790_v50  ;;  %v9372_v50 = vld [vmem:[%s9898_s5 + $0x118] sm:$0xff] }
 0x353   : > { %4295 = vmatprep.subr.mxu0 %v10113_v60  ;;  %4328 = vmatprep.subr.mxu1 %v10113_v60 }
 0x354   : > { %4296 = vmatpush2.msra.mxu0 %v5874_v3  ;;  %4329 = vmatpush1.msra.mxu1 %v8800_v59  ;;  %v9382_v59 = vld [vmem:[%s9898_s5 + $0x110] sm:$0xff] }
 0x355   : > { %4297 = vmatprep.subr.mxu0 %v10113_v60  ;;  %4330 = vmatprep.subr.mxu1 %v10113_v60 }
 0x356   : > { %4298 = vmatpush2.msra.mxu0 %v5875_v55  ;;  %4331 = vmatpush1.msra.mxu1 %v8809_v6  ;;  %v9391_v6 = vld [vmem:[%s9898_s5 + $0x108] sm:$0xff] }
 0x357   : > { %4300 = vmatmul.mubr.f32.vlgmr.msra.gmra.mxu0 %v2616_v18  ;;  %4332 = vmatprep.subr.mxu1 %v10113_v60  ;;  %v9547_v18 = vld [vmem:[%s9898_s5 + $0x88] sm:$0xff] }
 0x358   : > { %5464 = vmatprep.subr.mxu0 %v10113_v60  ;;  %4333 = vmatpush1.msra.mxu1 %v8819_v14  ;;  %v9400_v14 = vld [vmem:[%s9898_s5 + $0x100] sm:$0xff] }
 0x359   : > { %5465 = vmatpush3.msra.mxu0 %v9372_v50  ;;  %4334 = vmatprep.subr.mxu1 %v10113_v60 }
 0x35a   : > { %5466 = vmatprep.subr.mxu0 %v10113_v60  ;;  %4335 = vmatpush1.msra.mxu1 %v8834_v4  ;;  %v9409_v4 = vld [vmem:[%s9898_s5 + $0xf8] sm:$0xff] }
 0x35b   : > { %5467 = vmatpush3.msra.mxu0 %v9382_v59  ;;  %4336 = vmatprep.subr.mxu1 %v10113_v60 }
 0x35c   : > { %5468 = vmatprep.subr.mxu0 %v10113_v60  ;;  %4337 = vmatpush1.msra.mxu1 %v8848_v0 }
 0x35d   : > { %5469 = vmatpush3.msra.mxu0 %v9391_v6  ;;  %4338 = vmatprep.subr.mxu1 %v10113_v60 }
 0x35e   : > { %5470 = vmatprep.subr.mxu0 %v10113_v60  ;;  %4339 = vmatpush1.msra.mxu1 %v8862_v8 }
 0x35f   : > { %5471 = vmatpush3.msra.mxu0 %v9400_v14  ;;  %4360 = vmatprep.subr.mxu1 %v10113_v60  ;;  %v9413_v0 = vpop.f32.mrf.mxu0 }
 0x360   : > { %5472 = vmatprep.subr.mxu0 %v10113_v60  ;;  %4361 = vmatpush2.msra.mxu1 %v8881_v10  ;;  %v9438_v10 = vld [vmem:[%s9898_s5 + $0xe0] sm:$0xff]  ;;  %v3721_v44 = vadd.f32 %v9413_v0, %v3645_v13 }
 0x361   : > { %5473 = vmatpush3.msra.mxu0 %v9409_v4  ;;  %4362 = vmatprep.subr.mxu1 %v10113_v60  ;;  %v3719_v8 = vpop.f32.mrf.mxu0 }
 0x362   : > { %5474 = vmatprep.subr.mxu0 %v10113_v60  ;;  %4363 = vmatpush2.msra.mxu1 %v8896_v15  ;;  %v10347_v15 = vld [vmem:[#allocation29_spill] sm:$0xff] }
 0x363   : > { %5475 = vmatpush3.msra.mxu0 %v9420_v24  ;;  %4364 = vmatprep.subr.mxu1 %v10113_v60  ;;  %v3064_v25 = vadd.f32 %v10347_v15, %v7948_v16  ;;  %v9458_v16 = vld [vmem:[%s9898_s5 + $0xd0] sm:$0xff] }
 0x364   : > { %5476 = vmatprep.subr.mxu0 %v10113_v60  ;;  %4365 = vmatpush2.msra.mxu1 %v8910_v61  ;;  %v9449_v61 = vld [vmem:[%s9898_s5 + $0xd8] sm:$0xff] }
 0x365   : > { %5477 = vmatpush3.msra.mxu0 %v9429_v41  ;;  %4366 = vmatprep.subr.mxu1 %v10113_v60  ;;  %v3066_v43 = vmax.f32 %v3064_v25, 0.0 }
 0x366   : > { %5478 = vmatprep.subr.mxu0 %v10113_v60  ;;  %4367 = vmatpush2.msra.mxu1 %v8927_v2  ;;  %v9463_v2 = vld [vmem:[%s9897_s4] sm:$0x1] }
 0x367   : > { %5479 = vmatpush3.msra.mxu0 %v9438_v10  ;;  %4368 = vmatprep.subr.mxu1 %v10113_v60  ;;  %v9469_v48 = vadd.f32 %v9206_v49, %v9463_v2  ;;  %v9527_v49 = vld [vmem:[%s9898_s5 + $0x98] sm:$0xff]  ;;  %v3262_v40 = vadd.f32 %v10348_v62, %v9463_v2  ;;  %v3722_v51 = vadd.f32 %v3721_v44, %v9463_v2 }
 0x368   : > { %5480 = vmatprep.subr.mxu0 %v10113_v60  ;;  %4369 = vmatpush2.msra.mxu1 %v8941_v30  ;;  %v9476_v30 = vld [vmem:[%s9898_s5 + $0xc8] sm:$0xff] }
 0x369   : > { %5481 = vmatpush3.msra.mxu0 %v9449_v61  ;;  %4370 = vmatprep.subr.mxu1 %v10113_v60  ;;  %v3504_v21 = vmax.f32 %v9469_v48, 0.0  ;;  %v3263_v31 = vmax.f32 %v3262_v40, 0.0  ;;  %v3723_v35 = vmax.f32 %v3722_v51, 0.0  ;;  %v5012_v51 = vld [vmem:[%s9900_s7 + $0x20] sm:$0xff] }
 0x36a   : > { %5482 = vmatprep.subr.mxu0 %v10113_v60  ;;  %4371 = vmatpush2.msra.mxu1 %v8956_v54  ;;  %v9489_v54 = vld [vmem:[%s9898_s5 + $0xc0] sm:$0xff] }
 0x36b   : > { %5483 = vmatpush3.msra.mxu0 %v9458_v16  ;;  %4373 = vmatmul.mubr.f32.vlgmr.msra.gmra.mxu1 %v3066_v43 }
 0x36c   : > { %5484 = vmatprep.subr.mxu0 %v10113_v60  ;;  %5491 = vmatprep.subr.mxu1 %v10113_v60 }
 0x36d   : > { %5485 = vmatpush3.msra.mxu0 %v9476_v30  ;;  %5492 = vmatpush3.msra.mxu1 %v9481_v47 }
 0x36e   : > { %5486 = vmatprep.subr.mxu0 %v10113_v60  ;;  %5493 = vmatprep.subr.mxu1 %v10113_v60 }
 0x36f   : > { %5487 = vmatpush3.msra.mxu0 %v9489_v54  ;;  %5488 = vmatprep.mubr.msk.f32.mxu0 %vm5939_vm2, %v10113_v60 }
 0x370   : > { %5494 = vmatpush3.msra.mxu1 %v9496_v58  ;;  %5489 = vmatmul.mubr.msk.f32.vlgmr.msra.gmra.mxu0 %vm405_vm0, %v3504_v21 }
 0x371   : > { %5495 = vmatprep.subr.mxu1 %v10113_v60  ;;  %5518 = vmatprep.subr.mxu0 %v10113_v60 }
 0x372   : > { %5496 = vmatpush3.msra.mxu1 %v9507_v32  ;;  %5519 = vmatpush3.msra.mxu0 %v9481_v47 }
 0x373   : > { %5497 = vmatprep.subr.mxu1 %v10113_v60  ;;  %5520 = vmatprep.subr.mxu0 %v10113_v60 }
 0x374   : > { %5498 = vmatpush3.msra.mxu1 %v9518_v17  ;;  %5521 = vmatpush3.msra.mxu0 %v9496_v58  ;;  %v9531_v34 = vpop.f32.mrf.mxu1 }
 0x375   : > { %5499 = vmatprep.subr.mxu1 %v10113_v60  ;;  %5522 = vmatprep.subr.mxu0 %v10113_v60 }
 0x376   : > { %5500 = vmatpush3.msra.mxu1 %v9527_v49  ;;  %5523 = vmatpush3.msra.mxu0 %v9507_v32  ;;  %v3795_v42 = vpop.f32.mrf.mxu1 }
 0x377   : > { %5501 = vmatprep.subr.mxu1 %v10113_v60  ;;  %5524 = vmatprep.subr.mxu0 %v10113_v60 }
 0x378   : > { %5502 = vmatpush3.msra.mxu1 %v9538_v7  ;;  %5525 = vmatpush3.msra.mxu0 %v9518_v17 }
 0x379   : > { %5503 = vmatprep.subr.mxu1 %v10113_v60  ;;  %5526 = vmatprep.subr.mxu0 %v10113_v60 }
 0x37a   : > { %5504 = vmatpush3.msra.mxu1 %v9547_v18  ;;  %5527 = vmatpush3.msra.mxu0 %v9527_v49 }
 0x37b   : > { %5505 = vmatprep.subr.mxu1 %v10113_v60  ;;  %5528 = vmatprep.subr.mxu0 %v10113_v60 }
 0x37c   : > { %5506 = vmatpush3.msra.mxu1 %v9556_v22  ;;  %5529 = vmatpush3.msra.mxu0 %v9538_v7 }
 0x37d   : > { %5507 = vmatprep.subr.mxu1 %v10113_v60  ;;  %5530 = vmatprep.subr.mxu0 %v10113_v60 }
 0x37e   : > { %5508 = vmatpush3.msra.mxu1 %v9565_v33  ;;  %5531 = vmatpush3.msra.mxu0 %v9547_v18 }
 0x37f   : > { %5509 = vmatprep.subr.mxu1 %v10113_v60  ;;  %5532 = vmatprep.subr.mxu0 %v10113_v60 }
 0x380   : > { %5510 = vmatpush3.msra.mxu1 %v9574_v63  ;;  %5533 = vmatpush3.msra.mxu0 %v9556_v22 }
 0x381   : > { %5511 = vmatprep.subr.mxu1 %v10113_v60  ;;  %5534 = vmatprep.subr.mxu0 %v10113_v60 }
 0x382   : > { %5512 = vmatpush3.msra.mxu1 %v9587_v26  ;;  %5535 = vmatpush3.msra.mxu0 %v9565_v33 }
 0x383   : > { %5513 = vmatprep.subr.mxu1 %v10113_v60  ;;  %5536 = vmatprep.subr.mxu0 %v10113_v60 }
 0x384   : > { %5514 = vmatpush3.msra.mxu1 %v9597_v20  ;;  %5515 = vmatprep.mubr.msk.f32.mxu1 %vm5939_vm2, %v10113_v60 }
 0x385   : > { %5537 = vmatpush3.msra.mxu0 %v9574_v63  ;;  %5516 = vmatmul.mubr.msk.f32.vlgmr.msra.gmra.mxu1 %vm405_vm0, %v3263_v31 }
 0x386   : > { %5538 = vmatprep.subr.mxu0 %v10113_v60  ;;  %5545 = vmatprep.subr.mxu1 %v10113_v60 }
 0x387   : > { %5539 = vmatpush3.msra.mxu0 %v9587_v26  ;;  %5546 = vmatpush3.msra.mxu1 %v9610_v5 }
 0x388   : > { %5540 = vmatprep.subr.mxu0 %v10113_v60  ;;  %5547 = vmatprep.subr.mxu1 %v10113_v60 }
 0x389   : > { %5541 = vmatpush3.msra.mxu0 %v9597_v20  ;;  %5542 = vmatprep.mubr.msk.f32.mxu0 %vm5939_vm2, %v10113_v60 }
 0x38a   : > { %5548 = vmatpush3.msra.mxu1 %v9621_v23  ;;  %5543 = vmatmul.mubr.msk.f32.vlgmr.msra.gmra.mxu0 %vm405_vm0, %v3723_v35  ;;  %v5009_v35 = vld [vmem:[%s9900_s7 + $0x8] sm:$0xff] }
 0x38b   : > { %5549 = vmatprep.subr.mxu1 %v10113_v60  ;;  %5572 = vmatprep.subr.mxu0 %v10113_v60 }
 0x38c   : > { %5550 = vmatpush3.msra.mxu1 %v9631_v12  ;;  %5573 = vmatpush3.msra.mxu0 %v9372_v50 }
 0x38d   : > { %5551 = vmatprep.subr.mxu1 %v10113_v60  ;;  %v3863_v57 = vpop.f32.mrf.mxu0  ;;  %5574 = vmatprep.subr.mxu0 %v10113_v60 }
 0x38e   : > { %5552 = vmatpush3.msra.mxu1 %v9639_v36  ;;  %5575 = vmatpush3.msra.mxu0 %v9382_v59  ;;  %v3864_v9 = vadd.f32 %v3863_v57, %v9531_v34 }
 0x38f   : > { %5553 = vmatprep.subr.mxu1 %v10113_v60  ;;  %v3865_v27 = vpop.f32.mrf.mxu0  ;;  %5576 = vmatprep.subr.mxu0 %v10113_v60 }
 0x390   : > { %5554 = vmatpush3.msra.mxu1 %v9648_v37  ;;  %5569 = vmatprep.mubr.msk.f32.mxu1 %vm5939_vm2, %v10113_v60 }
 0x391   : > { %5555 = vmatprep.subr.mxu1 %v10113_v60  ;;  %5577 = vmatpush3.msra.mxu0 %v9391_v6 }
 0x392   : > { %5556 = vmatpush3.msra.mxu1 %v9657_v52  ;;  %5578 = vmatprep.subr.mxu0 %v10113_v60 }
 0x393   : > { %5557 = vmatprep.subr.mxu1 %v10113_v60  ;;  %5579 = vmatpush3.msra.mxu0 %v9400_v14 }
 0x394   : > { %5558 = vmatpush3.msra.mxu1 %v9667_v38  ;;  %5580 = vmatprep.subr.mxu0 %v10113_v60 }
 0x395   : > { %5559 = vmatprep.subr.mxu1 %v10113_v60  ;;  %5581 = vmatpush3.msra.mxu0 %v9409_v4 }
 0x396   : > { %5560 = vmatpush3.msra.mxu1 %v9676_v28  ;;  %5582 = vmatprep.subr.mxu0 %v10113_v60 }
 0x397   : > { %5561 = vmatprep.subr.mxu1 %v10113_v60  ;;  %5583 = vmatpush3.msra.mxu0 %v9420_v24 }
 0x398   : > { %5562 = vmatpush3.msra.mxu1 %v9685_v1  ;;  %5584 = vmatprep.subr.mxu0 %v10113_v60 }
 0x399   : > { %5563 = vmatprep.subr.mxu1 %v10113_v60  ;;  %5585 = vmatpush3.msra.mxu0 %v9429_v41 }
 0x39a   : > { %5564 = vmatpush3.msra.mxu1 %v9694_v53  ;;  %5586 = vmatprep.subr.mxu0 %v10113_v60 }
 0x39b   : > { %5565 = vmatprep.subr.mxu1 %v10113_v60  ;;  %5587 = vmatpush3.msra.mxu0 %v9438_v10 }
 0x39c   : > { %5566 = vmatpush3.msra.mxu1 %v9703_v45  ;;  %5588 = vmatprep.subr.mxu0 %v10113_v60 }
 0x39d   : > { %5567 = vmatprep.subr.mxu1 %v10113_v60  ;;  %5589 = vmatpush3.msra.mxu0 %v9449_v61 }
 0x39e   : > { %5568 = vmatpush3.msra.mxu1 %v9712_v19  ;;  %5590 = vmatprep.subr.mxu0 %v10113_v60 }
 0x39f   : > { %5570 = vmatmul.mubr.msk.f32.vlgmr.msra.gmra.mxu1 %vm405_vm0, %v3504_v21  ;;  %5591 = vmatpush3.msra.mxu0 %v9458_v16 }
 0x3a0   : > { %5592 = vmatprep.subr.mxu0 %v10113_v60  ;;  %5596 = vmatprep.mubr.msk.f32.mxu0 %vm5939_vm2, %v10113_v60 }
 0x3a1   : > { %5593 = vmatpush3.msra.mxu0 %v9476_v30  ;;  %5599 = vmatprep.subr.mxu1 %v10113_v60 }
 0x3a2   : > { %v3936_v56 = vpop.f32.mrf.mxu1  ;;  %5594 = vmatprep.subr.mxu0 %v10113_v60  ;;  %5600 = vmatpush3.msra.mxu1 %v9481_v47 }
 0x3a3   : > { %v3940_v39 = vadd.f32 %v3936_v56, %v3864_v9  ;;  %5595 = vmatpush3.msra.mxu0 %v9489_v54  ;;  %5601 = vmatprep.subr.mxu1 %v10113_v60 }
 0x3a4   : > { %v3938_v29 = vpop.f32.mrf.mxu1  ;;  %5626 = vmatprep.subr.mxu0 %v10113_v60  ;;  %5602 = vmatpush3.msra.mxu1 %v9496_v58 }
 0x3a5   : > { %v3941_v11 = vadd.f32 %v3940_v39, %v9463_v2  ;;  %5603 = vmatprep.subr.mxu1 %v10113_v60  ;;  %5623 = vmatprep.mubr.msk.f32.mxu1 %vm5939_vm2, %v10113_v60 }
 0x3a6   : > { %5604 = vmatpush3.msra.mxu1 %v9507_v32 }
 0x3a7   : > { %v3942_v46 = vmax.f32 %v3941_v11, 0.0  ;;  %5605 = vmatprep.subr.mxu1 %v10113_v60 }
 0x3a8   : > { %5606 = vmatpush3.msra.mxu1 %v9518_v17 }
 0x3a9   : > { %5597 = vmatmul.mubr.msk.f32.vlgmr.msra.gmra.mxu0 %vm405_vm0, %v3942_v46  ;;  %5607 = vmatprep.subr.mxu1 %v10113_v60 }
 0x3aa   : > { %5627 = vmatpush3.msra.mxu0 %v9610_v5  ;;  %5650 = vmatprep.mubr.msk.f32.mxu0 %vm5939_vm2, %v10113_v60  ;;  %v5011_v5 = vld [vmem:[%s9900_s7 + $0x18] sm:$0xff] }
 0x3ab   : > { %5628 = vmatprep.subr.mxu0 %v10113_v60  ;;  %5608 = vmatpush3.msra.mxu1 %v9527_v49 }
 0x3ac   : > { %5629 = vmatpush3.msra.mxu0 %v9621_v23  ;;  %5609 = vmatprep.subr.mxu1 %v10113_v60  ;;  %v5010_v23 = vld [vmem:[%s9900_s7 + $0x10] sm:$0xff] }
 0x3ad   : > { %5630 = vmatprep.subr.mxu0 %v10113_v60  ;;  %5610 = vmatpush3.msra.mxu1 %v9538_v7 }
 0x3ae   : > { %5631 = vmatpush3.msra.mxu0 %v9631_v12  ;;  %5611 = vmatprep.subr.mxu1 %v10113_v60  ;;  %v5008_v12 = vld [vmem:[%s9900_s7] sm:$0xff] }
 0x3af   : > { %5632 = vmatprep.subr.mxu0 %v10113_v60  ;;  %5612 = vmatpush3.msra.mxu1 %v9547_v18 }
 0x3b0   : > { %5633 = vmatpush3.msra.mxu0 %v9639_v36  ;;  %5613 = vmatprep.subr.mxu1 %v10113_v60 }
 0x3b1   : > { %5634 = vmatprep.subr.mxu0 %v10113_v60  ;;  %5614 = vmatpush3.msra.mxu1 %v9556_v22 }
 0x3b2   : > { %5635 = vmatpush3.msra.mxu0 %v9648_v37  ;;  %5615 = vmatprep.subr.mxu1 %v10113_v60 }
 0x3b3   : > { %5636 = vmatprep.subr.mxu0 %v10113_v60  ;;  %5616 = vmatpush3.msra.mxu1 %v9565_v33  ;;  %v4381_v33 = vld [vmem:[%s9899_s6] sm:$0x1] }
 0x3b4   : > { %5637 = vmatpush3.msra.mxu0 %v9657_v52  ;;  %5617 = vmatprep.subr.mxu1 %v10113_v60 }
 0x3b5   : > { %5638 = vmatprep.subr.mxu0 %v10113_v60  ;;  %5618 = vmatpush3.msra.mxu1 %v9574_v63 }
 0x3b6   : > { %5639 = vmatpush3.msra.mxu0 %v9667_v38  ;;  %5619 = vmatprep.subr.mxu1 %v10113_v60 }
 0x3b7   : > { %5640 = vmatprep.subr.mxu0 %v10113_v60  ;;  %5620 = vmatpush3.msra.mxu1 %v9587_v26 }
 0x3b8   : > { %5641 = vmatpush3.msra.mxu0 %v9676_v28  ;;  %5621 = vmatprep.subr.mxu1 %v10113_v60 }
 0x3b9   : > { %5642 = vmatprep.subr.mxu0 %v10113_v60  ;;  %5622 = vmatpush3.msra.mxu1 %v9597_v20 }
 0x3ba   : > { %5643 = vmatpush3.msra.mxu0 %v9685_v1  ;;  %5653 = vmatprep.subr.mxu1 %v10113_v60 }
 0x3bb   : > { %v4012_v3 = vpop.f32.mrf.mxu0  ;;  %5644 = vmatprep.subr.mxu0 %v10113_v60 }
 0x3bc   : > { %5645 = vmatpush3.msra.mxu0 %v9694_v53 }
 0x3bd   : > { %v4014_v55 = vpop.f32.mrf.mxu0  ;;  %5646 = vmatprep.subr.mxu0 %v10113_v60 }
 0x3be   : > { %5647 = vmatpush3.msra.mxu0 %v9703_v45 }
 0x3bf   : > { %5648 = vmatprep.subr.mxu0 %v10113_v60 }
 0x3c0   : > { %5649 = vmatpush3.msra.mxu0 %v9712_v19 }
 0x3c1   : > { %5651 = vmatmul.mubr.msk.f32.vlgmr.msra.gmra.mxu0 %vm405_vm0, %v3942_v46  ;;  %5680 = vmatprep.subr.mxu0 %v10113_v60 }
 0x3c2   : > { %5694 = vmatprep.mubr.msk.f32.mxu0 %vm5939_vm2, %v10113_v60 }
 0x3d0   : > { %v4082_v0 = vpop.f32.mrf.mxu1 }
 0x3d1   : > { %v4083_v15 = vadd.f32 %v4082_v0, %v4012_v3 }
 0x3d2   : > { %v4084_v8 = vpop.f32.mrf.mxu1 }
 0x3e9   : > { %v4155_v25 = vpop.f32.mrf.mxu0 }
 0x3ea   : > { %v4159_v43 = vadd.f32 %v4155_v25, %v4083_v15 }
 0x3eb   : > { %v4157_v48 = vpop.f32.mrf.mxu0 }
 0x3ec   : > { %v4160_v47 = vadd.f32 %v4159_v43, %v9463_v2 }
 0x3ee   : > { %v4161_v58 = vmax.f32 %v4160_v47, 0.0 }
 0x3f0   : > { %5624 = vmatmul.mubr.msk.f32.vlgmr.msra.gmra.mxu1 %vm405_vm0, %v4161_v58 }
 0x3f1   : > { %5654 = vmatpush3.msra.mxu1 %v9372_v50  ;;  %5677 = vmatprep.mubr.msk.f32.mxu1 %vm5939_vm2, %v10113_v60 }
 0x3f2   : > { %5655 = vmatprep.subr.mxu1 %v10113_v60 }
 0x3f3   : > { %5656 = vmatpush3.msra.mxu1 %v9382_v59 }
 0x3f4   : > { %5657 = vmatprep.subr.mxu1 %v10113_v60 }
 0x3f5   : > { %5658 = vmatpush3.msra.mxu1 %v9391_v6 }
 0x3f6   : > { %5659 = vmatprep.subr.mxu1 %v10113_v60 }
 0x3f7   : > { %5660 = vmatpush3.msra.mxu1 %v9400_v14 }
 0x3f8   : > { %5661 = vmatprep.subr.mxu1 %v10113_v60 }
 0x3f9   : > { %5662 = vmatpush3.msra.mxu1 %v9409_v4 }
 0x3fa   : > { %5663 = vmatprep.subr.mxu1 %v10113_v60 }
 0x3fb   : > { %5664 = vmatpush3.msra.mxu1 %v9420_v24 }
 0x3fc   : > { %5665 = vmatprep.subr.mxu1 %v10113_v60 }
 0x3fd   : > { %5666 = vmatpush3.msra.mxu1 %v9429_v41 }
 0x3fe   : > { %v4231_v50 = vpop.f32.mrf.mxu1  ;;  %5667 = vmatprep.subr.mxu1 %v10113_v60 }
 0x3ff   : > { %5668 = vmatpush3.msra.mxu1 %v9438_v10 }
 0x400   : > { %v4233_v59 = vpop.f32.mrf.mxu1  ;;  %5669 = vmatprep.subr.mxu1 %v10113_v60 }
 0x401   : > { %5670 = vmatpush3.msra.mxu1 %v9449_v61 }
 0x402   : > { %5671 = vmatprep.subr.mxu1 %v10113_v60 }
 0x403   : > { %5672 = vmatpush3.msra.mxu1 %v9458_v16  ;;  %v5014_v16 = vld [vmem:[%s9900_s7 + $0x30] sm:$0x3f] }
 0x404   : > { %5673 = vmatprep.subr.mxu1 %v10113_v60  ;;  %5681 = vmatpush3.msk.msra.mxu0 %vm5020_vm3, %v5014_v16 }
 0x405   : > { %5674 = vmatpush3.msra.mxu1 %v9476_v30  ;;  %v5013_v30 = vld [vmem:[%s9900_s7 + $0x28] sm:$0xff]  ;;  %5682 = vmatprep.subr.mxu0 %v10113_v60 }
 0x406   : > { %5675 = vmatprep.subr.mxu1 %v10113_v60  ;;  %5683 = vmatpush3.msra.mxu0 %v5013_v30 }
 0x407   : > { %5676 = vmatpush3.msra.mxu1 %v9489_v54  ;;  %5684 = vmatprep.subr.mxu0 %v10113_v60 }
 0x408   : > { %5685 = vmatpush3.msra.mxu0 %v5012_v51 }
 0x409   : > { %5686 = vmatprep.subr.mxu0 %v10113_v60 }
 0x40a   : > { %5687 = vmatpush3.msra.mxu0 %v5011_v5 }
 0x40b   : > { %5688 = vmatprep.subr.mxu0 %v10113_v60 }
 0x40c   : > { %5689 = vmatpush3.msra.mxu0 %v5010_v23 }
 0x40d   : > { %5690 = vmatprep.subr.mxu0 %v10113_v60 }
 0x40e   : > { %5691 = vmatpush3.msra.mxu0 %v5009_v35 }
 0x40f   : > { %5692 = vmatprep.subr.mxu0 %v10113_v60  ;;  %v5015_v60 = vld [vmem:[%s9901_s8] sm:$0x1] }
 0x410   : > { %5693 = vmatpush3.msra.mxu0 %v5008_v12 }
 0x417   : > { %v4301_v6 = vpop.f32.mrf.mxu0 }
 0x418   : > { %v4302_v4 = vadd.f32 %v4301_v6, %v4231_v50 }
 0x419   : > { %v4303_v14 = vpop.f32.mrf.mxu0 }
 0x42b   : > { %v4374_v24 = vpop.f32.mrf.mxu1 }
 0x42c   : > { %v4378_v41 = vadd.f32 %v4374_v24, %v4302_v4 }
 0x42d   : > { %v4376_v10 = vpop.f32.mrf.mxu1 }
 0x42e   : > { %v4379_v61 = vadd.f32 %v4378_v41, %v9463_v2 }
 0x430   : > { %v4380_v21 = vmax.f32 %v4379_v61, 0.0  ;;  %v4477_v32 = vpop.f32.mrf.mxu0 }
 0x432   : > { %v5490_v17 = vpop.f32.mrf.mxu0  ;;  %5678 = vmatmul.mubr.msk.f32.vlgmr.msra.gmra.mxu1 %vm405_vm0, %v4380_v21 }
 0x445   : > { %v4550_v2 = vpop.f32.mrf.mxu1 }
 0x446   : > { %v4551_v54 = vadd.f32 %v4550_v2, %v4477_v32 }
 0x447   : > { %v5517_v49 = vpop.f32.mrf.mxu1 }
 0x448   : > { %v4554_v13 = vadd.f32 %v4551_v54, %v4381_v33 }
 0x44a   : > { %v4637_v34 = vpop.f32.mrf.mxu0  ;;  %v4555_v44 = vmax.f32 %v4554_v13, 0.0 }
 0x44c   : > { %v5544_v7 = vpop.f32.mrf.mxu0 }
 0x45f   : > { %v4707_v42 = vpop.f32.mrf.mxu1 }
 0x460   : > { %v4708_v18 = vadd.f32 %v4707_v42, %v4637_v34 }
 0x461   : > { %v5571_v22 = vpop.f32.mrf.mxu1 }
 0x469   : > { %v4780_v63 = vpop.f32.mrf.mxu0 }
 0x46a   : > { %v4784_v62 = vadd.f32 %v4780_v63, %v4708_v18 }
 0x46b   : > { %v5598_v40 = vpop.f32.mrf.mxu0 }
 0x46c   : > { %v4785_v26 = vadd.f32 %v4784_v62, %v4381_v33 }
 0x46e   : > { %v4786_v20 = vmax.f32 %v4785_v26, 0.0 }
 0x470   : > { %v5006_v31 = vadd.f32 %v4786_v20, %v4555_v44 }
 0x481   : > { %v4926_v36 = vpop.f32.mrf.mxu0 }
 0x483   : > { %v5652_v37 = vpop.f32.mrf.mxu0 }
 0x4b0   : > { %v4856_v57 = vpop.f32.mrf.mxu1 }
 0x4b1   : > { %v4927_v52 = vadd.f32 %v4926_v36, %v4856_v57 }
 0x4b2   : > { %v5625_v27 = vpop.f32.mrf.mxu1 }
 0x4f2   : > { %v4999_v38 = vpop.f32.mrf.mxu1 }
 0x4f3   : > { %v5003_v28 = vadd.f32 %v4999_v38, %v4927_v52 }
 0x4f4   : > { %v5679_v1 = vpop.f32.mrf.mxu1 }
 0x4f5   : > { %v5004_v53 = vadd.f32 %v5003_v28, %v4381_v33 }
 0x4f7   : > { %v5005_v45 = vmax.f32 %v5004_v53, 0.0 }
 0x4f9   : > { %v5007_v19 = vadd.f32 %v5006_v31, %v5005_v45 }
 0x4fb   : > { %5695 = vmatmul.mubr.msk.f32.vlgmr.msra.gmra.mxu0 %vm5016_vm4, %v5007_v19 }
 0x5bb   : > { %v5090_v9 = vpop.f32.mrf.mxu0 }
 0x5bc   : > { %v5091_v56 = vadd.f32 %v5090_v9, %v5015_v60 }
 0x5bd   : > { %v5696_v39 = vpop.f32.mrf.mxu0 }
 0x5be   : > { %5095 = vst.msk [vmem:[%s324_s24] sm:$0x1] %vm5094_vm5, %v5091_v56 }
 0x5bf   : > { %5889 = shalt.err (!%p5886_p3)
}
 0x5c0   : > { %s5890_s21 = scalar_lea.hbm %s9858_s16, 16  ;;  %s5894_s24 = scalar_lea.hbm %s9902_s9, 32 }
 0x5c1   : > { %p5891_p4 = scmp.ne.s32.totalorder %s9858_s16, %s5890_s21  ;;  %p5895_p9 = scmp.lt.s32.totalorder %s9858_s16, %s9902_s9 }
 0x5c2   : > { %p5896_p10 = scmp.lt.s32.totalorder %s5894_s24, %s5890_s21 }
 0x5c3   : > { %p5892_p7 = pnand %p5891_p4, %p6029_p5 }
 0x5c4   : > { %p5897_p11 = por %p5896_p10, %p5895_p9 }
 0x5c5   : > { %p5893_p8 = pneg %p5892_p7 }
 0x5c7   : > { %p5898_p12 = pnand %p5897_p11, %p5893_p8 }
 0x5c9   : > { %5901 = shalt.err (!%p5898_p12)
}
 0x5ca   : > { %5697 = dma.vmem_to_hbm [thread:$0]  (%p6029_p5), %s5110_s25, 16, %s9858_s16, %s5097_s28  }
 0x5cb PF: > { %p5703_p13 = scmp.ge.s32.totalorder %s5936_s12, 2  ;;  %s5121_s23 = sand.u32 1, %s5924_s30  }
 0x5cc   : > { %s5122_s13 = scalar_lea.sflag [#allocation3], %s5121_s23 }
 0x5cd   : > { %p5700_p0 = pnand %p5703_p13, %p6033_p6 }
 0x5cf   : > { %p5701_p1 = pneg %p5700_p0 }
 0x5d1   : > { %5919 = dma.done.wait (%p5701_p1), %s5122_s13, 16  }
 0x5d2   : > { %5921 = vsyncadd (%p5701_p1), %s5122_s13, 4294967280  ;;  %p19_p2 = scmp.ge.s32.totalorder %s6016_s15, 4   ;;  %s10349_s30 = smov %s5928_s10 }
 0x5d3   : > { %s10350_s10 = smov %s5932_s11  ;;  %s10351_s11 = smov %s6027_s18 }
 0x5d4   : > { %s10352_s12 = smov %s6016_s15  ;;  %21 = sbr.rel (!%p19_p2) target bundleno = 3 (0x3), region = 97 }
 0x5d9   :  { %5126 = vsyncpa [#allocation3], 1 }
 0x5da   :  { %5128 = vsyncpa [#allocation3 + $0x1], 1 }

</bundles_post_ra>
